<compile_context>
chip_gen: v6e
topology: v6e:2x2x1
jax: 0.10.0
libtpu: 0.0.40
codegen_flags: <defaults>
</compile_context>

<pallas_src>
import functools

import jax
import jax.numpy as jnp
from jax.experimental import pallas as pl
from jax.experimental.pallas import tpu as pltpu

EPS = 1e-5
_VMEM_LIMIT = 32 * 1024 * 1024  # explicit scoped-VMEM budget (safe on v5e/v6e/v7x)


# -----------------------------------------------------------------------------
# Shared in-kernel helpers
# -----------------------------------------------------------------------------
def _conv3x3_mxu(tap, w_ref, h, w):
    """im2col over a zero-padded window source + a single MXU matmul.

    tap(dh, dw) must return the (h, w, C) shifted window of the padded input.
    Returns the conv output as (Cout, H*W) float32 (spatial on the lane axis).
    """
    hw = h * w
    cols = []
    for dh in range(3):
        for dw in range(3):
            t = tap(dh, dw)                                   # (h, w, C)
            cols.append(t.reshape(hw, t.shape[-1]))           # (H*W, C)
    patches_t = jnp.concatenate(cols, axis=1)                 # (H*W, 9*C)
    # (Cout, K) contracted with (H*W, K) -> (Cout, H*W)
    return jax.lax.dot_general(
        w_ref[...], patches_t,
        dimension_numbers=(((1,), (1,)), ((), ())),
        preferred_element_type=jnp.float32)


def _block_stats(y):
    """Per-batch-block BN statistics: [:, 0] = mean, [:, 1] = centered sum-of-squares."""
    mean = jnp.mean(y, axis=1, keepdims=True)                 # (Cout, 1)
    d = y - mean
    m2 = jnp.sum(d * d, axis=1, keepdims=True)                # (Cout, 1)
    return jnp.concatenate([mean, m2], axis=1)                # (Cout, 2)


# -----------------------------------------------------------------------------
# Kernel 1: conv1 (3x3, padding=1, no bias) + per-block BN1 statistics
# -----------------------------------------------------------------------------
def _conv1_stats_kernel(x_ref, w_ref, y_ref, stats_ref):
    # x_ref     : (1, H+2, W+2, Cin)  zero-padded NHWC block (one batch element)
    # w_ref     : (Cout, 9*Cin)       weight slab, column = (dh*3 + dw)*Cin + cin
    # y_ref     : (1, Cout, H*W)      pre-BN conv output (f32), lane axis = spatial
    # stats_ref : (1, Cout, 2)        per-block (mean, centered SS)
    _, hp, wp, _ = x_ref.shape
    h, w = hp - 2, wp - 2
    y = _conv3x3_mxu(lambda dh, dw: x_ref[0, dh:dh + h, dw:dw + w, :], w_ref, h, w)
    y_ref[0] = y
    stats_ref[0] = _block_stats(y)


def _conv1_stats(x_pad_nhwc, w_slab):
    n, hp, wp, cin = x_pad_nhwc.shape
    h, w = hp - 2, wp - 2
    hw = h * w
    cout, k = w_slab.shape
    return pl.pallas_call(
        _conv1_stats_kernel,
        out_shape=(jax.ShapeDtypeStruct((n, cout, hw), jnp.float32),
                   jax.ShapeDtypeStruct((n, cout, 2), jnp.float32)),
        grid=(n,),
        in_specs=[pl.BlockSpec((1, hp, wp, cin), lambda i: (i, 0, 0, 0)),
                  pl.BlockSpec((cout, k), lambda i: (0, 0))],
        out_specs=(pl.BlockSpec((1, cout, hw), lambda i: (i, 0, 0)),
                   pl.BlockSpec((1, cout, 2), lambda i: (i, 0, 0))),
        compiler_params=pltpu.CompilerParams(
            dimension_semantics=("parallel",),
            vmem_limit_bytes=_VMEM_LIMIT),
    )(x_pad_nhwc, w_slab)


# -----------------------------------------------------------------------------
# Kernel 2 (fused): BN1 affine + ReLU1 + re-pad (VMEM scratch) + conv2 + BN2 statistics
# -----------------------------------------------------------------------------
def _bn_relu_conv_stats_kernel(y1_ref, scale_ref, shift_ref, w_ref,
                               y2_ref, stats_ref, scr):
    # y1_ref    : (1, Cout, H*W) f32 pre-BN conv1 output
    # scale/shift: (Cout, 1) f32 folded BN1 parameters
    # w_ref     : (Cout, 9*Cout) conv2 weight slab
    # y2_ref    : (1, Cout, H*W) f32 pre-BN conv2 output
    # stats_ref : (1, Cout, 2)   per-block BN2 statistics
    # scr       : (H+2, W+2, Cout) VMEM scratch, zero-padded NHWC activation for conv2
    hp, wp, cout = scr.shape
    h, w = hp - 2, wp - 2

    # BN1 + ReLU1 in f32, cast to the MXU compute dtype.
    a = jnp.maximum(y1_ref[0] * scale_ref[...] + shift_ref[...], 0.0)   # (Cout, H*W)
    a_hwc = a.astype(scr.dtype).T.reshape(h, w, cout)                   # (H, W, Cout)

    # Re-pad into VMEM scratch: interior + 1-pixel halo only (no full-buffer fill,
    # no HBM round-trip).  Halo is re-zeroed every step (scratch persists per core).
    scr[1:h + 1, 1:w + 1, :] = a_hwc
    zrow = jnp.zeros((wp, cout), scr.dtype)
    zcol = jnp.zeros((hp, cout), scr.dtype)
    scr[0, :, :] = zrow
    scr[h + 1, :, :] = zrow
    scr[:, 0, :] = zcol
    scr[:, w + 1, :] = zcol

    # conv2 as one im2col matmul straight out of the scratch buffer.
    y2 = _conv3x3_mxu(lambda dh, dw: scr[dh:dh + h, dw:dw + w, :], w_ref, h, w)
    y2_ref[0] = y2
    stats_ref[0] = _block_stats(y2)


def _bn_relu_conv_stats(y1, scale, shift, w_slab, h, w, compute_dtype):
    n, cout, hw = y1.shape
    k = w_slab.shape[1]
    hp, wp = h + 2, w + 2
    return pl.pallas_call(
        _bn_relu_conv_stats_kernel,
        out_shape=(jax.ShapeDtypeStruct((n, cout, hw), jnp.float32),
                   jax.ShapeDtypeStruct((n, cout, 2), jnp.float32)),
        grid=(n,),
        in_specs=[pl.BlockSpec((1, cout, hw), lambda i: (i, 0, 0)),
                  pl.BlockSpec((cout, 1), lambda i: (0, 0)),
                  pl.BlockSpec((cout, 1), lambda i: (0, 0)),
                  pl.BlockSpec((cout, k), lambda i: (0, 0))],
        out_specs=(pl.BlockSpec((1, cout, hw), lambda i: (i, 0, 0)),
                   pl.BlockSpec((1, cout, 2), lambda i: (i, 0, 0))),
        scratch_shapes=[pltpu.VMEM((hp, wp, cout), compute_dtype)],
        compiler_params=pltpu.CompilerParams(
            dimension_semantics=("parallel",),
            vmem_limit_bytes=_VMEM_LIMIT),
    )(y1, scale, shift, w_slab)


# -----------------------------------------------------------------------------
# Kernel 3: BN2 affine + ReLU2, emitted NCHW-flat (lane-dense last dim = H*W)
# -----------------------------------------------------------------------------
def _bn_relu_out_kernel(y_ref, scale_ref, shift_ref, out_ref):
    a = jnp.maximum(y_ref[0] * scale_ref[...] + shift_ref[...], 0.0)    # (Cout, H*W)
    out_ref[0] = a.astype(out_ref.dtype)


def _bn_relu_out(y, scale, shift, out_dtype):
    n, cout, hw = y.shape
    return pl.pallas_call(
        _bn_relu_out_kernel,
        out_shape=jax.ShapeDtypeStruct((n, cout, hw), out_dtype),
        grid=(n,),
        in_specs=[pl.BlockSpec((1, cout, hw), lambda i: (i, 0, 0)),
                  pl.BlockSpec((cout, 1), lambda i: (0, 0)),
                  pl.BlockSpec((cout, 1), lambda i: (0, 0))],
        out_specs=pl.BlockSpec((1, cout, hw), lambda i: (i, 0, 0)),
        compiler_params=pltpu.CompilerParams(
            dimension_semantics=("parallel",),
            vmem_limit_bytes=_VMEM_LIMIT),
    )(y, scale, shift)


# -----------------------------------------------------------------------------
# O(N*Cout) XLA glue: combine per-block stats -> per-channel BN scale/shift
# -----------------------------------------------------------------------------
def _fold_bn(stats, gamma, beta, hw):
    # Chan/Welford combination of per-batch-block (mean, centered-SS) into global batch
    # statistics (biased variance), folded with gamma/beta into scale/shift.
    n = stats.shape[0]
    means = stats[:, :, 0]                                              # (N, Cout)
    m2s = stats[:, :, 1]                                                # (N, Cout)
    mean = jnp.mean(means, axis=0)                                      # (Cout,)
    var = (jnp.sum(m2s, axis=0)
           + hw * jnp.sum((means - mean) ** 2, axis=0)) / (n * hw)      # biased variance
    scale = gamma * jax.lax.rsqrt(var + EPS)
    shift = beta - mean * scale
    cout = gamma.shape[0]
    return (scale.reshape(cout, 1).astype(jnp.float32),
            shift.reshape(cout, 1).astype(jnp.float32))


@functools.partial(jax.jit, static_argnames=("compute_dtype",))
def double_convolution(x_nchw, w1, g1, b1, w2, g2, b2, *, compute_dtype=jnp.bfloat16):
    """Pallas implementation of DoubleConvolution.forward (training-mode BatchNorm)."""
    n, cin, h, w = x_nchw.shape
    cout = w1.shape[0]
    hw = h * w

    # Wrapper glue (input side only): layout + dtype prep for conv1 and the weight slabs.
    x_pad = jnp.pad(jnp.transpose(x_nchw, (0, 2, 3, 1)),
                    ((0, 0), (1, 1), (1, 1), (0, 0))).astype(compute_dtype)
    # PyTorch (Cout, Cin, 3, 3) -> (Cout, 9*Cin), column = (dh*3 + dw)*Cin + cin.
    w1_slab = jnp.transpose(w1, (0, 2, 3, 1)).reshape(cout, 9 * cin).astype(compute_dtype)
    w2_slab = jnp.transpose(w2, (0, 2, 3, 1)).reshape(cout, 9 * cout).astype(compute_dtype)

    # Stage 1: conv1 + per-block BN1 stats.
    y1, stats1 = _conv1_stats(x_pad, w1_slab)
    scale1, shift1 = _fold_bn(stats1, g1.astype(jnp.float32), b1.astype(jnp.float32), hw)

    # Stage 2 (fused): BN1+ReLU1 apply + re-pad (VMEM scratch) + conv2 + BN2 stats.
    y2, stats2 = _bn_relu_conv_stats(y1, scale1, shift1, w2_slab, h, w, compute_dtype)
    scale2, shift2 = _fold_bn(stats2, g2.astype(jnp.float32), b2.astype(jnp.float32), hw)

    # Stage 3: BN2+ReLU2 apply, NCHW-flat lane-dense store.
    out_flat = _bn_relu_out(y2, scale2, shift2, x_nchw.dtype)
    return out_flat.reshape(n, cout, h, w)


def _reference(x, w1, g1, b1, w2, g2, b2):
    """Pure-JAX reference matching PyTorch semantics (training-mode BN)."""
    def conv(x, w):
        return jax.lax.conv_general_dilated(
            x, w, window_strides=(1, 1), padding="SAME",
            dimension_numbers=("NCHW", "OIHW", "NCHW"))

    def bn_relu(y, g, b):
        mean = jnp.mean(y, axis=(0, 2, 3), keepdims=True)
        var = jnp.mean((y - mean) ** 2, axis=(0, 2, 3), keepdims=True)
        yn = (y - mean) * jax.lax.rsqrt(var + EPS)
        yn = yn * g.reshape(1, -1, 1, 1) + b.reshape(1, -1, 1, 1)
        return jnp.maximum(yn, 0.0)

    y = bn_relu(conv(x, w1), g1, b1)
    y = bn_relu(conv(y, w2), g2, b2)
    return y


if __name__ == "__main__":
    N, Cin, Cout, H, W = 2, 4, 8, 16, 16
    key = jax.random.PRNGKey(0)
    kx, k1, k2 = jax.random.split(key, 3)

    x = jax.random.normal(kx, (N, Cin, H, W), dtype=jnp.float32)
    # Conv2d weights (no bias); BN gamma=1, beta=0 (PyTorch default init).
    w1 = jax.random.normal(k1, (Cout, Cin, 3, 3), dtype=jnp.float32) * 0.1
    w2 = jax.random.normal(k2, (Cout, Cout, 3, 3), dtype=jnp.float32) * 0.1
    g1 = jnp.ones((Cout,), jnp.float32)
    b1 = jnp.zeros((Cout,), jnp.float32)
    g2 = jnp.ones((Cout,), jnp.float32)
    b2 = jnp.zeros((Cout,), jnp.float32)

    ref = _reference(x, w1, g1, b1, w2, g2, b2)

    # f32 compute path: tight correctness check of the math.
    out_f32 = jax.block_until_ready(
        double_convolution(x, w1, g1, b1, w2, g2, b2, compute_dtype=jnp.float32))
    assert out_f32.shape == (N, Cout, H, W)
    assert jnp.allclose(out_f32, ref, atol=5e-4, rtol=5e-4)

    # bf16 MXU path (default): loose check consistent with bf16 rounding.
    out_bf16 = jax.block_until_ready(double_convolution(x, w1, g1, b1, w2, g2, b2))
    assert out_bf16.shape == (N, Cout, H, W)
    assert jnp.allclose(out_bf16, ref, atol=1e-1, rtol=1e-1)

    print("KERNEL_OK")
</pallas_src>

<mosaic_0001>
module attributes {stable_mosaic.version = 11 : i64} {
  func.func @_conv1_stats_kernel(%arg0: i32, %arg1: memref<1x18x18x4xf32, #tpu.memory_space<vmem>>, %arg2: memref<8x36xf32, #tpu.memory_space<vmem>>, %arg3: memref<1x8x256xf32, #tpu.memory_space<vmem>>, %arg4: memref<1x8x2xf32, #tpu.memory_space<vmem>>) attributes {dimension_semantics = [#tpu.dimension_semantics<parallel>], iteration_bounds = array<i64: 2>, scalar_prefetch = 0 : i64, scratch_operands = 0 : i64, tpu.core_type = #tpu.core_type<tc>, window_params = [{transform_indices = @transform_0, window_bounds = array<i64: 1, 18, 18, 4>}, {pipeline_mode = #tpu.pipeline_mode<synchronous>, transform_indices = @transform_1, window_bounds = array<i64: 8, 36>}, {transform_indices = @transform_2, window_bounds = array<i64: 1, 8, 256>}, {transform_indices = @transform_3, window_bounds = array<i64: 1, 8, 2>}]} {
    %c0 = arith.constant 0 : index
    %c0_0 = arith.constant 0 : index
    %c0_1 = arith.constant 0 : index
    %c0_2 = arith.constant 0 : index
    %0 = vector.load %arg1[%c0, %c0_0, %c0_1, %c0_2] : memref<1x18x18x4xf32, #tpu.memory_space<vmem>>, vector<1x16x16x4xf32>
    %1 = vector.shape_cast %0 : vector<1x16x16x4xf32> to vector<16x16x4xf32>
    %2 = vector.shape_cast %1 : vector<16x16x4xf32> to vector<256x4xf32>
    %c0_3 = arith.constant 0 : index
    %c0_4 = arith.constant 0 : index
    %c1 = arith.constant 1 : index
    %c0_5 = arith.constant 0 : index
    %3 = vector.load %arg1[%c0_3, %c0_4, %c1, %c0_5] : memref<1x18x18x4xf32, #tpu.memory_space<vmem>>, vector<1x16x16x4xf32>
    %4 = vector.shape_cast %3 : vector<1x16x16x4xf32> to vector<16x16x4xf32>
    %5 = vector.shape_cast %4 : vector<16x16x4xf32> to vector<256x4xf32>
    %c0_6 = arith.constant 0 : index
    %c0_7 = arith.constant 0 : index
    %c2 = arith.constant 2 : index
    %c0_8 = arith.constant 0 : index
    %6 = vector.load %arg1[%c0_6, %c0_7, %c2, %c0_8] : memref<1x18x18x4xf32, #tpu.memory_space<vmem>>, vector<1x16x16x4xf32>
    %7 = vector.shape_cast %6 : vector<1x16x16x4xf32> to vector<16x16x4xf32>
    %8 = vector.shape_cast %7 : vector<16x16x4xf32> to vector<256x4xf32>
    %c0_9 = arith.constant 0 : index
    %c1_10 = arith.constant 1 : index
    %c0_11 = arith.constant 0 : index
    %c0_12 = arith.constant 0 : index
    %9 = vector.load %arg1[%c0_9, %c1_10, %c0_11, %c0_12] : memref<1x18x18x4xf32, #tpu.memory_space<vmem>>, vector<1x16x16x4xf32>
    %10 = vector.shape_cast %9 : vector<1x16x16x4xf32> to vector<16x16x4xf32>
    %11 = vector.shape_cast %10 : vector<16x16x4xf32> to vector<256x4xf32>
    %c0_13 = arith.constant 0 : index
    %c1_14 = arith.constant 1 : index
    %c1_15 = arith.constant 1 : index
    %c0_16 = arith.constant 0 : index
    %12 = vector.load %arg1[%c0_13, %c1_14, %c1_15, %c0_16] : memref<1x18x18x4xf32, #tpu.memory_space<vmem>>, vector<1x16x16x4xf32>
    %13 = vector.shape_cast %12 : vector<1x16x16x4xf32> to vector<16x16x4xf32>
    %14 = vector.shape_cast %13 : vector<16x16x4xf32> to vector<256x4xf32>
    %c0_17 = arith.constant 0 : index
    %c1_18 = arith.constant 1 : index
    %c2_19 = arith.constant 2 : index
    %c0_20 = arith.constant 0 : index
    %15 = vector.load %arg1[%c0_17, %c1_18, %c2_19, %c0_20] : memref<1x18x18x4xf32, #tpu.memory_space<vmem>>, vector<1x16x16x4xf32>
    %16 = vector.shape_cast %15 : vector<1x16x16x4xf32> to vector<16x16x4xf32>
    %17 = vector.shape_cast %16 : vector<16x16x4xf32> to vector<256x4xf32>
    %c0_21 = arith.constant 0 : index
    %c2_22 = arith.constant 2 : index
    %c0_23 = arith.constant 0 : index
    %c0_24 = arith.constant 0 : index
    %18 = vector.load %arg1[%c0_21, %c2_22, %c0_23, %c0_24] : memref<1x18x18x4xf32, #tpu.memory_space<vmem>>, vector<1x16x16x4xf32>
    %19 = vector.shape_cast %18 : vector<1x16x16x4xf32> to vector<16x16x4xf32>
    %20 = vector.shape_cast %19 : vector<16x16x4xf32> to vector<256x4xf32>
    %c0_25 = arith.constant 0 : index
    %c2_26 = arith.constant 2 : index
    %c1_27 = arith.constant 1 : index
    %c0_28 = arith.constant 0 : index
    %21 = vector.load %arg1[%c0_25, %c2_26, %c1_27, %c0_28] : memref<1x18x18x4xf32, #tpu.memory_space<vmem>>, vector<1x16x16x4xf32>
    %22 = vector.shape_cast %21 : vector<1x16x16x4xf32> to vector<16x16x4xf32>
    %23 = vector.shape_cast %22 : vector<16x16x4xf32> to vector<256x4xf32>
    %c0_29 = arith.constant 0 : index
    %c2_30 = arith.constant 2 : index
    %c2_31 = arith.constant 2 : index
    %c0_32 = arith.constant 0 : index
    %24 = vector.load %arg1[%c0_29, %c2_30, %c2_31, %c0_32] : memref<1x18x18x4xf32, #tpu.memory_space<vmem>>, vector<1x16x16x4xf32>
    %25 = vector.shape_cast %24 : vector<1x16x16x4xf32> to vector<16x16x4xf32>
    %26 = vector.shape_cast %25 : vector<16x16x4xf32> to vector<256x4xf32>
    %27 = tpu.concatenate %2, %5, %8, %11, %14, %17, %20, %23, %26 in 1 : vector<256x4xf32>, vector<256x4xf32>, vector<256x4xf32>, vector<256x4xf32>, vector<256x4xf32>, vector<256x4xf32>, vector<256x4xf32>, vector<256x4xf32>, vector<256x4xf32> -> vector<256x36xf32>
    %c0_33 = arith.constant 0 : index
    %c0_34 = arith.constant 0 : index
    %28 = vector.load %arg2[%c0_33, %c0_34] : memref<8x36xf32, #tpu.memory_space<vmem>>, vector<8x36xf32>
    %cst = arith.constant dense<0.000000e+00> : vector<8x256xf32>
    %29 = tpu.matmul %28, %27, %cst {dimension_numbers = #tpu.dot_dimension_numbers<[1], [1], [0], [0], [0, 0, 1, 0], [], []>} : vector<8x36xf32>, vector<256x36xf32>, vector<8x256xf32> -> vector<8x256xf32>
    %c0_35 = arith.constant 0 : index
    %c0_36 = arith.constant 0 : index
    %c0_37 = arith.constant 0 : index
    %30 = vector.load %arg3[%c0_35, %c0_36, %c0_37] : memref<1x8x256xf32, #tpu.memory_space<vmem>>, vector<1x8x256xf32>
    %31 = vector.shape_cast %30 : vector<1x8x256xf32> to vector<8x256xf32>
    %32 = vector.shape_cast %29 : vector<8x256xf32> to vector<1x8x256xf32>
    tpu.vector_store %arg3[%c0_35, %c0_36, %c0_37], %32 {strides = array<i32>} : memref<1x8x256xf32, #tpu.memory_space<vmem>>, vector<1x8x256xf32>,
    %cst_38 = arith.constant dense<0.000000e+00> : vector<8xf32>
    %33 = vector.multi_reduction <add>, %29, %cst_38 [1] : vector<8x256xf32> to vector<8xf32>
    %34 = vector.shape_cast %33 : vector<8xf32> to vector<8x1xf32>
    %cst_39 = arith.constant 2.560000e+02 : f32
    %35 = vector.broadcast %cst_39 : f32 to vector<8x1xf32>
    %36 = arith.divf %34, %35 : vector<8x1xf32>
    %37 = vector.broadcast %36 : vector<8x1xf32> to vector<8x256xf32>
    %38 = arith.subf %29, %37 : vector<8x256xf32>
    %39 = arith.mulf %38, %38 : vector<8x256xf32>
    %cst_40 = arith.constant dense<0.000000e+00> : vector<8xf32>
    %40 = vector.multi_reduction <add>, %39, %cst_40 [1] : vector<8x256xf32> to vector<8xf32>
    %41 = vector.shape_cast %40 : vector<8xf32> to vector<8x1xf32>
    %42 = tpu.concatenate %36, %41 in 1 : vector<8x1xf32>, vector<8x1xf32> -> vector<8x2xf32>
    %c0_41 = arith.constant 0 : index
    %c0_42 = arith.constant 0 : index
    %c0_43 = arith.constant 0 : index
    %43 = vector.load %arg4[%c0_41, %c0_42, %c0_43] : memref<1x8x2xf32, #tpu.memory_space<vmem>>, vector<1x8x2xf32>
    %44 = vector.shape_cast %43 : vector<1x8x2xf32> to vector<8x2xf32>
    %45 = vector.shape_cast %42 : vector<8x2xf32> to vector<1x8x2xf32>
    tpu.vector_store %arg4[%c0_41, %c0_42, %c0_43], %45 {strides = array<i32>} : memref<1x8x2xf32, #tpu.memory_space<vmem>>, vector<1x8x2xf32>,
    return
  }
  func.func @transform_0(%arg0: i32) -> (i32, i32, i32, i32) {
    %c0_i32 = arith.constant 0 : i32
    %c0_i32_0 = arith.constant 0 : i32
    %c0_i32_1 = arith.constant 0 : i32
    %c0_i32_2 = arith.constant 0 : i32
    return %arg0, %c0_i32, %c0_i32_0, %c0_i32_1 : i32, i32, i32, i32
  }
  func.func @transform_1(%arg0: i32) -> (i32, i32) {
    %c0_i32 = arith.constant 0 : i32
    %c0_i32_0 = arith.constant 0 : i32
    %c0_i32_1 = arith.constant 0 : i32
    return %c0_i32, %c0_i32_0 : i32, i32
  }
  func.func @transform_2(%arg0: i32) -> (i32, i32, i32) {
    %c0_i32 = arith.constant 0 : i32
    %c0_i32_0 = arith.constant 0 : i32
    %c0_i32_1 = arith.constant 0 : i32
    return %arg0, %c0_i32, %c0_i32_0 : i32, i32, i32
  }
  func.func @transform_3(%arg0: i32) -> (i32, i32, i32) {
    %c0_i32 = arith.constant 0 : i32
    %c0_i32_0 = arith.constant 0 : i32
    %c0_i32_1 = arith.constant 0 : i32
    return %arg0, %c0_i32, %c0_i32_0 : i32, i32, i32
  }
}

module attributes {stable_mosaic.version = 11 : i64} {
  func.func @_bn_relu_conv_stats_kernel(%arg0: i32, %arg1: memref<1x8x256xf32, #tpu.memory_space<vmem>>, %arg2: memref<8x1xf32, #tpu.memory_space<vmem>>, %arg3: memref<8x1xf32, #tpu.memory_space<vmem>>, %arg4: memref<8x72xf32, #tpu.memory_space<vmem>>, %arg5: memref<1x8x256xf32, #tpu.memory_space<vmem>>, %arg6: memref<1x8x2xf32, #tpu.memory_space<vmem>>, %arg7: memref<18x18x8xf32, #tpu.memory_space<vmem>>) attributes {dimension_semantics = [#tpu.dimension_semantics<parallel>], iteration_bounds = array<i64: 2>, scalar_prefetch = 0 : i64, scratch_operands = 1 : i64, tpu.core_type = #tpu.core_type<tc>, window_params = [{transform_indices = @transform_0, window_bounds = array<i64: 1, 8, 256>}, {pipeline_mode = #tpu.pipeline_mode<synchronous>, transform_indices = @transform_1, window_bounds = array<i64: 8, 1>}, {pipeline_mode = #tpu.pipeline_mode<synchronous>, transform_indices = @transform_2, window_bounds = array<i64: 8, 1>}, {pipeline_mode = #tpu.pipeline_mode<synchronous>, transform_indices = @transform_3, window_bounds = array<i64: 8, 72>}, {transform_indices = @transform_4, window_bounds = array<i64: 1, 8, 256>}, {transform_indices = @transform_5, window_bounds = array<i64: 1, 8, 2>}]} {
    %c0 = arith.constant 0 : index
    %c0_0 = arith.constant 0 : index
    %c0_1 = arith.constant 0 : index
    %0 = vector.load %arg1[%c0, %c0_0, %c0_1] : memref<1x8x256xf32, #tpu.memory_space<vmem>>, vector<1x8x256xf32>
    %1 = vector.shape_cast %0 : vector<1x8x256xf32> to vector<8x256xf32>
    %c0_2 = arith.constant 0 : index
    %c0_3 = arith.constant 0 : index
    %2 = vector.load %arg2[%c0_2, %c0_3] : memref<8x1xf32, #tpu.memory_space<vmem>>, vector<8x1xf32>
    %3 = vector.broadcast %2 : vector<8x1xf32> to vector<8x256xf32>
    %4 = arith.mulf %1, %3 : vector<8x256xf32>
    %c0_4 = arith.constant 0 : index
    %c0_5 = arith.constant 0 : index
    %5 = vector.load %arg3[%c0_4, %c0_5] : memref<8x1xf32, #tpu.memory_space<vmem>>, vector<8x1xf32>
    %6 = vector.broadcast %5 : vector<8x1xf32> to vector<8x256xf32>
    %7 = arith.addf %4, %6 : vector<8x256xf32>
    %cst = arith.constant 0.000000e+00 : f32
    %8 = vector.broadcast %cst : f32 to vector<8x256xf32>
    %9 = arith.maximumf %7, %8 : vector<8x256xf32>
    %10 = tpu.transpose %9, [1, 0] : vector<8x256xf32> -> vector<256x8xf32>
    %11 = vector.shape_cast %10 : vector<256x8xf32> to vector<16x16x8xf32>
    %c1 = arith.constant 1 : index
    %c1_6 = arith.constant 1 : index
    %c0_7 = arith.constant 0 : index
    %12 = vector.load %arg7[%c1, %c1_6, %c0_7] : memref<18x18x8xf32, #tpu.memory_space<vmem>>, vector<16x16x8xf32>
    tpu.vector_store %arg7[%c1, %c1_6, %c0_7], %11 {strides = array<i32>} : memref<18x18x8xf32, #tpu.memory_space<vmem>>, vector<16x16x8xf32>,
    %cst_8 = arith.constant 0.000000e+00 : f32
    %13 = vector.broadcast %cst_8 : f32 to vector<18x8xf32>
    %cst_9 = arith.constant 0.000000e+00 : f32
    %14 = vector.broadcast %cst_9 : f32 to vector<18x8xf32>
    %c0_10 = arith.constant 0 : index
    %c0_11 = arith.constant 0 : index
    %c0_12 = arith.constant 0 : index
    %15 = vector.load %arg7[%c0_10, %c0_11, %c0_12] : memref<18x18x8xf32, #tpu.memory_space<vmem>>, vector<1x18x8xf32>
    %16 = vector.shape_cast %15 : vector<1x18x8xf32> to vector<18x8xf32>
    %17 = vector.shape_cast %13 : vector<18x8xf32> to vector<1x18x8xf32>
    tpu.vector_store %arg7[%c0_10, %c0_11, %c0_12], %17 {strides = array<i32>} : memref<18x18x8xf32, #tpu.memory_space<vmem>>, vector<1x18x8xf32>,
    %c17 = arith.constant 17 : index
    %c0_13 = arith.constant 0 : index
    %c0_14 = arith.constant 0 : index
    %18 = vector.load %arg7[%c17, %c0_13, %c0_14] : memref<18x18x8xf32, #tpu.memory_space<vmem>>, vector<1x18x8xf32>
    %19 = vector.shape_cast %18 : vector<1x18x8xf32> to vector<18x8xf32>
    %20 = vector.shape_cast %13 : vector<18x8xf32> to vector<1x18x8xf32>
    tpu.vector_store %arg7[%c17, %c0_13, %c0_14], %20 {strides = array<i32>} : memref<18x18x8xf32, #tpu.memory_space<vmem>>, vector<1x18x8xf32>,
    %c0_15 = arith.constant 0 : index
    %c0_16 = arith.constant 0 : index
    %c0_17 = arith.constant 0 : index
    %21 = vector.load %arg7[%c0_15, %c0_16, %c0_17] : memref<18x18x8xf32, #tpu.memory_space<vmem>>, vector<18x1x8xf32>
    %22 = vector.shape_cast %21 : vector<18x1x8xf32> to vector<18x8xf32>
    %23 = vector.shape_cast %14 : vector<18x8xf32> to vector<18x1x8xf32>
    tpu.vector_store %arg7[%c0_15, %c0_16, %c0_17], %23 {strides = array<i32>} : memref<18x18x8xf32, #tpu.memory_space<vmem>>, vector<18x1x8xf32>,
    %c0_18 = arith.constant 0 : index
    %c17_19 = arith.constant 17 : index
    %c0_20 = arith.constant 0 : index
    %24 = vector.load %arg7[%c0_18, %c17_19, %c0_20] : memref<18x18x8xf32, #tpu.memory_space<vmem>>, vector<18x1x8xf32>
    %25 = vector.shape_cast %24 : vector<18x1x8xf32> to vector<18x8xf32>
    %26 = vector.shape_cast %14 : vector<18x8xf32> to vector<18x1x8xf32>
    tpu.vector_store %arg7[%c0_18, %c17_19, %c0_20], %26 {strides = array<i32>} : memref<18x18x8xf32, #tpu.memory_space<vmem>>, vector<18x1x8xf32>,
    %c0_21 = arith.constant 0 : index
    %c0_22 = arith.constant 0 : index
    %c0_23 = arith.constant 0 : index
    %27 = vector.load %arg7[%c0_21, %c0_22, %c0_23] : memref<18x18x8xf32, #tpu.memory_space<vmem>>, vector<16x16x8xf32>
    %28 = vector.shape_cast %27 : vector<16x16x8xf32> to vector<256x8xf32>
    %c0_24 = arith.constant 0 : index
    %c1_25 = arith.constant 1 : index
    %c0_26 = arith.constant 0 : index
    %29 = vector.load %arg7[%c0_24, %c1_25, %c0_26] : memref<18x18x8xf32, #tpu.memory_space<vmem>>, vector<16x16x8xf32>
    %30 = vector.shape_cast %29 : vector<16x16x8xf32> to vector<256x8xf32>
    %c0_27 = arith.constant 0 : index
    %c2 = arith.constant 2 : index
    %c0_28 = arith.constant 0 : index
    %31 = vector.load %arg7[%c0_27, %c2, %c0_28] : memref<18x18x8xf32, #tpu.memory_space<vmem>>, vector<16x16x8xf32>
    %32 = vector.shape_cast %31 : vector<16x16x8xf32> to vector<256x8xf32>
    %c1_29 = arith.constant 1 : index
    %c0_30 = arith.constant 0 : index
    %c0_31 = arith.constant 0 : index
    %33 = vector.load %arg7[%c1_29, %c0_30, %c0_31] : memref<18x18x8xf32, #tpu.memory_space<vmem>>, vector<16x16x8xf32>
    %34 = vector.shape_cast %33 : vector<16x16x8xf32> to vector<256x8xf32>
    %c1_32 = arith.constant 1 : index
    %c1_33 = arith.constant 1 : index
    %c0_34 = arith.constant 0 : index
    %35 = vector.load %arg7[%c1_32, %c1_33, %c0_34] : memref<18x18x8xf32, #tpu.memory_space<vmem>>, vector<16x16x8xf32>
    %36 = vector.shape_cast %35 : vector<16x16x8xf32> to vector<256x8xf32>
    %c1_35 = arith.constant 1 : index
    %c2_36 = arith.constant 2 : index
    %c0_37 = arith.constant 0 : index
    %37 = vector.load %arg7[%c1_35, %c2_36, %c0_37] : memref<18x18x8xf32, #tpu.memory_space<vmem>>, vector<16x16x8xf32>
    %38 = vector.shape_cast %37 : vector<16x16x8xf32> to vector<256x8xf32>
    %c2_38 = arith.constant 2 : index
    %c0_39 = arith.constant 0 : index
    %c0_40 = arith.constant 0 : index
    %39 = vector.load %arg7[%c2_38, %c0_39, %c0_40] : memref<18x18x8xf32, #tpu.memory_space<vmem>>, vector<16x16x8xf32>
    %40 = vector.shape_cast %39 : vector<16x16x8xf32> to vector<256x8xf32>
    %c2_41 = arith.constant 2 : index
    %c1_42 = arith.constant 1 : index
    %c0_43 = arith.constant 0 : index
    %41 = vector.load %arg7[%c2_41, %c1_42, %c0_43] : memref<18x18x8xf32, #tpu.memory_space<vmem>>, vector<16x16x8xf32>
    %42 = vector.shape_cast %41 : vector<16x16x8xf32> to vector<256x8xf32>
    %c2_44 = arith.constant 2 : index
    %c2_45 = arith.constant 2 : index
    %c0_46 = arith.constant 0 : index
    %43 = vector.load %arg7[%c2_44, %c2_45, %c0_46] : memref<18x18x8xf32, #tpu.memory_space<vmem>>, vector<16x16x8xf32>
    %44 = vector.shape_cast %43 : vector<16x16x8xf32> to vector<256x8xf32>
    %45 = tpu.concatenate %28, %30, %32, %34, %36, %38, %40, %42, %44 in 1 : vector<256x8xf32>, vector<256x8xf32>, vector<256x8xf32>, vector<256x8xf32>, vector<256x8xf32>, vector<256x8xf32>, vector<256x8xf32>, vector<256x8xf32>, vector<256x8xf32> -> vector<256x72xf32>
    %c0_47 = arith.constant 0 : index
    %c0_48 = arith.constant 0 : index
    %46 = vector.load %arg4[%c0_47, %c0_48] : memref<8x72xf32, #tpu.memory_space<vmem>>, vector<8x72xf32>
    %cst_49 = arith.constant dense<0.000000e+00> : vector<8x256xf32>
    %47 = tpu.matmul %46, %45, %cst_49 {dimension_numbers = #tpu.dot_dimension_numbers<[1], [1], [0], [0], [0, 0, 1, 0], [], []>} : vector<8x72xf32>, vector<256x72xf32>, vector<8x256xf32> -> vector<8x256xf32>
    %c0_50 = arith.constant 0 : index
    %c0_51 = arith.constant 0 : index
    %c0_52 = arith.constant 0 : index
    %48 = vector.load %arg5[%c0_50, %c0_51, %c0_52] : memref<1x8x256xf32, #tpu.memory_space<vmem>>, vector<1x8x256xf32>
    %49 = vector.shape_cast %48 : vector<1x8x256xf32> to vector<8x256xf32>
    %50 = vector.shape_cast %47 : vector<8x256xf32> to vector<1x8x256xf32>
    tpu.vector_store %arg5[%c0_50, %c0_51, %c0_52], %50 {strides = array<i32>} : memref<1x8x256xf32, #tpu.memory_space<vmem>>, vector<1x8x256xf32>,
    %cst_53 = arith.constant dense<0.000000e+00> : vector<8xf32>
    %51 = vector.multi_reduction <add>, %47, %cst_53 [1] : vector<8x256xf32> to vector<8xf32>
    %52 = vector.shape_cast %51 : vector<8xf32> to vector<8x1xf32>
    %cst_54 = arith.constant 2.560000e+02 : f32
    %53 = vector.broadcast %cst_54 : f32 to vector<8x1xf32>
    %54 = arith.divf %52, %53 : vector<8x1xf32>
    %55 = vector.broadcast %54 : vector<8x1xf32> to vector<8x256xf32>
    %56 = arith.subf %47, %55 : vector<8x256xf32>
    %57 = arith.mulf %56, %56 : vector<8x256xf32>
    %cst_55 = arith.constant dense<0.000000e+00> : vector<8xf32>
    %58 = vector.multi_reduction <add>, %57, %cst_55 [1] : vector<8x256xf32> to vector<8xf32>
    %59 = vector.shape_cast %58 : vector<8xf32> to vector<8x1xf32>
    %60 = tpu.concatenate %54, %59 in 1 : vector<8x1xf32>, vector<8x1xf32> -> vector<8x2xf32>
    %c0_56 = arith.constant 0 : index
    %c0_57 = arith.constant 0 : index
    %c0_58 = arith.constant 0 : index
    %61 = vector.load %arg6[%c0_56, %c0_57, %c0_58] : memref<1x8x2xf32, #tpu.memory_space<vmem>>, vector<1x8x2xf32>
    %62 = vector.shape_cast %61 : vector<1x8x2xf32> to vector<8x2xf32>
    %63 = vector.shape_cast %60 : vector<8x2xf32> to vector<1x8x2xf32>
    tpu.vector_store %arg6[%c0_56, %c0_57, %c0_58], %63 {strides = array<i32>} : memref<1x8x2xf32, #tpu.memory_space<vmem>>, vector<1x8x2xf32>,
    return
  }
  func.func @transform_0(%arg0: i32) -> (i32, i32, i32) {
    %c0_i32 = arith.constant 0 : i32
    %c0_i32_0 = arith.constant 0 : i32
    %c0_i32_1 = arith.constant 0 : i32
    return %arg0, %c0_i32, %c0_i32_0 : i32, i32, i32
  }
  func.func @transform_1(%arg0: i32) -> (i32, i32) {
    %c0_i32 = arith.constant 0 : i32
    %c0_i32_0 = arith.constant 0 : i32
    %c0_i32_1 = arith.constant 0 : i32
    return %c0_i32, %c0_i32_0 : i32, i32
  }
  func.func @transform_2(%arg0: i32) -> (i32, i32) {
    %c0_i32 = arith.constant 0 : i32
    %c0_i32_0 = arith.constant 0 : i32
    %c0_i32_1 = arith.constant 0 : i32
    return %c0_i32, %c0_i32_0 : i32, i32
  }
  func.func @transform_3(%arg0: i32) -> (i32, i32) {
    %c0_i32 = arith.constant 0 : i32
    %c0_i32_0 = arith.constant 0 : i32
    %c0_i32_1 = arith.constant 0 : i32
    return %c0_i32, %c0_i32_0 : i32, i32
  }
  func.func @transform_4(%arg0: i32) -> (i32, i32, i32) {
    %c0_i32 = arith.constant 0 : i32
    %c0_i32_0 = arith.constant 0 : i32
    %c0_i32_1 = arith.constant 0 : i32
    return %arg0, %c0_i32, %c0_i32_0 : i32, i32, i32
  }
  func.func @transform_5(%arg0: i32) -> (i32, i32, i32) {
    %c0_i32 = arith.constant 0 : i32
    %c0_i32_0 = arith.constant 0 : i32
    %c0_i32_1 = arith.constant 0 : i32
    return %arg0, %c0_i32, %c0_i32_0 : i32, i32, i32
  }
}

module attributes {stable_mosaic.version = 11 : i64} {
  func.func @_bn_relu_out_kernel(%arg0: i32, %arg1: memref<1x8x256xf32, #tpu.memory_space<vmem>>, %arg2: memref<8x1xf32, #tpu.memory_space<vmem>>, %arg3: memref<8x1xf32, #tpu.memory_space<vmem>>, %arg4: memref<1x8x256xf32, #tpu.memory_space<vmem>>) attributes {dimension_semantics = [#tpu.dimension_semantics<parallel>], iteration_bounds = array<i64: 2>, scalar_prefetch = 0 : i64, scratch_operands = 0 : i64, tpu.core_type = #tpu.core_type<tc>, window_params = [{transform_indices = @transform_0, window_bounds = array<i64: 1, 8, 256>}, {pipeline_mode = #tpu.pipeline_mode<synchronous>, transform_indices = @transform_1, window_bounds = array<i64: 8, 1>}, {pipeline_mode = #tpu.pipeline_mode<synchronous>, transform_indices = @transform_2, window_bounds = array<i64: 8, 1>}, {transform_indices = @transform_3, window_bounds = array<i64: 1, 8, 256>}]} {
    %c0 = arith.constant 0 : index
    %c0_0 = arith.constant 0 : index
    %c0_1 = arith.constant 0 : index
    %0 = vector.load %arg1[%c0, %c0_0, %c0_1] : memref<1x8x256xf32, #tpu.memory_space<vmem>>, vector<1x8x256xf32>
    %1 = vector.shape_cast %0 : vector<1x8x256xf32> to vector<8x256xf32>
    %c0_2 = arith.constant 0 : index
    %c0_3 = arith.constant 0 : index
    %2 = vector.load %arg2[%c0_2, %c0_3] : memref<8x1xf32, #tpu.memory_space<vmem>>, vector<8x1xf32>
    %3 = vector.broadcast %2 : vector<8x1xf32> to vector<8x256xf32>
    %4 = arith.mulf %1, %3 : vector<8x256xf32>
    %c0_4 = arith.constant 0 : index
    %c0_5 = arith.constant 0 : index
    %5 = vector.load %arg3[%c0_4, %c0_5] : memref<8x1xf32, #tpu.memory_space<vmem>>, vector<8x1xf32>
    %6 = vector.broadcast %5 : vector<8x1xf32> to vector<8x256xf32>
    %7 = arith.addf %4, %6 : vector<8x256xf32>
    %cst = arith.constant 0.000000e+00 : f32
    %8 = vector.broadcast %cst : f32 to vector<8x256xf32>
    %9 = arith.maximumf %7, %8 : vector<8x256xf32>
    %c0_6 = arith.constant 0 : index
    %c0_7 = arith.constant 0 : index
    %c0_8 = arith.constant 0 : index
    %10 = vector.load %arg4[%c0_6, %c0_7, %c0_8] : memref<1x8x256xf32, #tpu.memory_space<vmem>>, vector<1x8x256xf32>
    %11 = vector.shape_cast %10 : vector<1x8x256xf32> to vector<8x256xf32>
    %12 = vector.shape_cast %9 : vector<8x256xf32> to vector<1x8x256xf32>
    tpu.vector_store %arg4[%c0_6, %c0_7, %c0_8], %12 {strides = array<i32>} : memref<1x8x256xf32, #tpu.memory_space<vmem>>, vector<1x8x256xf32>,
    return
  }
  func.func @transform_0(%arg0: i32) -> (i32, i32, i32) {
    %c0_i32 = arith.constant 0 : i32
    %c0_i32_0 = arith.constant 0 : i32
    %c0_i32_1 = arith.constant 0 : i32
    return %arg0, %c0_i32, %c0_i32_0 : i32, i32, i32
  }
  func.func @transform_1(%arg0: i32) -> (i32, i32) {
    %c0_i32 = arith.constant 0 : i32
    %c0_i32_0 = arith.constant 0 : i32
    %c0_i32_1 = arith.constant 0 : i32
    return %c0_i32, %c0_i32_0 : i32, i32
  }
  func.func @transform_2(%arg0: i32) -> (i32, i32) {
    %c0_i32 = arith.constant 0 : i32
    %c0_i32_0 = arith.constant 0 : i32
    %c0_i32_1 = arith.constant 0 : i32
    return %c0_i32, %c0_i32_0 : i32, i32
  }
  func.func @transform_3(%arg0: i32) -> (i32, i32, i32) {
    %c0_i32 = arith.constant 0 : i32
    %c0_i32_0 = arith.constant 0 : i32
    %c0_i32_1 = arith.constant 0 : i32
    return %arg0, %c0_i32, %c0_i32_0 : i32, i32, i32
  }
}

</mosaic_0001>

<bundles_post_ra>
// kernel: double_convolution.5
= control target key start
LH: loop header
LB: loop body
LE: loop exit
PB: predicated region body
PF: predicated region fallthrough
CT: control target
= control target key end

     0   :  { %s300_s12 = smov 0   ;;  %s323_s0 = inlined_call_operand.vmem [shape: f32[2,8,256], index: 0, kind: input, shape index: {}]   ;;  %s324_s1 = inlined_call_operand.vmem [shape: f32[8,1], index: 1, kind: input, shape index: {}]   ;;  %s325_s2 = inlined_call_operand.vmem [shape: f32[8,1], index: 2, kind: input, shape index: {}]   ;;  %s326_s3 = inlined_call_operand.vmem [shape: f32[2,8,256], index: 3, kind: output, shape index: {}]  }
   0x1 LB: > { %s248_s13 = sadd.s32 4294967295, %s277_s12   ;;  %p252_p0 = scmp.ge.s32.totalorder %s277_s12, 1  ;;  %s277_s12 = sphi %s300_s12, %s13_s12  }
   0x2   : > { %p137_p1 = scmp.lt.s32.totalorder %s277_s12, 3 }
   0x4   : > { %p138_p2 = pnand %p252_p0, %p137_p1 }
   0x5   : > { %p161_p3 = scmp.lt.s32.totalorder (!%p138_p2), %s248_s13, 1 }
   0x6   : > { %141 = sbr.rel (%p138_p2) target bundleno = 146 (0x92), region = 32 }
   0xb   : > { %v173_v0 = vld [vmem:[%s324_s1] sm:$0xff]  ;;  %v279_v1 = vmov 0   ;;  %s328_s13 = smov (!%p161_p3, %s248_s13), 1 }
   0xc   : > { %270 = vset.pattern.permute.xlu0 %v279_v1  ;;  %v181_v2 = vld [vmem:[%s325_s2] sm:$0xff]  ;;  %s259_s18 = sshll.u32 %s328_s13, 4 }
   0xd   : > { %176 = vperm.xlu0 %270, %v173_v0   ;;  %s165_s21 = scalar_lea.vmem %s323_s0, %s259_s18  ;;  %s170_s24 = scalar_lea.vmem %s326_s3, %s259_s18 }
   0xe   : > { %v171_v4 = vld [vmem:[%s165_s21] sm:$0xff]  ;;  %v172_v5 = vld [vmem:[%s165_s21 + $0x8] sm:$0xff] }
  0x11   : > { %184 = vperm.xlu0 %270, %v181_v2  }
  0x88   : > { %v177_v3 = vpop.permute.xlu0 %176 }
  0x89   : > { %v179_v6 = vmul.f32 %v177_v3, %v171_v4  ;;  %v180_v7 = vmul.f32 %v177_v3, %v172_v5 }
  0x8c   : > { %v185_v8 = vpop.permute.xlu0 %184 }
  0x8d   : > { %v187_v9 = vadd.f32 %v185_v8, %v179_v6  ;;  %v188_v10 = vadd.f32 %v185_v8, %v180_v7 }
  0x8f   : > { %v189_v11 = vmax.f32 %v187_v9, 0.0  ;;  %v190_v12 = vmax.f32 %v188_v10, 0.0 }
  0x91   : > { %191 = vst [vmem:[%s170_s24] sm:$0xff] %v189_v11  ;;  %192 = vst [vmem:[%s170_s24 + $0x8] sm:$0xff] %v190_v12 }
  0x92 PF: > { %s13_s12 = sadd.s32 1, %s277_s12  }
  0x93   : > { %p10_p4 = scmp.ge.s32.totalorder %s13_s12, 4  }
  0x95   :  { %12 = sbr.rel (!%p10_p4) target bundleno = 1 (0x1), region = 62 }

// kernel: double_convolution.3
= control target key start
LH: loop header
LB: loop body
LE: loop exit
PB: predicated region body
PF: predicated region fallthrough
CT: control target
= control target key end

     0   :  { %s2364_s12 = smov 0   ;;  %s3717_s0 = inlined_call_operand.vmem [shape: f32[2,18,18,4], index: 0, kind: input, shape index: {}]   ;;  %s3718_s1 = inlined_call_operand.vmem [shape: f32[8,36], index: 1, kind: input, shape index: {}]   ;;  %s3719_s2 = inlined_call_operand.vmem [shape: f32[2,8,256], index: 2, kind: output, shape index: {0}]   ;;  %s3720_s3 = inlined_call_operand.vmem [shape: f32[2,8,2], index: 3, kind: output, shape index: {1}]  }
   0x1 LB: > { %s2036_s13 = sadd.s32 4294967295, %s2334_s12   ;;  %p2040_p0 = scmp.ge.s32.totalorder %s2334_s12, 1  ;;  %s2334_s12 = sphi %s2364_s12, %s14_s12  }
   0x2   : > { %p140_p1 = scmp.lt.s32.totalorder %s2334_s12, 3 }
   0x4   : > { %p141_p2 = pnand %p2040_p0, %p140_p1 }
   0x6   : > { %144 = sbr.rel (%p141_p2) target bundleno = 1129 (0x469), region = 28 }
   0xb   : > { %p168_p3 = scmp.lt.s32.totalorder %s2036_s13, 1  ;;  %s2336_s18 = smov 4   ;;  %vm1529_vm0 = vcmask 64512   ;;  %vm1496_vm1 = vcmask 31744   ;;  %vm1562_vm2 = vcmask 97280   ;;  %vm1595_vm3 = vcmask 130048  }
   0xc   : > { %s2337_s19 = smov 8   ;;  %s2338_s20 = smov 12   ;;  %vm1628_vm4 = vcmask 162816   ;;  %vm1661_vm5 = vcmask 195584   ;;  %vm1694_vm6 = vcmask 228352   ;;  %vm1727_vm7 = vcmask 261120  }
   0xd   : > { %s3760_s13 = smov (!%p168_p3, %s2036_s13), 1  ;;  %s2339_s21 = smov 16   ;;  %vm1761_vm8 = vcmask 293888   ;;  %vm1946_vm9 = vcmask 7168   ;;  %vm1948_vm10 = vcmask 15360  }
   0xe   : > { %s2307_s14 = smul.u32 432, %s3760_s13  ;;  %s2340_s22 = smov 20  }
   0xf   : > { %s2341_s23 = smov 24   ;;  %s2342_s24 = smov 28  }
  0x10   : > { %s2378_s17 = scalar_lea.vmem %s3717_s0, %s2307_s14  ;;  %s2343_s25 = smov 32  }
  0x11   : > { %v216_v0 = vld [vmem:[%s2378_s17 + $0x19] sm:$0xff]  ;;  %v214_v1 = vld [vmem:[%s2378_s17 + $0x1] sm:$0xff]  ;;  %v215_v3 = vld [vmem:[%s2378_s17 + $0x9] sm:$0xff]  ;;  %s2272_s28 = sshll.u32 %s3760_s13, 4  ;;  %s2044_s5 = sshll.u32 %s3760_s13, 3 }
  0x12   : > { %508 = vrot.lane.b32.xlu1 %v216_v0, %s2336_s18  ;;  %504 = vrot.lane.b32.xlu0 %v214_v1, %s2336_s18  ;;  %v217_v2 = vld [vmem:[%s2378_s17 + $0x21] sm:$0xff]  ;;  %v219_v4 = vld [vmem:[%s2378_s17 + $0x39] sm:$0xff]  ;;  %s177_s4 = scalar_lea.vmem %s3719_s2, %s2272_s28  ;;  %s181_s8 = scalar_lea.vmem %s3720_s3, %s2044_s5 }
  0x13   : > { %v218_v5 = vld [vmem:[%s2378_s17 + $0x31] sm:$0xff]  ;;  %v220_v7 = vld [vmem:[%s2378_s17 + $0x49] sm:$0xff]  ;;  %v222_v9 = vld [vmem:[%s2378_s17 + $0x61] sm:$0xff] }
  0x14   : > { %v221_v6 = vld [vmem:[%s2378_s17 + $0x51] sm:$0xff]  ;;  %v223_v8 = vld [vmem:[%s2378_s17 + $0x69] sm:$0xff]  ;;  %v2401_v10 = vld [vmem:[%s2378_s17 + $0x81] sm:$0xff] }
  0x15   : > { %v2404_v11 = vld [vmem:[%s2378_s17 + $0x79] sm:$0xff]  ;;  %v2414_v13 = vld [vmem:[%s2378_s17 + $0x91] sm:$0xff]  ;;  %v2424_v15 = vld [vmem:[%s2378_s17 + $0xa9] sm:$0xff] }
  0x16   : > { %510 = vrot.lane.b32.xlu1 %v217_v2, %s2336_s18  ;;  %506 = vrot.lane.b32.xlu0 %v215_v3, %s2336_s18  ;;  %v2411_v12 = vld [vmem:[%s2378_s17 + $0x99] sm:$0xff]  ;;  %v2421_v14 = vld [vmem:[%s2378_s17 + $0xb1] sm:$0xff] }
  0x17   : > { %v2431_v16 = vld [vmem:[%s2378_s17 + $0xc9] sm:$0xff]  ;;  %v2434_v17 = vld [vmem:[%s2378_s17 + $0xc1] sm:$0xff]  ;;  %v2442_v19 = vld [vmem:[%s2378_s17 + $0xd9] sm:$0xff] }
  0x18   : > { %v233_v18 = vld [vmem:[%s2378_s17 + $0xe1] sm:$0xff]  ;;  %v235_v20 = vld [vmem:[%s2378_s17 + $0xf9] sm:$0xff]  ;;  %v234_v21 = vld [vmem:[%s2378_s17 + $0xf1] sm:$0xff] }
  0x19   : > { %v237_v22 = vld [vmem:[%s2378_s17 + $0x111] sm:$0xff]  ;;  %v236_v23 = vld [vmem:[%s2378_s17 + $0x109] sm:$0xff]  ;;  %v238_v25 = vld [vmem:[%s2378_s17 + $0x121] sm:$0xff] }
  0x1a   : > { %514 = vrot.lane.b32.xlu1 %v219_v4, %s2336_s18  ;;  %512 = vrot.lane.b32.xlu0 %v218_v5, %s2336_s18  ;;  %v2456_v24 = vld [vmem:[%s2378_s17 + $0x129] sm:$0xff]  ;;  %v2463_v26 = vld [vmem:[%s2378_s17 + $0x171] sm:$0xff] }
  0x1b   : > { %v2466_v27 = vld [vmem:[%s2378_s17 + $0x139] sm:$0xff]  ;;  %v2483_v30 = vld [vmem:[%s2378_s17 + $0xc8] sm:$0xff]  ;;  %v2575_v51 = vld [vmem:[%s2378_s17 + $0x170] sm:$0xff] }
  0x1c   : > { %v2473_v28 = vld [vmem:[%s2378_s17 + $0xb2] sm:$0xff]  ;;  %v2486_v31 = vld [vmem:[%s2378_s17 + $0x188] sm:$0xff]  ;;  %v2172_v38 = vld [vmem:[%s2378_s17 + $0x1a0] sm:$0xff] }
  0x1d   : > { %v2476_v29 = vld [vmem:[%s2378_s17 + $0x172] sm:$0xff]  ;;  %v2493_v32 = vld [vmem:[%s2378_s17 + $0x169] sm:$0xff]  ;;  %v2156_v39 = vld [vmem:[%s2378_s17 + $0xe0] sm:$0xff] }
  0x1e   : > { %518 = vrot.lane.b32.xlu1 %v221_v6, %s2336_s18  ;;  %516 = vrot.lane.b32.xlu0 %v220_v7, %s2336_s18  ;;  %v2496_v33 = vld [vmem:[%s2378_s17 + $0x189] sm:$0xff]  ;;  %v2528_v40 = vld [vmem:[%s2378_s17 + $0x180] sm:$0xff] }
  0x1f   : > { %v2503_v34 = vld [vmem:[%s2378_s17 + $0x18a] sm:$0xff]  ;;  %v2534_v41 = vld [vmem:[%s2378_s17 + $0xc0] sm:$0xff]  ;;  %v2171_v49 = vld [vmem:[%s2378_s17 + $0x198] sm:$0xff] }
  0x20   : > { %v2510_v35 = vld [vmem:[%s2378_s17 + $0xca] sm:$0xff]  ;;  %v2204_v42 = vld [vmem:[%s2378_s17 + $0x1a1] sm:$0xff]  ;;  %v2547_v44 = vld [vmem:[%s2378_s17 + $0x159] sm:$0xff] }
  0x21   : > { %v2513_v36 = vld [vmem:[%s2378_s17 + $0x16a] sm:$0xff]  ;;  %v2541_v43 = vld [vmem:[%s2378_s17 + $0x181] sm:$0xff]  ;;  %v2203_v53 = vld [vmem:[%s2378_s17 + $0x199] sm:$0xff] }
  0x22   : > { %522 = vrot.lane.b32.xlu1 %v223_v8, %s2336_s18  ;;  %520 = vrot.lane.b32.xlu0 %v222_v9, %s2336_s18  ;;  %v2520_v37 = vld [vmem:[%s2378_s17 + $0xaa] sm:$0xff]  ;;  %v2236_v45 = vld [vmem:[%s2378_s17 + $0x1a2] sm:$0xff] }
  0x23   : > { %v2554_v46 = vld [vmem:[%s2378_s17 + $0x182] sm:$0xff]  ;;  %v2561_v47 = vld [vmem:[%s2378_s17 + $0x15a] sm:$0xff]  ;;  %v2589_v55 = vld [vmem:[%s2378_s17 + $0xb0] sm:$0xff] }
  0x24   : > { %v2220_v48 = vld [vmem:[%s2378_s17 + $0xe2] sm:$0xff]  ;;  %v2578_v52 = vld [vmem:[%s2378_s17 + $0x9a] sm:$0xff]  ;;  %v2608_v61 = vld [vmem:[%s2378_s17 + $0x151] sm:$0xff] }
  0x25   : > { %v2569_v50 = vld [vmem:[%s2378_s17 + $0xc2] sm:$0xff]  ;;  %v2155_v54 = vld [vmem:[%s2378_s17 + $0xd8] sm:$0xff] }
  0x26   : > { %526 = vrot.lane.b32.xlu1 %v2401_v10, %s2336_s18  ;;  %524 = vrot.lane.b32.xlu0 %v2404_v11, %s2336_s18  ;;  %v2235_v58 = vld [vmem:[%s2378_s17 + $0x19a] sm:$0xff]  ;;  %v2627_v3 = vld [vmem:[%s2378_s17 + $0x152] sm:$0xff] }
  0x27   : > { %v2219_v0 = vld [vmem:[%s2378_s17 + $0xda] sm:$0xff]  ;;  %v2638_v6 = vld [vmem:[%s2378_s17 + $0x92] sm:$0xff]  ;;  %v2649_v9 = vld [vmem:[%s2378_s17 + $0x168] sm:$0xff] }
  0x2a   : > { %530 = vrot.lane.b32.xlu1 %v2411_v12, %s2336_s18  ;;  %528 = vrot.lane.b32.xlu0 %v2414_v13, %s2336_s18 }
  0x2e   : > { %534 = vrot.lane.b32.xlu1 %v2421_v14, %s2336_s18  ;;  %532 = vrot.lane.b32.xlu0 %v2424_v15, %s2336_s18 }
  0x32   : > { %538 = vrot.lane.b32.xlu1 %v2431_v16, %s2336_s18  ;;  %536 = vrot.lane.b32.xlu0 %v2434_v17, %s2336_s18 }
  0x36   : > { %542 = vrot.lane.b32.xlu1 %v233_v18, %s2336_s18  ;;  %540 = vrot.lane.b32.xlu0 %v2442_v19, %s2336_s18 }
  0x3a   : > { %546 = vrot.lane.b32.xlu1 %v235_v20, %s2336_s18  ;;  %544 = vrot.lane.b32.xlu0 %v234_v21, %s2336_s18  ;;  %v2660_v20 = vld [vmem:[%s2378_s17 + $0xa8] sm:$0xff] }
  0x3e   : > { %550 = vrot.lane.b32.xlu1 %v237_v22, %s2336_s18  ;;  %548 = vrot.lane.b32.xlu0 %v236_v23, %s2336_s18 }
  0x42   : > { %554 = vrot.lane.b32.xlu1 %v2456_v24, %s2336_s18  ;;  %552 = vrot.lane.b32.xlu0 %v238_v25, %s2336_s18 }
  0x46   : > { %566 = vrot.lane.b32.xlu1 %v2463_v26, %s2336_s18  ;;  %556 = vrot.lane.b32.xlu0 %v2466_v27, %s2336_s18 }
  0x4a   : > { %662 = vrot.lane.b32.xlu1 %v2473_v28, %s2337_s19  ;;  %694 = vrot.lane.b32.xlu0 %v2476_v29, %s2337_s19 }
  0x4e   : > { %790 = vrot.lane.b32.xlu1 %v2483_v30, %s2338_s20  ;;  %822 = vrot.lane.b32.xlu0 %v2486_v31, %s2338_s20 }
  0x52   : > { %564 = vrot.lane.b32.xlu1 %v2493_v32, %s2336_s18  ;;  %950 = vrot.lane.b32.xlu0 %v2496_v33, %s2339_s21 }
  0x56   : > { %1078 = vrot.lane.b32.xlu1 %v2503_v34, %s2340_s22  ;;  %918 = vrot.lane.b32.xlu0 %v2431_v16, %s2339_s21 }
  0x5a   : > { %1046 = vrot.lane.b32.xlu1 %v2510_v35, %s2340_s22  ;;  %692 = vrot.lane.b32.xlu0 %v2513_v36, %s2337_s19 }
  0x5e   : > { %660 = vrot.lane.b32.xlu1 %v2520_v37, %s2337_s19  ;;  %1206 = vrot.lane.b32.xlu0 %v2172_v38, %s2341_s23 }
  0x62   : > { %1174 = vrot.lane.b32.xlu1 %v2156_v39, %s2341_s23  ;;  %820 = vrot.lane.b32.xlu0 %v2528_v40, %s2338_s20  ;;  %v2698_v39 = vld [vmem:[%s2378_s17 + $0x142] sm:$0xff] }
  0x66   : > { %788 = vrot.lane.b32.xlu1 %v2534_v41, %s2338_s20  ;;  %1334 = vrot.lane.b32.xlu0 %v2204_v42, %s2342_s24 }
  0x6a   : > { %1302 = vrot.lane.b32.xlu1 %v233_v18, %s2342_s24  ;;  %948 = vrot.lane.b32.xlu0 %v2541_v43, %s2339_s21 }
  0x6e   : > { %562 = vrot.lane.b32.xlu1 %v2547_v44, %s2336_s18  ;;  %1462 = vrot.lane.b32.xlu0 %v2236_v45, %s2343_s25 }
  0x72   : > { %1076 = vrot.lane.b32.xlu1 %v2554_v46, %s2340_s22  ;;  %916 = vrot.lane.b32.xlu0 %v2434_v17, %s2339_s21 }
  0x76   : > { %690 = vrot.lane.b32.xlu1 %v2561_v47, %s2337_s19  ;;  %1430 = vrot.lane.b32.xlu0 %v2220_v48, %s2343_s25 }
  0x7a   : > { %1204 = vrot.lane.b32.xlu1 %v2171_v49, %s2341_s23  ;;  %1044 = vrot.lane.b32.xlu0 %v2569_v50, %s2340_s22  ;;  %v2717_v49 = vld [vmem:[%s2378_s17 + $0x158] sm:$0xff] }
  0x7e   : > { %818 = vrot.lane.b32.xlu1 %v2575_v51, %s2338_s20  ;;  %658 = vrot.lane.b32.xlu0 %v2578_v52, %s2337_s19 }
  0x82   : > { %1332 = vrot.lane.b32.xlu1 %v2203_v53, %s2342_s24  ;;  %1172 = vrot.lane.b32.xlu0 %v2155_v54, %s2341_s23  ;;  %v2720_v53 = vld [vmem:[%s2378_s17 + $0x82] sm:$0xff] }
  0x84   : > { %v2591_v56 = vpop.permute.xlu1 %508  ;;  %v2593_v57 = vpop.permute.xlu0 %504 }
  0x85   : > { %3721 = vst [vmem:[#allocation2_spill] sm:$0xff] %v2591_v56  ;;  %3722 = vst [vmem:[#allocation3_spill] sm:$0xff] %v2593_v57  ;;  %v2735_v57 = vld [vmem:[%s2378_s17 + $0x98] sm:$0xff] }
  0x86   : > { %946 = vrot.lane.b32.xlu1 %v2463_v26, %s2339_s21  ;;  %786 = vrot.lane.b32.xlu0 %v2589_v55, %s2338_s20  ;;  %v2752_v56 = vld [vmem:[%s2378_s17 + $0x13a] sm:$0xff] }
  0x88   : > { %v2600_v59 = vpop.permute.xlu1 %510  ;;  %v2602_v60 = vpop.permute.xlu0 %506 }
  0x89   : > { %3723 = vst [vmem:[#allocation4_spill] sm:$0xff] %v2600_v59  ;;  %3724 = vst [vmem:[#allocation5_spill] sm:$0xff] %v2602_v60 }
  0x8a   : > { %1460 = vrot.lane.b32.xlu1 %v2235_v58, %s2343_s25  ;;  %1300 = vrot.lane.b32.xlu0 %v2442_v19, %s2342_s24 }
  0x8c   : > { %v2610_v62 = vpop.permute.xlu1 %514  ;;  %v2612_v63 = vpop.permute.xlu0 %512 }
  0x8d   : > { %3725 = vst [vmem:[#allocation6_spill] sm:$0xff] %v2610_v62  ;;  %3726 = vst [vmem:[#allocation7_spill] sm:$0xff] %v2612_v63  ;;  %v2770_v63 = vld [vmem:[%s2378_s17 + $0x7a] sm:$0xff] }
  0x8e   : > { %914 = vrot.lane.b32.xlu1 %v2421_v14, %s2339_s21  ;;  %560 = vrot.lane.b32.xlu0 %v2608_v61, %s2336_s18 }
  0x90   : > { %v2619_v1 = vpop.permute.xlu1 %518  ;;  %v2621_v2 = vpop.permute.xlu0 %516 }
  0x91   : > { %3727 = vst [vmem:[#allocation8_spill] sm:$0xff] %v2619_v1  ;;  %3728 = vst [vmem:[#allocation9_spill] sm:$0xff] %v2621_v2 }
  0x92   : > { %1428 = vrot.lane.b32.xlu1 %v2219_v0, %s2343_s25  ;;  %1074 = vrot.lane.b32.xlu0 %v2476_v29, %s2340_s22 }
  0x94   : > { %v2629_v4 = vpop.permute.xlu1 %522  ;;  %v2631_v5 = vpop.permute.xlu0 %520 }
  0x95   : > { %3729 = vst [vmem:[#allocation10_spill] sm:$0xff] %v2629_v4  ;;  %3730 = vst [vmem:[#allocation11_spill] sm:$0xff] %v2631_v5 }
  0x96   : > { %1042 = vrot.lane.b32.xlu1 %v2473_v28, %s2340_s22  ;;  %688 = vrot.lane.b32.xlu0 %v2627_v3, %s2337_s19 }
  0x98   : > { %v2640_v7 = vpop.permute.xlu1 %526  ;;  %v2642_v8 = vpop.permute.xlu0 %524 }
  0x9a   : > { %656 = vrot.lane.b32.xlu1 %v2638_v6, %s2337_s19  ;;  %1202 = vrot.lane.b32.xlu0 %v2486_v31, %s2341_s23 }
  0x9c   : > { %v2651_v18 = vpop.permute.xlu1 %530  ;;  %v2653_v19 = vpop.permute.xlu0 %528 }
  0x9e   : > { %1170 = vrot.lane.b32.xlu1 %v2483_v30, %s2341_s23  ;;  %816 = vrot.lane.b32.xlu0 %v2649_v9, %s2338_s20  ;;  %v2679_v30 = vld [vmem:[%s2378_s17 + $0x141] sm:$0xff] }
  0xa0   : > { %v2662_v21 = vpop.permute.xlu1 %534  ;;  %v2664_v22 = vpop.permute.xlu0 %532 }
  0xa2   : > { %784 = vrot.lane.b32.xlu1 %v2660_v20, %s2338_s20  ;;  %1330 = vrot.lane.b32.xlu0 %v2496_v33, %s2342_s24 }
  0xa4   : > { %v2670_v23 = vpop.permute.xlu1 %538  ;;  %v2672_v25 = vpop.permute.xlu0 %536 }
  0xa5   : > { %3731 = vst [vmem:[#allocation12_spill] sm:$0xff] %v2670_v23  ;;  %3732 = vst [vmem:[#allocation13_spill] sm:$0xff] %v2672_v25 }
  0xa6   : > { %1298 = vrot.lane.b32.xlu1 %v2431_v16, %s2342_s24  ;;  %944 = vrot.lane.b32.xlu0 %v2493_v32, %s2339_s21 }
  0xa8   : > { %v2681_v31 = vpop.permute.xlu1 %542  ;;  %v2683_v38 = vpop.permute.xlu0 %540 }
  0xa9   : > { %3733 = vst [vmem:[#allocation14_spill] sm:$0xff] %v2681_v31  ;;  %3734 = vst [vmem:[#allocation15_spill] sm:$0xff] %v2683_v38  ;;  %v2767_v31 = vld [vmem:[%s2378_s17 + $0x150] sm:$0xff] }
  0xaa   : > { %558 = vrot.lane.b32.xlu1 %v2679_v30, %s2336_s18  ;;  %1458 = vrot.lane.b32.xlu0 %v2503_v34, %s2343_s25 }
  0xac   : > { %v2689_v33 = vpop.permute.xlu1 %546  ;;  %v2691_v16 = vpop.permute.xlu0 %544 }
  0xad   : > { %3735 = vst [vmem:[#allocation16_spill] sm:$0xff] %v2689_v33  ;;  %3736 = vst [vmem:[#allocation17_spill] sm:$0xff] %v2691_v16 }
  0xae   : > { %1072 = vrot.lane.b32.xlu1 %v2513_v36, %s2340_s22  ;;  %912 = vrot.lane.b32.xlu0 %v2424_v15, %s2339_s21 }
  0xb0   : > { %v2700_v42 = vpop.permute.xlu1 %550  ;;  %v2702_v45 = vpop.permute.xlu0 %548 }
  0xb1   : > { %3737 = vst [vmem:[#allocation18_spill] sm:$0xff] %v2700_v42  ;;  %3738 = vst [vmem:[#allocation19_spill] sm:$0xff] %v2702_v45 }
  0xb2   : > { %686 = vrot.lane.b32.xlu1 %v2698_v39, %s2337_s19  ;;  %1426 = vrot.lane.b32.xlu0 %v2510_v35, %s2343_s25 }
  0xb4   : > { %v2708_v34 = vpop.permute.xlu1 %554  ;;  %v2710_v48 = vpop.permute.xlu0 %552 }
  0xb5   : > { %3739 = vst [vmem:[#allocation20_spill] sm:$0xff] %v2710_v48  ;;  %v2789_v48 = vld [vmem:[%s2378_s17 + $0x90] sm:$0xff] }
  0xb6   : > { %1200 = vrot.lane.b32.xlu1 %v2528_v40, %s2341_s23  ;;  %1040 = vrot.lane.b32.xlu0 %v2520_v37, %s2340_s22 }
  0xb8   : > { %v567_v54 = vpop.permute.xlu1 %566  ;;  %v2722_v58 = vpop.permute.xlu0 %556 }
  0xb9   : > { %v1528_v2 = vsel %vm1496_vm1, %v2575_v51, %v567_v54 }
  0xba   : > { %814 = vrot.lane.b32.xlu1 %v2717_v49, %s2338_s20  ;;  %654 = vrot.lane.b32.xlu0 %v2720_v53, %s2337_s19 }
  0xbc   : > { %v2728_v35 = vpop.permute.xlu1 %662  ;;  %v695_v0 = vpop.permute.xlu0 %694 }
  0xbd   : > { %v1561_v45 = vsel %vm1529_vm0, %v1528_v2, %v695_v0 }
  0xbe   : > { %1328 = vrot.lane.b32.xlu1 %v2541_v43, %s2342_s24  ;;  %1168 = vrot.lane.b32.xlu0 %v2534_v41, %s2341_s23 }
  0xc0   : > { %v791_v40 = vpop.permute.xlu1 %790  ;;  %v823_v25 = vpop.permute.xlu0 %822 }
  0xc1   : > { %v1594_v1 = vsel %vm1562_vm2, %v1561_v45, %v823_v25 }
  0xc2   : > { %942 = vrot.lane.b32.xlu1 %v2547_v44, %s2339_s21  ;;  %782 = vrot.lane.b32.xlu0 %v2735_v57, %s2338_s20 }
  0xc4   : > { %v2741_v60 = vpop.permute.xlu1 %564  ;;  %v951_v23 = vpop.permute.xlu0 %950 }
  0xc5   : > { %v1627_v4 = vsel %vm1595_vm3, %v1594_v1, %v951_v23 }
  0xc6   : > { %1456 = vrot.lane.b32.xlu1 %v2554_v46, %s2343_s25  ;;  %1296 = vrot.lane.b32.xlu0 %v2434_v17, %s2342_s24 }
  0xc8   : > { %v1079_v41 = vpop.permute.xlu1 %1078  ;;  %v919_v43 = vpop.permute.xlu0 %918 }
  0xca   : > { %1070 = vrot.lane.b32.xlu1 %v2561_v47, %s2340_s22  ;;  %910 = vrot.lane.b32.xlu0 %v2411_v12, %s2339_s21 }
  0xcc   : > { %v1047_v38 = vpop.permute.xlu1 %1046  ;;  %v2754_v59 = vpop.permute.xlu0 %692 }
  0xce   : > { %684 = vrot.lane.b32.xlu1 %v2752_v56, %s2337_s19  ;;  %1424 = vrot.lane.b32.xlu0 %v2569_v50, %s2343_s25 }
  0xd0   : > { %v2760_v17 = vpop.permute.xlu1 %660  ;;  %v1207_v46 = vpop.permute.xlu0 %1206 }
  0xd2   : > { %1198 = vrot.lane.b32.xlu1 %v2575_v51, %s2341_s23  ;;  %1038 = vrot.lane.b32.xlu0 %v2578_v52, %s2340_s22  ;;  %v1660_v51 = vsel %vm1628_vm4, %v1627_v4, %v1079_v41  ;;  %v1512_v4 = vsel %vm1496_vm1, %v2589_v55, %v2662_v21 }
  0xd3   : > { %v1545_v23 = vsel %vm1529_vm0, %v1512_v4, %v2728_v35 }
  0xd4   : > { %v1175_v16 = vpop.permute.xlu1 %1174  ;;  %v2772_v62 = vpop.permute.xlu0 %820 }
  0xd6   : > { %812 = vrot.lane.b32.xlu1 %v2767_v31, %s2338_s20  ;;  %652 = vrot.lane.b32.xlu0 %v2770_v63, %s2337_s19 }
  0xd8   : > { %v2778_v50 = vpop.permute.xlu1 %788  ;;  %v1335_v33 = vpop.permute.xlu0 %1334 }
  0xda   : > { %1326 = vrot.lane.b32.xlu1 %v2463_v26, %s2342_s24  ;;  %1166 = vrot.lane.b32.xlu0 %v2589_v55, %s2341_s23  ;;  %v1693_v26 = vsel %vm1661_vm5, %v1660_v51, %v1207_v46 }
  0xdb   : > { %v1726_v2 = vsel %vm1694_vm6, %v1693_v26, %v1335_v33  ;;  %v1578_v33 = vsel %vm1562_vm2, %v1545_v23, %v791_v40 }
  0xdc   : > { %v1303_v42 = vpop.permute.xlu1 %1302  ;;  %v949_v5 = vpop.permute.xlu0 %948  ;;  %v1611_v41 = vsel %vm1595_vm3, %v1578_v33, %v919_v43 }
  0xdd   : > { %v1644_v46 = vsel %vm1628_vm4, %v1611_v41, %v1047_v38  ;;  %v2864_v41 = vld [vmem:[%s2378_s17 + $0x80] sm:$0xff] }
  0xde   : > { %940 = vrot.lane.b32.xlu1 %v2608_v61, %s2339_s21  ;;  %780 = vrot.lane.b32.xlu0 %v2789_v48, %s2338_s20 }
  0xe0   : > { %v2799_v25 = vpop.permute.xlu1 %562  ;;  %v1463_v45 = vpop.permute.xlu0 %1462 }
  0xe1   : > { %v1759_v1 = vsel %vm1727_vm7, %v1726_v2, %v1463_v45  ;;  %v1527_v45 = vsel %vm1496_vm1, %v2649_v9, %v2741_v60 }
  0xe2   : > { %1454 = vrot.lane.b32.xlu1 %v2476_v29, %s2343_s25  ;;  %1294 = vrot.lane.b32.xlu0 %v2421_v14, %s2342_s24  ;;  %v1677_v14 = vsel %vm1661_vm5, %v1644_v46, %v1175_v16  ;;  %v2821_v29 = vld [vmem:[%s2378_s17 + $0x12a] sm:$0xff]  ;;  %v2837_v16 = vld [vmem:[%s2378_s17 + $0x140] sm:$0xff] }
  0xe3   : > { %2273 = vmatprep.subr.msk.mxu0 %vm1761_vm8, %v1759_v1  ;;  %v1710_v55 = vsel %vm1694_vm6, %v1677_v14, %v1303_v42  ;;  %v2840_v42 = vld [vmem:[%s2378_s17 + $0x6a] sm:$0xff]  ;;  %v1560_v1 = vsel %vm1529_vm0, %v1527_v45, %v2754_v59 }
  0xe4   : > { %v1077_v54 = vpop.permute.xlu1 %1076  ;;  %v917_v0 = vpop.permute.xlu0 %916  ;;  %v1593_v4 = vsel %vm1562_vm2, %v1560_v1, %v2772_v62  ;;  %v2918_v1 = vld [vmem:[%s2378_s17 + $0x138] sm:$0xff] }
  0xe5   : > { %v1626_v46 = vsel %vm1595_vm3, %v1593_v4, %v949_v5  ;;  %v1511_v5 = vsel %vm1496_vm1, %v2660_v20, %v2664_v22 }
  0xe6   : > { %1068 = vrot.lane.b32.xlu1 %v2627_v3, %s2340_s22  ;;  %908 = vrot.lane.b32.xlu0 %v2414_v13, %s2339_s21  ;;  %v1659_v60 = vsel %vm1628_vm4, %v1626_v46, %v1077_v54  ;;  %v1544_v54 = vsel %vm1529_vm0, %v1511_v5, %v2760_v17 }
  0xe8   : > { %v2824_v21 = vpop.permute.xlu1 %690  ;;  %v1431_v35 = vpop.permute.xlu0 %1430 }
  0xe9   : > { %v1743_v40 = vsel %vm1727_vm7, %v1710_v55, %v1431_v35  ;;  %v1577_v55 = vsel %vm1562_vm2, %v1544_v54, %v2778_v50 }
  0xea   : > { %682 = vrot.lane.b32.xlu1 %v2821_v29, %s2337_s19  ;;  %1422 = vrot.lane.b32.xlu0 %v2473_v28, %s2343_s25 }
  0xeb   : > { %2274 = vmatpush3.xpose.msk.msra.mxu0 %vm1761_vm8, %v1743_v40 }
  0xec   : > { %v1205_v38 = vpop.permute.xlu1 %1204  ;;  %v1045_v43 = vpop.permute.xlu0 %1044 }
  0xee   : > { %1196 = vrot.lane.b32.xlu1 %v2649_v9, %s2341_s23  ;;  %1036 = vrot.lane.b32.xlu0 %v2638_v6, %s2340_s22 }
  0xf0   : > { %v2842_v51 = vpop.permute.xlu1 %818  ;;  %v2844_v26 = vpop.permute.xlu0 %658 }
  0xf2   : > { %810 = vrot.lane.b32.xlu1 %v2837_v16, %s2338_s20  ;;  %650 = vrot.lane.b32.xlu0 %v2840_v42, %s2337_s19 }
  0xf4   : > { %v1333_v28 = vpop.permute.xlu1 %1332  ;;  %v1173_v2 = vpop.permute.xlu0 %1172 }
  0xf6   : > { %1324 = vrot.lane.b32.xlu1 %v2493_v32, %s2342_s24  ;;  %1164 = vrot.lane.b32.xlu0 %v2660_v20, %s2341_s23  ;;  %v1692_v32 = vsel %vm1661_vm5, %v1659_v60, %v1205_v38  ;;  %v1610_v38 = vsel %vm1595_vm3, %v1577_v55, %v917_v0 }
  0xf7   : > { %v1725_v59 = vsel %vm1694_vm6, %v1692_v32, %v1333_v28  ;;  %v1643_v20 = vsel %vm1628_vm4, %v1610_v38, %v1045_v43  ;;  %v2913_v28 = vld [vmem:[%s2378_s17 + $0x62] sm:$0xff]  ;;  %v2931_v32 = vld [vmem:[%s2378_s17 + $0x78] sm:$0xff] }
  0xf8   : > { %v947_v23 = vpop.permute.xlu1 %946  ;;  %v2861_v33 = vpop.permute.xlu0 %786 }
  0xfa   : > { %938 = vrot.lane.b32.xlu1 %v2679_v30, %s2339_s21  ;;  %778 = vrot.lane.b32.xlu0 %v2864_v41, %s2338_s20 }
  0xfc   : > { %v1461_v62 = vpop.permute.xlu1 %1460  ;;  %v1301_v9 = vpop.permute.xlu0 %1300 }
  0xfd   : > { %v1758_v14 = vsel %vm1727_vm7, %v1725_v59, %v1461_v62  ;;  %v1526_v59 = vsel %vm1496_vm1, %v2717_v49, %v2799_v25 }
  0xfe   : > { %1452 = vrot.lane.b32.xlu1 %v2513_v36, %s2343_s25  ;;  %1292 = vrot.lane.b32.xlu0 %v2424_v15, %s2342_s24  ;;  %v1676_v15 = vsel %vm1661_vm5, %v1643_v20, %v1173_v2  ;;  %v2897_v36 = vld [vmem:[%s2378_s17 + $0x122] sm:$0xff] }
  0xff   : > { %2275 = vmatprep.subr.msk.mxu0 %vm1761_vm8, %v1758_v14  ;;  %v1709_v22 = vsel %vm1694_vm6, %v1676_v15, %v1301_v9 }
 0x100   : > { %v915_v35 = vpop.permute.xlu1 %914  ;;  %v2887_v40 = vpop.permute.xlu0 %560 }
 0x102   : > { %1066 = vrot.lane.b32.xlu1 %v2698_v39, %s2340_s22  ;;  %906 = vrot.lane.b32.xlu0 %v2401_v10, %s2339_s21 }
 0x104   : > { %v1429_v17 = vpop.permute.xlu1 %1428  ;;  %v1075_v50 = vpop.permute.xlu0 %1074 }
 0x105   : > { %v1742_v0 = vsel %vm1727_vm7, %v1709_v22, %v1429_v17 }
 0x106   : > { %680 = vrot.lane.b32.xlu1 %v2897_v36, %s2337_s19  ;;  %1420 = vrot.lane.b32.xlu0 %v2520_v37, %s2343_s25 }
 0x107   : > { %2276 = vmatpush3.xpose.msk.msra.mxu0 %vm1761_vm8, %v1742_v0 }
 0x108   : > { %v1043_v10 = vpop.permute.xlu1 %1042  ;;  %v2906_v43 = vpop.permute.xlu0 %688 }
 0x10a   : > { %1194 = vrot.lane.b32.xlu1 %v2717_v49, %s2341_s23  ;;  %1034 = vrot.lane.b32.xlu0 %v2720_v53, %s2340_s22 }
 0x10c   : > { %v2915_v2 = vpop.permute.xlu1 %656  ;;  %v1203_v45 = vpop.permute.xlu0 %1202 }
 0x10e   : > { %808 = vrot.lane.b32.xlu1 %v2918_v1, %s2338_s20  ;;  %648 = vrot.lane.b32.xlu0 %v2913_v28, %s2337_s19 }
 0x110   : > { %v1171_v37 = vpop.permute.xlu1 %1170  ;;  %v817_v4 = vpop.permute.xlu0 %816 }
 0x112   : > { %1322 = vrot.lane.b32.xlu1 %v2547_v44, %s2342_s24  ;;  %1162 = vrot.lane.b32.xlu0 %v2735_v57, %s2341_s23  ;;  %v1559_v44 = vsel %vm1529_vm0, %v1526_v59, %v2824_v21  ;;  %v1525_v59 = vsel %vm1496_vm1, %v2767_v31, %v2887_v40 }
 0x113   : > { %v1592_v62 = vsel %vm1562_vm2, %v1559_v44, %v2842_v51 }
 0x114   : > { %v2928_v46 = vpop.permute.xlu1 %784  ;;  %v1331_v60 = vpop.permute.xlu0 %1330  ;;  %v1625_v5 = vsel %vm1595_vm3, %v1592_v62, %v947_v23  ;;  %v1510_v23 = vsel %vm1496_vm1, %v2735_v57, %v2651_v18 }
 0x115   : > { %v1658_v54 = vsel %vm1628_vm4, %v1625_v5, %v1075_v50  ;;  %v2990_v50 = vld [vmem:[%s2378_s17 + $0x128] sm:$0xff] }
 0x116   : > { %936 = vrot.lane.b32.xlu1 %v2466_v27, %s2339_s21  ;;  %776 = vrot.lane.b32.xlu0 %v2931_v32, %s2338_s20  ;;  %v1691_v27 = vsel %vm1661_vm5, %v1658_v54, %v1203_v45 }
 0x117   : > { %v1724_v49 = vsel %vm1694_vm6, %v1691_v27, %v1331_v60  ;;  %v3005_v60 = vld [vmem:[%s2378_s17 + $0x68] sm:$0xff] }
 0x118   : > { %v1299_v9 = vpop.permute.xlu1 %1298  ;;  %v945_v14 = vpop.permute.xlu0 %944 }
 0x11a   : > { %1450 = vrot.lane.b32.xlu1 %v2561_v47, %s2343_s25  ;;  %1290 = vrot.lane.b32.xlu0 %v2411_v12, %s2342_s24  ;;  %v1543_v12 = vsel %vm1529_vm0, %v1510_v23, %v2844_v26  ;;  %v2966_v47 = vld [vmem:[%s2378_s17 + $0x112] sm:$0xff] }
 0x11b   : > { %v1576_v55 = vsel %vm1562_vm2, %v1543_v12, %v2861_v33 }
 0x11c   : > { %v2952_v25 = vpop.permute.xlu1 %558  ;;  %v1459_v21 = vpop.permute.xlu0 %1458  ;;  %v1609_v57 = vsel %vm1595_vm3, %v1576_v55, %v915_v35  ;;  %v2987_v35 = vld [vmem:[%s2378_s17 + $0x52] sm:$0xff] }
 0x11d   : > { %v1757_v51 = vsel %vm1727_vm7, %v1724_v49, %v1459_v21  ;;  %v1642_v18 = vsel %vm1628_vm4, %v1609_v57, %v1043_v10  ;;  %v3066_v57 = vld [vmem:[%s2378_s17 + $0x120] sm:$0xff] }
 0x11e   : > { %1064 = vrot.lane.b32.xlu1 %v2752_v56, %s2340_s22  ;;  %904 = vrot.lane.b32.xlu0 %v2404_v11, %s2339_s21  ;;  %v1675_v11 = vsel %vm1661_vm5, %v1642_v18, %v1171_v37 }
 0x11f   : > { %2277 = vmatprep.subr.msk.mxu0 %vm1761_vm8, %v1757_v51  ;;  %v1708_v26 = vsel %vm1694_vm6, %v1675_v11, %v1299_v9 }
 0x120   : > { %v1073_v38 = vpop.permute.xlu1 %1072  ;;  %v913_v20 = vpop.permute.xlu0 %912 }
 0x122   : > { %678 = vrot.lane.b32.xlu1 %v2966_v47, %s2337_s19  ;;  %1418 = vrot.lane.b32.xlu0 %v2578_v52, %s2343_s25 }
 0x124   : > { %v2978_v15 = vpop.permute.xlu1 %686  ;;  %v1427_v33 = vpop.permute.xlu0 %1426 }
 0x125   : > { %v1741_v22 = vsel %vm1727_vm7, %v1708_v26, %v1427_v33  ;;  %v3081_v26 = vld [vmem:[%s2378_s17 + $0x121] sm:$0xff] }
 0x126   : > { %1192 = vrot.lane.b32.xlu1 %v2767_v31, %s2341_s23  ;;  %1032 = vrot.lane.b32.xlu0 %v2770_v63, %s2340_s22  ;;  %v3027_v31 = vld [vmem:[%s2378_s17 + $0x69] sm:$0xff] }
 0x127   : > { %2278 = vmatpush3.xpose.msk.msra.mxu0 %vm1761_vm8, %v1741_v22 }
 0x128   : > { %v1201_v52 = vpop.permute.xlu1 %1200  ;;  %v1041_v17 = vpop.permute.xlu0 %1040 }
 0x12a   : > { %806 = vrot.lane.b32.xlu1 %v2990_v50, %s2338_s20  ;;  %646 = vrot.lane.b32.xlu0 %v2987_v35, %s2337_s19 }
 0x12c   : > { %v2996_v0 = vpop.permute.xlu1 %814  ;;  %v2998_v10 = vpop.permute.xlu0 %654 }
 0x12e   : > { %1320 = vrot.lane.b32.xlu1 %v2608_v61, %s2342_s24  ;;  %1160 = vrot.lane.b32.xlu0 %v2789_v48, %s2341_s23  ;;  %v1558_v61 = vsel %vm1529_vm0, %v1525_v59, %v2906_v43 }
 0x12f   : > { %v1591_v44 = vsel %vm1562_vm2, %v1558_v61, %v817_v4 }
 0x130   : > { %v1329_v45 = vpop.permute.xlu1 %1328  ;;  %v1169_v37 = vpop.permute.xlu0 %1168  ;;  %v1624_v5 = vsel %vm1595_vm3, %v1591_v44, %v945_v14  ;;  %v1509_v14 = vsel %vm1496_vm1, %v2789_v48, %v2653_v19 }
 0x131   : > { %v1657_v54 = vsel %vm1628_vm4, %v1624_v5, %v1073_v38 }
 0x132   : > { %934 = vrot.lane.b32.xlu1 %v2456_v24, %s2339_s21  ;;  %774 = vrot.lane.b32.xlu0 %v3005_v60, %s2338_s20  ;;  %v1690_v24 = vsel %vm1661_vm5, %v1657_v54, %v1201_v52  ;;  %v3084_v52 = vld [vmem:[%s2378_s17 + $0x60] sm:$0xff] }
 0x133   : > { %v1723_v40 = vsel %vm1694_vm6, %v1690_v24, %v1329_v45  ;;  %v2180_v45 = vld [vmem:[%s2378_s17 + $0x81] sm:$0xff] }
 0x134   : > { %v943_v62 = vpop.permute.xlu1 %942  ;;  %v3017_v9 = vpop.permute.xlu0 %782 }
 0x136   : > { %1448 = vrot.lane.b32.xlu1 %v2627_v3, %s2343_s25  ;;  %1288 = vrot.lane.b32.xlu0 %v2414_v13, %s2342_s24  ;;  %v1542_v13 = vsel %vm1529_vm0, %v1509_v14, %v2915_v2  ;;  %v3042_v3 = vld [vmem:[%s2378_s17 + $0x10a] sm:$0xff] }
 0x137   : > { %v1575_v49 = vsel %vm1562_vm2, %v1542_v13, %v2928_v46 }
 0x138   : > { %v1457_v43 = vpop.permute.xlu1 %1456  ;;  %v1297_v4 = vpop.permute.xlu0 %1296  ;;  %v1608_v19 = vsel %vm1595_vm3, %v1575_v49, %v913_v20 }
 0x139   : > { %v1756_v27 = vsel %vm1727_vm7, %v1723_v40, %v1457_v43  ;;  %v1641_v48 = vsel %vm1628_vm4, %v1608_v19, %v1041_v17  ;;  %v1524_v17 = vsel %vm1496_vm1, %v2837_v16, %v2952_v25  ;;  %v3122_v40 = vld [vmem:[%s2378_s17 + $0xfa] sm:$0xff]  ;;  %v3146_v19 = vld [vmem:[%s2378_s17 + $0x110] sm:$0xff] }
 0x13a   : > { %1062 = vrot.lane.b32.xlu1 %v2821_v29, %s2340_s22  ;;  %902 = vrot.lane.b32.xlu0 %v3027_v31, %s2339_s21  ;;  %v1674_v2 = vsel %vm1661_vm5, %v1641_v48, %v1169_v37  ;;  %v2195_v48 = vld [vmem:[%s2378_s17 + $0x139] sm:$0xff] }
 0x13b   : > { %2279 = vmatprep.subr.msk.mxu0 %vm1761_vm8, %v1756_v27  ;;  %v1707_v23 = vsel %vm1694_vm6, %v1674_v2, %v1297_v4 }
 0x13c   : > { %v1071_v21 = vpop.permute.xlu1 %1070  ;;  %v911_v51 = vpop.permute.xlu0 %910 }
 0x13e   : > { %676 = vrot.lane.b32.xlu1 %v3042_v3, %s2337_s19  ;;  %1416 = vrot.lane.b32.xlu0 %v2638_v6, %s2343_s25  ;;  %v3063_v6 = vld [vmem:[%s2378_s17 + $0x4a] sm:$0xff] }
 0x140   : > { %v3054_v12 = vpop.permute.xlu1 %684  ;;  %v1425_v46 = vpop.permute.xlu0 %1424 }
 0x141   : > { %v1740_v55 = vsel %vm1727_vm7, %v1707_v23, %v1425_v46  ;;  %v3161_v46 = vld [vmem:[%s2378_s17 + $0x111] sm:$0xff] }
 0x142   : > { %1190 = vrot.lane.b32.xlu1 %v2837_v16, %s2341_s23  ;;  %1030 = vrot.lane.b32.xlu0 %v2840_v42, %s2340_s22 }
 0x143   : > { %2280 = vmatpush3.xpose.msk.msra.mxu0 %vm1761_vm8, %v1740_v55 }
 0x144   : > { %v1199_v38 = vpop.permute.xlu1 %1198  ;;  %v1039_v20 = vpop.permute.xlu0 %1038 }
 0x146   : > { %804 = vrot.lane.b32.xlu1 %v3066_v57, %s2338_s20  ;;  %644 = vrot.lane.b32.xlu0 %v3063_v6, %s2337_s19 }
 0x148   : > { %v3072_v18 = vpop.permute.xlu1 %812  ;;  %v3074_v11 = vpop.permute.xlu0 %652 }
 0x14a   : > { %1318 = vrot.lane.b32.xlu1 %v2679_v30, %s2342_s24  ;;  %1158 = vrot.lane.b32.xlu0 %v2864_v41, %s2341_s23  ;;  %v1557_v30 = vsel %vm1529_vm0, %v1524_v17, %v2978_v15  ;;  %v3107_v15 = vld [vmem:[%s2378_s17 + $0x61] sm:$0xff]  ;;  %v2179_v17 = vld [vmem:[%s2378_s17 + $0x79] sm:$0xff] }
 0x14b   : > { %v1590_v37 = vsel %vm1562_vm2, %v1557_v30, %v2996_v0 }
 0x14c   : > { %v1327_v33 = vpop.permute.xlu1 %1326  ;;  %v1167_v22 = vpop.permute.xlu0 %1166  ;;  %v1623_v44 = vsel %vm1595_vm3, %v1590_v37, %v943_v62  ;;  %v1508_v62 = vsel %vm1496_vm1, %v2864_v41, %v2640_v7 }
 0x14d   : > { %v1656_v16 = vsel %vm1628_vm4, %v1623_v44, %v1071_v21 }
 0x14e   : > { %932 = vrot.lane.b32.xlu1 %v3081_v26, %s2339_s21  ;;  %772 = vrot.lane.b32.xlu0 %v3084_v52, %s2338_s20  ;;  %v1689_v25 = vsel %vm1661_vm5, %v1656_v16, %v1199_v38 }
 0x14f   : > { %v1722_v5 = vsel %vm1694_vm6, %v1689_v25, %v1327_v33  ;;  %v1523_v33 = vsel %vm1496_vm1, %v2918_v1, %v2722_v58 }
 0x150   : > { %v941_v59 = vpop.permute.xlu1 %940  ;;  %v3098_v61 = vpop.permute.xlu0 %780 }
 0x152   : > { %1446 = vrot.lane.b32.xlu1 %v2698_v39, %s2343_s25  ;;  %1286 = vrot.lane.b32.xlu0 %v2180_v45, %s2342_s24  ;;  %v1541_v39 = vsel %vm1529_vm0, %v1508_v62, %v2998_v10 }
 0x153   : > { %v1574_v43 = vsel %vm1562_vm2, %v1541_v39, %v3017_v9 }
 0x154   : > { %v1455_v0 = vpop.permute.xlu1 %1454  ;;  %v1295_v54 = vpop.permute.xlu0 %1294  ;;  %v1607_v7 = vsel %vm1595_vm3, %v1574_v43, %v911_v51 }
 0x155   : > { %v1755_v24 = vsel %vm1727_vm7, %v1722_v5, %v1455_v0  ;;  %v1640_v41 = vsel %vm1628_vm4, %v1607_v7, %v1039_v20  ;;  %v3164_v20 = vld [vmem:[%s2378_s17 + $0x50] sm:$0xff] }
 0x156   : > { %1060 = vrot.lane.b32.xlu1 %v2897_v36, %s2340_s22  ;;  %900 = vrot.lane.b32.xlu0 %v3107_v15, %s2339_s21  ;;  %v1673_v10 = vsel %vm1661_vm5, %v1640_v41, %v1167_v22  ;;  %v1556_v22 = vsel %vm1529_vm0, %v1523_v33, %v3054_v12  ;;  %v3187_v12 = vld [vmem:[%s2378_s17 + $0x51] sm:$0xff]  ;;  %v3226_v41 = vld [vmem:[%s2378_s17 + $0x108] sm:$0xff] }
 0x157   : > { %2281 = vmatprep.subr.msk.mxu0 %vm1761_vm8, %v1755_v24  ;;  %v1706_v14 = vsel %vm1694_vm6, %v1673_v10, %v1295_v54  ;;  %v1589_v30 = vsel %vm1562_vm2, %v1556_v22, %v3072_v18  ;;  %v3202_v0 = vld [vmem:[%s2378_s17 + $0xf2] sm:$0xff]  ;;  %v2194_v10 = vld [vmem:[%s2378_s17 + $0x129] sm:$0xff] }
 0x158   : > { %v1069_v4 = vpop.permute.xlu1 %1068  ;;  %v909_v27 = vpop.permute.xlu0 %908  ;;  %v1622_v44 = vsel %vm1595_vm3, %v1589_v30, %v941_v59  ;;  %v1507_v59 = vsel %vm1496_vm1, %v2931_v32, %v2642_v8 }
 0x159   : > { %v1655_v58 = vsel %vm1628_vm4, %v1622_v44, %v1069_v4 }
 0x15a   : > { %674 = vrot.lane.b32.xlu1 %v3122_v40, %s2337_s19  ;;  %1414 = vrot.lane.b32.xlu0 %v2720_v53, %s2343_s25  ;;  %v3143_v53 = vld [vmem:[%s2378_s17 + $0x3a] sm:$0xff] }
 0x15c   : > { %v3134_v13 = vpop.permute.xlu1 %682  ;;  %v1423_v9 = vpop.permute.xlu0 %1422 }
 0x15d   : > { %v1739_v49 = vsel %vm1727_vm7, %v1706_v14, %v1423_v9  ;;  %v2146_v14 = vld [vmem:[%s2378_s17 + $0x68] sm:$0xff] }
 0x15e   : > { %1188 = vrot.lane.b32.xlu1 %v2918_v1, %s2341_s23  ;;  %1028 = vrot.lane.b32.xlu0 %v2913_v28, %s2340_s22 }
 0x15f   : > { %2282 = vmatpush3.xpose.msk.msra.mxu0 %vm1761_vm8, %v1739_v49 }
 0x160   : > { %v1197_v21 = vpop.permute.xlu1 %1196  ;;  %v1037_v51 = vpop.permute.xlu0 %1036 }
 0x161   : > { %v1688_v1 = vsel %vm1661_vm5, %v1655_v58, %v1197_v21  ;;  %v3241_v21 = vld [vmem:[%s2378_s17 + $0x109] sm:$0xff] }
 0x162   : > { %802 = vrot.lane.b32.xlu1 %v3146_v19, %s2338_s20  ;;  %642 = vrot.lane.b32.xlu0 %v3143_v53, %s2337_s19 }
 0x164   : > { %v3153_v2 = vpop.permute.xlu1 %810  ;;  %v3155_v23 = vpop.permute.xlu0 %650 }
 0x166   : > { %1316 = vrot.lane.b32.xlu1 %v2195_v48, %s2342_s24  ;;  %1156 = vrot.lane.b32.xlu0 %v2931_v32, %s2341_s23 }
 0x168   : > { %v1325_v55 = vpop.permute.xlu1 %1324  ;;  %v1165_v38 = vpop.permute.xlu0 %1164 }
 0x169   : > { %v1721_v16 = vsel %vm1694_vm6, %v1688_v1, %v1325_v55 }
 0x16a   : > { %930 = vrot.lane.b32.xlu1 %v3161_v46, %s2339_s21  ;;  %770 = vrot.lane.b32.xlu0 %v3164_v20, %s2338_s20 }
 0x16c   : > { %v939_v45 = vpop.permute.xlu1 %938  ;;  %v3178_v37 = vpop.permute.xlu0 %778 }
 0x16e   : > { %1444 = vrot.lane.b32.xlu1 %v2752_v56, %s2343_s25  ;;  %1284 = vrot.lane.b32.xlu0 %v2179_v17, %s2342_s24  ;;  %v1540_v56 = vsel %vm1529_vm0, %v1507_v59, %v3074_v11 }
 0x16f   : > { %v1573_v54 = vsel %vm1562_vm2, %v1540_v56, %v3098_v61 }
 0x170   : > { %v1453_v18 = vpop.permute.xlu1 %1452  ;;  %v1293_v25 = vpop.permute.xlu0 %1292  ;;  %v1606_v8 = vsel %vm1595_vm3, %v1573_v54, %v909_v27 }
 0x171   : > { %v1754_v5 = vsel %vm1727_vm7, %v1721_v16, %v1453_v18  ;;  %v1639_v32 = vsel %vm1628_vm4, %v1606_v8, %v1037_v51  ;;  %v3244_v51 = vld [vmem:[%s2378_s17 + $0x48] sm:$0xff]  ;;  %v3740_v18 = vld [vmem:[#allocation10_spill] sm:$0xff] }
 0x172   : > { %1058 = vrot.lane.b32.xlu1 %v2966_v47, %s2340_s22  ;;  %898 = vrot.lane.b32.xlu0 %v3187_v12, %s2339_s21  ;;  %v1672_v11 = vsel %vm1661_vm5, %v1639_v32, %v1165_v38  ;;  %v1522_v38 = vsel %vm1496_vm1, %v2990_v50, %v2708_v34 }
 0x173   : > { %2283 = vmatprep.subr.msk.mxu0 %vm1761_vm8, %v1754_v5  ;;  %v1705_v39 = vsel %vm1694_vm6, %v1672_v11, %v1293_v25  ;;  %v1555_v33 = vsel %vm1529_vm0, %v1522_v38, %v3134_v13  ;;  %v3267_v13 = vld [vmem:[%s2378_s17 + $0x49] sm:$0xff]  ;;  %v3306_v11 = vld [vmem:[%s2378_s17 + $0xf8] sm:$0xff] }
 0x174   : > { %v1067_v24 = vpop.permute.xlu1 %1066  ;;  %v907_v62 = vpop.permute.xlu0 %906  ;;  %v1588_v22 = vsel %vm1562_vm2, %v1555_v33, %v3153_v2 }
 0x175   : > { %v1621_v44 = vsel %vm1595_vm3, %v1588_v22, %v939_v45  ;;  %v1506_v45 = vsel %vm1496_vm1, %v3005_v60, %v3740_v18 }
 0x176   : > { %672 = vrot.lane.b32.xlu1 %v3202_v0, %s2337_s19  ;;  %1412 = vrot.lane.b32.xlu0 %v2770_v63, %s2343_s25  ;;  %v3223_v63 = vld [vmem:[%s2378_s17 + $0x32] sm:$0xff]  ;;  %v1654_v34 = vsel %vm1628_vm4, %v1621_v44, %v1067_v24 }
 0x178   : > { %v3214_v61 = vpop.permute.xlu1 %680  ;;  %v1421_v43 = vpop.permute.xlu0 %1420 }
 0x179   : > { %v1738_v4 = vsel %vm1727_vm7, %v1705_v39, %v1421_v43  ;;  %v2145_v39 = vld [vmem:[%s2378_s17 + $0x60] sm:$0xff] }
 0x17a   : > { %1186 = vrot.lane.b32.xlu1 %v2990_v50, %s2341_s23  ;;  %1026 = vrot.lane.b32.xlu0 %v2987_v35, %s2340_s22 }
 0x17b   : > { %2284 = vmatpush3.xpose.msk.msra.mxu0 %vm1761_vm8, %v1738_v4 }
 0x17c   : > { %v1195_v27 = vpop.permute.xlu1 %1194  ;;  %v1035_v7 = vpop.permute.xlu0 %1034 }
 0x17d   : > { %v1687_v50 = vsel %vm1661_vm5, %v1654_v34, %v1195_v27  ;;  %v3321_v27 = vld [vmem:[%s2378_s17 + $0xf9] sm:$0xff] }
 0x17e   : > { %800 = vrot.lane.b32.xlu1 %v3226_v41, %s2338_s20  ;;  %640 = vrot.lane.b32.xlu0 %v3223_v63, %s2337_s19 }
 0x180   : > { %v3234_v9 = vpop.permute.xlu1 %808  ;;  %v3236_v49 = vpop.permute.xlu0 %648 }
 0x182   : > { %1314 = vrot.lane.b32.xlu1 %v2194_v10, %s2342_s24  ;;  %1154 = vrot.lane.b32.xlu0 %v2146_v14, %s2341_s23 }
 0x184   : > { %v1323_v48 = vpop.permute.xlu1 %1322  ;;  %v1163_v55 = vpop.permute.xlu0 %1162 }
 0x185   : > { %v1720_v2 = vsel %vm1694_vm6, %v1687_v50, %v1323_v48  ;;  %v3741_v48 = vld [vmem:[#allocation20_spill] sm:$0xff] }
 0x186   : > { %928 = vrot.lane.b32.xlu1 %v3241_v21, %s2339_s21  ;;  %768 = vrot.lane.b32.xlu0 %v3244_v51, %s2338_s20 }
 0x188   : > { %v937_v17 = vpop.permute.xlu1 %936  ;;  %v3257_v30 = vpop.permute.xlu0 %776 }
 0x18a   : > { %1442 = vrot.lane.b32.xlu1 %v2821_v29, %s2343_s25  ;;  %1282 = vrot.lane.b32.xlu0 %v3027_v31, %s2342_s24  ;;  %v1539_v29 = vsel %vm1529_vm0, %v1506_v45, %v3155_v23  ;;  %v3282_v31 = vld [vmem:[%s2378_s17 + $0xe2] sm:$0xff] }
 0x18b   : > { %v1572_v25 = vsel %vm1562_vm2, %v1539_v29, %v3178_v37 }
 0x18c   : > { %v1451_v58 = vpop.permute.xlu1 %1450  ;;  %v1291_v1 = vpop.permute.xlu0 %1290  ;;  %v1605_v60 = vsel %vm1595_vm3, %v1572_v25, %v907_v62  ;;  %v2160_v25 = vld [vmem:[%s2378_s17 + $0x110] sm:$0xff] }
 0x18d   : > { %v1753_v16 = vsel %vm1727_vm7, %v1720_v2, %v1451_v58  ;;  %v1638_v56 = vsel %vm1628_vm4, %v1605_v60, %v1035_v7  ;;  %v3324_v7 = vld [vmem:[%s2378_s17 + $0x38] sm:$0xff] }
 0x18e   : > { %1056 = vrot.lane.b32.xlu1 %v3042_v3, %s2340_s22  ;;  %896 = vrot.lane.b32.xlu0 %v3267_v13, %s2339_s21  ;;  %v1671_v23 = vsel %vm1661_vm5, %v1638_v56, %v1163_v55  ;;  %v1521_v55 = vsel %vm1496_vm1, %v3066_v57, %v3741_v48  ;;  %v3386_v56 = vld [vmem:[%s2378_s17 + $0x1a] sm:$0xff] }
 0x18f   : > { %2285 = vmatprep.subr.msk.mxu0 %vm1761_vm8, %v1753_v16  ;;  %v1704_v54 = vsel %vm1694_vm6, %v1671_v23, %v1291_v1  ;;  %v3743_v48 = vld [vmem:[#allocation18_spill] sm:$0xff] }
 0x190   : > { %v1065_v5 = vpop.permute.xlu1 %1064  ;;  %v905_v59 = vpop.permute.xlu0 %904 }
 0x192   : > { %670 = vrot.lane.b32.xlu1 %v3282_v31, %s2337_s19  ;;  %1410 = vrot.lane.b32.xlu0 %v2840_v42, %s2343_s25  ;;  %v3303_v42 = vld [vmem:[%s2378_s17 + $0x22] sm:$0xff] }
 0x194   : > { %v3294_v24 = vpop.permute.xlu1 %678  ;;  %v1419_v37 = vpop.permute.xlu0 %1418 }
 0x195   : > { %v1737_v8 = vsel %vm1727_vm7, %v1704_v54, %v1419_v37  ;;  %v2144_v37 = vld [vmem:[%s2378_s17 + $0x50] sm:$0xff] }
 0x196   : > { %1184 = vrot.lane.b32.xlu1 %v3066_v57, %s2341_s23  ;;  %1024 = vrot.lane.b32.xlu0 %v3063_v6, %s2340_s22 }
 0x197   : > { %2286 = vmatpush3.xpose.msk.msra.mxu0 %vm1761_vm8, %v1737_v8 }
 0x198   : > { %v1193_v62 = vpop.permute.xlu1 %1192  ;;  %v1033_v32 = vpop.permute.xlu0 %1032 }
 0x19a   : > { %798 = vrot.lane.b32.xlu1 %v3306_v11, %s2338_s20  ;;  %638 = vrot.lane.b32.xlu0 %v3303_v42, %s2337_s19 }
 0x19c   : > { %v3313_v43 = vpop.permute.xlu1 %806  ;;  %v3315_v4 = vpop.permute.xlu0 %646 }
 0x19e   : > { %1312 = vrot.lane.b32.xlu1 %v3081_v26, %s2342_s24  ;;  %1152 = vrot.lane.b32.xlu0 %v2145_v39, %s2341_s23  ;;  %v1554_v26 = vsel %vm1529_vm0, %v1521_v55, %v3214_v61  ;;  %v3347_v61 = vld [vmem:[%s2378_s17 + $0x39] sm:$0xff]  ;;  %v3404_v39 = vld [vmem:[%s2378_s17 + $0x30] sm:$0xff]  ;;  %v1520_v55 = vsel %vm1496_vm1, %v3146_v19, %v3743_v48 }
 0x19f   : > { %v1587_v38 = vsel %vm1562_vm2, %v1554_v26, %v3234_v9 }
 0x1a0   : > { %v1321_v10 = vpop.permute.xlu1 %1320  ;;  %v1161_v14 = vpop.permute.xlu0 %1160  ;;  %v1620_v44 = vsel %vm1595_vm3, %v1587_v38, %v937_v17  ;;  %v3742_v17 = vld [vmem:[#allocation11_spill] sm:$0xff] }
 0x1a1   : > { %v1653_v57 = vsel %vm1628_vm4, %v1620_v44, %v1065_v5  ;;  %v1505_v1 = vsel %vm1496_vm1, %v3084_v52, %v3742_v17 }
 0x1a2   : > { %926 = vrot.lane.b32.xlu1 %v3321_v27, %s2339_s21  ;;  %766 = vrot.lane.b32.xlu0 %v3324_v7, %s2338_s20  ;;  %v1686_v34 = vsel %vm1661_vm5, %v1653_v57, %v1193_v62 }
 0x1a3   : > { %v1719_v9 = vsel %vm1694_vm6, %v1686_v34, %v1321_v10 }
 0x1a4   : > { %v935_v33 = vpop.permute.xlu1 %934  ;;  %v3337_v22 = vpop.permute.xlu0 %774 }
 0x1a6   : > { %1440 = vrot.lane.b32.xlu1 %v2897_v36, %s2343_s25  ;;  %1280 = vrot.lane.b32.xlu0 %v3107_v15, %s2342_s24  ;;  %v1538_v36 = vsel %vm1529_vm0, %v1505_v1, %v3236_v49  ;;  %v3362_v15 = vld [vmem:[%s2378_s17 + $0xda] sm:$0xff] }
 0x1a7   : > { %v1571_v16 = vsel %vm1562_vm2, %v1538_v36, %v3257_v30 }
 0x1a8   : > { %v1449_v50 = vpop.permute.xlu1 %1448  ;;  %v1289_v2 = vpop.permute.xlu0 %1288  ;;  %v1604_v45 = vsel %vm1595_vm3, %v1571_v16, %v905_v59 }
 0x1a9   : > { %v1752_v58 = vsel %vm1727_vm7, %v1719_v9, %v1449_v50  ;;  %v1637_v29 = vsel %vm1628_vm4, %v1604_v45, %v1033_v32  ;;  %v3401_v32 = vld [vmem:[%s2378_s17 + $0xf1] sm:$0xff] }
 0x1aa   : > { %1054 = vrot.lane.b32.xlu1 %v3122_v40, %s2340_s22  ;;  %894 = vrot.lane.b32.xlu0 %v3347_v61, %s2339_s21  ;;  %v1670_v49 = vsel %vm1661_vm5, %v1637_v29, %v1161_v14 }
 0x1ab   : > { %2287 = vmatprep.subr.msk.mxu0 %vm1761_vm8, %v1752_v58  ;;  %v1703_v30 = vsel %vm1694_vm6, %v1670_v49, %v1289_v2 }
 0x1ac   : > { %v1063_v18 = vpop.permute.xlu1 %1062  ;;  %v903_v52 = vpop.permute.xlu0 %902 }
 0x1ae   : > { %668 = vrot.lane.b32.xlu1 %v3362_v15, %s2337_s19  ;;  %1408 = vrot.lane.b32.xlu0 %v2913_v28, %s2343_s25  ;;  %v3383_v28 = vld [vmem:[%s2378_s17 + $0xf0] sm:$0xff] }
 0x1b0   : > { %v3375_v5 = vpop.permute.xlu1 %676  ;;  %v1417_v60 = vpop.permute.xlu0 %1416 }
 0x1b1   : > { %v1736_v59 = vsel %vm1727_vm7, %v1703_v30, %v1417_v60 }
 0x1b2   : > { %1182 = vrot.lane.b32.xlu1 %v2160_v25, %s2341_s23  ;;  %1022 = vrot.lane.b32.xlu0 %v3143_v53, %s2340_s22 }
 0x1b3   : > { %2288 = vmatpush3.xpose.msk.msra.mxu0 %vm1761_vm8, %v1736_v59 }
 0x1b4   : > { %v1191_v23 = vpop.permute.xlu1 %1190  ;;  %v1031_v54 = vpop.permute.xlu0 %1030 }
 0x1b6   : > { %796 = vrot.lane.b32.xlu1 %v3383_v28, %s2338_s20  ;;  %636 = vrot.lane.b32.xlu0 %v3386_v56, %s2337_s19 }
 0x1b8   : > { %v3393_v8 = vpop.permute.xlu1 %804  ;;  %v3395_v62 = vpop.permute.xlu0 %644 }
 0x1ba   : > { %1310 = vrot.lane.b32.xlu1 %v3161_v46, %s2342_s24  ;;  %1150 = vrot.lane.b32.xlu0 %v2144_v37, %s2341_s23  ;;  %v1553_v46 = vsel %vm1529_vm0, %v1520_v55, %v3294_v24  ;;  %v3427_v24 = vld [vmem:[%s2378_s17 + $0x31] sm:$0xff] }
 0x1bb   : > { %v1586_v26 = vsel %vm1562_vm2, %v1553_v46, %v3313_v43 }
 0x1bc   : > { %v1319_v10 = vpop.permute.xlu1 %1318  ;;  %v1159_v14 = vpop.permute.xlu0 %1158  ;;  %v1619_v57 = vsel %vm1595_vm3, %v1586_v26, %v935_v33  ;;  %v3744_v33 = vld [vmem:[#allocation8_spill] sm:$0xff] }
 0x1bd   : > { %v1652_v19 = vsel %vm1628_vm4, %v1619_v57, %v1063_v18  ;;  %v1504_v58 = vsel %vm1496_vm1, %v3164_v20, %v3744_v33  ;;  %v2159_v18 = vld [vmem:[%s2378_s17 + $0x108] sm:$0xff] }
 0x1be   : > { %924 = vrot.lane.b32.xlu1 %v3401_v32, %s2339_s21  ;;  %764 = vrot.lane.b32.xlu0 %v3404_v39, %s2338_s20  ;;  %v1685_v34 = vsel %vm1661_vm5, %v1652_v19, %v1191_v23  ;;  %v2094_v23 = vld [vmem:[%s2378_s17 + $0xe1] sm:$0xff] }
 0x1bf   : > { %v1718_v43 = vsel %vm1694_vm6, %v1685_v34, %v1319_v10  ;;  %v2078_v19 = vld [vmem:[%s2378_s17 + $0x21] sm:$0xff] }
 0x1c0   : > { %v933_v38 = vpop.permute.xlu1 %932  ;;  %v3417_v44 = vpop.permute.xlu0 %772 }
 0x1c2   : > { %1438 = vrot.lane.b32.xlu1 %v2966_v47, %s2343_s25  ;;  %1278 = vrot.lane.b32.xlu0 %v3187_v12, %s2342_s24  ;;  %v1537_v47 = vsel %vm1529_vm0, %v1504_v58, %v3315_v4  ;;  %v263_v12 = vld [vmem:[%s2378_s17 + $0xca] sm:$0xff] }
 0x1c3   : > { %v1570_v17 = vsel %vm1562_vm2, %v1537_v47, %v3337_v22 }
 0x1c4   : > { %v1447_v9 = vpop.permute.xlu1 %1446  ;;  %v1287_v50 = vpop.permute.xlu0 %1286  ;;  %v1603_v20 = vsel %vm1595_vm3, %v1570_v17, %v903_v52  ;;  %v247_v52 = vld [vmem:[%s2378_s17 + $0xa] sm:$0xff] }
 0x1c5   : > { %v1751_v2 = vsel %vm1727_vm7, %v1718_v43, %v1447_v9  ;;  %v1636_v16 = vsel %vm1628_vm4, %v1603_v20, %v1031_v54  ;;  %v2046_v54 = vld [vmem:[%s2378_s17 + $0x20] sm:$0xff]  ;;  %v3746_v9 = vld [vmem:[#allocation9_spill] sm:$0xff] }
 0x1c6   : > { %1052 = vrot.lane.b32.xlu1 %v3202_v0, %s2340_s22  ;;  %892 = vrot.lane.b32.xlu0 %v3427_v24, %s2339_s21  ;;  %v1669_v4 = vsel %vm1661_vm5, %v1636_v16, %v1159_v14  ;;  %v3745_v14 = vld [vmem:[#allocation19_spill] sm:$0xff] }
 0x1c7   : > { %2289 = vmatprep.subr.msk.mxu0 %vm1761_vm8, %v1751_v2  ;;  %v1702_v45 = vsel %vm1694_vm6, %v1669_v4, %v1287_v50  ;;  %v1519_v48 = vsel %vm1496_vm1, %v3226_v41, %v3745_v14  ;;  %v188_v41 = vld [vmem:[%s2378_s17 + $0x48] sm:$0xff]  ;;  %v2077_v14 = vld [vmem:[%s2378_s17 + $0x19] sm:$0xff] }
 0x1c8   : > { %v1061_v1 = vpop.permute.xlu1 %1060  ;;  %v901_v36 = vpop.permute.xlu0 %900  ;;  %v1503_v50 = vsel %vm1496_vm1, %v188_v41, %v3746_v9 }
 0x1ca   : > { %666 = vrot.lane.b32.xlu1 %v263_v12, %s2337_s19  ;;  %1406 = vrot.lane.b32.xlu0 %v2987_v35, %s2343_s25  ;;  %v2062_v35 = vld [vmem:[%s2378_s17 + $0xe0] sm:$0xff] }
 0x1cc   : > { %v3452_v29 = vpop.permute.xlu1 %674  ;;  %v1415_v22 = vpop.permute.xlu0 %1414 }
 0x1cd   : > { %v1735_v49 = vsel %vm1727_vm7, %v1702_v45, %v1415_v22  ;;  %v2045_v22 = vld [vmem:[%s2378_s17 + $0x18] sm:$0xff] }
 0x1ce   : > { %1180 = vrot.lane.b32.xlu1 %v2159_v18, %s2341_s23  ;;  %1020 = vrot.lane.b32.xlu0 %v3223_v63, %s2340_s22 }
 0x1cf   : > { %2290 = vmatpush3.xpose.msk.msra.mxu0 %vm1761_vm8, %v1735_v49 }
 0x1d0   : > { %v1189_v25 = vpop.permute.xlu1 %1188  ;;  %v1029_v30 = vpop.permute.xlu0 %1028 }
 0x1d2   : > { %794 = vrot.lane.b32.xlu1 %v2062_v35, %s2338_s20  ;;  %634 = vrot.lane.b32.xlu0 %v247_v52, %s2337_s19  ;;  %v3747_v52 = vld [vmem:[#allocation16_spill] sm:$0xff] }
 0x1d4   : > { %v3463_v60 = vpop.permute.xlu1 %802  ;;  %v3465_v59 = vpop.permute.xlu0 %642 }
 0x1d6   : > { %1308 = vrot.lane.b32.xlu1 %v3241_v21, %s2342_s24  ;;  %1148 = vrot.lane.b32.xlu0 %v3244_v51, %s2341_s23  ;;  %v1552_v21 = vsel %vm1529_vm0, %v1519_v48, %v3375_v5 }
 0x1d7   : > { %v1585_v51 = vsel %vm1562_vm2, %v1552_v21, %v3393_v8 }
 0x1d8   : > { %v1317_v37 = vpop.permute.xlu1 %1316  ;;  %v1157_v10 = vpop.permute.xlu0 %1156  ;;  %v1618_v26 = vsel %vm1595_vm3, %v1585_v51, %v933_v38  ;;  %v3748_v51 = vld [vmem:[#allocation6_spill] sm:$0xff] }
 0x1d9   : > { %v1651_v57 = vsel %vm1628_vm4, %v1618_v26, %v1061_v1 }
 0x1da   : > { %922 = vrot.lane.b32.xlu1 %v2094_v23, %s2339_s21  ;;  %762 = vrot.lane.b32.xlu0 %v2046_v54, %s2338_s20  ;;  %v1684_v5 = vsel %vm1661_vm5, %v1651_v57, %v1189_v25  ;;  %v1518_v25 = vsel %vm1496_vm1, %v3306_v11, %v3747_v52  ;;  %v187_v11 = vld [vmem:[%s2378_s17 + $0x38] sm:$0xff] }
 0x1db   : > { %v1717_v8 = vsel %vm1694_vm6, %v1684_v5, %v1317_v37 }
 0x1dc   : > { %v931_v55 = vpop.permute.xlu1 %930  ;;  %v3482_v46 = vpop.permute.xlu0 %770 }
 0x1de   : > { %1436 = vrot.lane.b32.xlu1 %v3042_v3, %s2343_s25  ;;  %1276 = vrot.lane.b32.xlu0 %v3267_v13, %s2342_s24  ;;  %v1536_v3 = vsel %vm1529_vm0, %v1503_v50, %v3395_v62  ;;  %v262_v13 = vld [vmem:[%s2378_s17 + $0xc2] sm:$0xff]  ;;  %v2158_v62 = vld [vmem:[%s2378_s17 + $0xf8] sm:$0xff] }
 0x1df   : > { %v1569_v2 = vsel %vm1562_vm2, %v1536_v3, %v3417_v44  ;;  %v3749_v50 = vld [vmem:[#allocation17_spill] sm:$0xff] }
 0x1e0   : > { %v1445_v34 = vpop.permute.xlu1 %1444  ;;  %v1285_v43 = vpop.permute.xlu0 %1284  ;;  %v1602_v47 = vsel %vm1595_vm3, %v1569_v2, %v901_v36  ;;  %v246_v36 = vld [vmem:[%s2378_s17 + $0x2] sm:$0xff] }
 0x1e1   : > { %v1750_v38 = vsel %vm1727_vm7, %v1717_v8, %v1445_v34  ;;  %v1635_v12 = vsel %vm1628_vm4, %v1602_v47, %v1029_v30 }
 0x1e2   : > { %1050 = vrot.lane.b32.xlu1 %v3282_v31, %s2340_s22  ;;  %890 = vrot.lane.b32.xlu0 %v2078_v19, %s2339_s21  ;;  %v1668_v31 = vsel %vm1661_vm5, %v1635_v12, %v1157_v10 }
 0x1e3   : > { %2291 = vmatprep.subr.msk.mxu0 %vm1761_vm8, %v1750_v38  ;;  %v1701_v17 = vsel %vm1694_vm6, %v1668_v31, %v1285_v43 }
 0x1e4   : > { %v1059_v33 = vpop.permute.xlu1 %1058  ;;  %v899_v58 = vpop.permute.xlu0 %898 }
 0x1e6   : > { %664 = vrot.lane.b32.xlu1 %v262_v13, %s2337_s19  ;;  %1404 = vrot.lane.b32.xlu0 %v3063_v6, %s2343_s25  ;;  %v2061_v6 = vld [vmem:[%s2378_s17 + $0xd8] sm:$0xff] }
 0x1e8   : > { %v3514_v1 = vpop.permute.xlu1 %672  ;;  %v1413_v44 = vpop.permute.xlu0 %1412 }
 0x1e9   : > { %v1734_v20 = vsel %vm1727_vm7, %v1701_v17, %v1413_v44  ;;  %v3750_v17 = vld [vmem:[#allocation7_spill] sm:$0xff] }
 0x1ea   : > { %1178 = vrot.lane.b32.xlu1 %v2158_v62, %s2341_s23  ;;  %1018 = vrot.lane.b32.xlu0 %v3303_v42, %s2340_s22  ;;  %v2093_v42 = vld [vmem:[%s2378_s17 + $0xd9] sm:$0xff] }
 0x1eb   : > { %2292 = vmatpush3.xpose.msk.msra.mxu0 %vm1761_vm8, %v1734_v20 }
 0x1ec   : > { %v1187_v16 = vpop.permute.xlu1 %1186  ;;  %v1027_v4 = vpop.permute.xlu0 %1026 }
 0x1ee   : > { %792 = vrot.lane.b32.xlu1 %v2061_v6, %s2338_s20  ;;  %632 = vrot.lane.b32.xlu0 %v246_v36, %s2337_s19 }
 0x1f0   : > { %v801_v18 = vpop.permute.xlu1 %800  ;;  %v3525_v45 = vpop.permute.xlu0 %640 }
 0x1f2   : > { %1306 = vrot.lane.b32.xlu1 %v3321_v27, %s2342_s24  ;;  %1146 = vrot.lane.b32.xlu0 %v3324_v7, %s2341_s23  ;;  %v1551_v27 = vsel %vm1529_vm0, %v1518_v25, %v3452_v29 }
 0x1f3   : > { %v1584_v7 = vsel %vm1562_vm2, %v1551_v27, %v3463_v60 }
 0x1f4   : > { %v1315_v49 = vpop.permute.xlu1 %1314  ;;  %v1155_v35 = vpop.permute.xlu0 %1154  ;;  %v1617_v54 = vsel %vm1595_vm3, %v1584_v7, %v931_v55  ;;  %v1502_v55 = vsel %vm1496_vm1, %v187_v11, %v3748_v51 }
 0x1f5   : > { %v1650_v37 = vsel %vm1628_vm4, %v1617_v54, %v1059_v33  ;;  %v3751_v54 = vld [vmem:[#allocation14_spill] sm:$0xff] }
 0x1f6   : > { %920 = vrot.lane.b32.xlu1 %v2093_v42, %s2339_s21  ;;  %760 = vrot.lane.b32.xlu0 %v2045_v22, %s2338_s20  ;;  %v1683_v10 = vsel %vm1661_vm5, %v1650_v37, %v1187_v16 }
 0x1f7   : > { %v1716_v29 = vsel %vm1694_vm6, %v1683_v10, %v1315_v49 }
 0x1f8   : > { %v929_v30 = vpop.permute.xlu1 %928  ;;  %v769_v23 = vpop.permute.xlu0 %768 }
 0x1fa   : > { %1434 = vrot.lane.b32.xlu1 %v3122_v40, %s2343_s25  ;;  %1274 = vrot.lane.b32.xlu0 %v3347_v61, %s2342_s24  ;;  %v1535_v40 = vsel %vm1529_vm0, %v1502_v55, %v3465_v59  ;;  %v3573_v59 = vld [vmem:[%s3718_s1] sm:$0xff] }
 0x1fb   : > { %v1568_v61 = vsel %vm1562_vm2, %v1535_v40, %v3482_v46  ;;  %2305 = vmatprep.mubr.msk.f32.mxu0 %vm1761_vm8, %v3573_v59 }
 0x1fc   : > { %v1443_v48 = vpop.permute.xlu1 %1442  ;;  %v1283_v60 = vpop.permute.xlu0 %1282  ;;  %v1601_v41 = vsel %vm1595_vm3, %v1568_v61, %v899_v58  ;;  %v186_v58 = vld [vmem:[%s2378_s17 + $0x30] sm:$0xff] }
 0x1fd   : > { %v1749_v21 = vsel %vm1727_vm7, %v1716_v29, %v1443_v48  ;;  %v1634_v5 = vsel %vm1628_vm4, %v1601_v41, %v1027_v4 }
 0x1fe   : > { %1048 = vrot.lane.b32.xlu1 %v3362_v15, %s2340_s22  ;;  %888 = vrot.lane.b32.xlu0 %v2077_v14, %s2339_s21  ;;  %v1667_v15 = vsel %vm1661_vm5, %v1634_v5, %v1155_v35 }
 0x1ff   : > { %2293 = vmatprep.subr.msk.mxu0 %vm1761_vm8, %v1749_v21  ;;  %v1700_v46 = vsel %vm1694_vm6, %v1667_v15, %v1283_v60  ;;  %v185_v21 = vld [vmem:[%s2378_s17 + $0x20] sm:$0xff] }
 0x200   : > { %v1057_v26 = vpop.permute.xlu1 %1056  ;;  %v897_v57 = vpop.permute.xlu0 %896 }
 0x202   : > { %1016 = vrot.lane.b32.xlu1 %v3386_v56, %s2340_s22  ;;  %1402 = vrot.lane.b32.xlu0 %v3143_v53, %s2343_s25 }
 0x204   : > { %v671_v19 = vpop.permute.xlu1 %670  ;;  %v1411_v8 = vpop.permute.xlu0 %1410 }
 0x205   : > { %v1733_v56 = vsel %vm1727_vm7, %v1700_v46, %v1411_v8 }
 0x206   : > { %1144 = vrot.lane.b32.xlu1 %v3404_v39, %s2341_s23  ;;  %1176 = vrot.lane.b32.xlu0 %v3383_v28, %s2341_s23  ;;  %v202_v28 = vld [vmem:[%s2378_s17 + $0xf0] sm:$0xff] }
 0x207   : > { %2294 = vmatpush3.xpose.msk.msra.mxu0 %vm1761_vm8, %v1733_v56  ;;  %v1517_v3 = vsel %vm1496_vm1, %v202_v28, %v3749_v50 }
 0x208   : > { %v1185_v53 = vpop.permute.xlu1 %1184  ;;  %v1025_v34 = vpop.permute.xlu0 %1024 }
 0x20a   : > { %1272 = vrot.lane.b32.xlu1 %v3427_v24, %s2342_s24  ;;  %1304 = vrot.lane.b32.xlu0 %v3401_v32, %s2342_s24  ;;  %v1550_v24 = vsel %vm1529_vm0, %v1517_v3, %v3514_v1  ;;  %v1501_v1 = vsel %vm1496_vm1, %v186_v58, %v3750_v17 }
 0x20b   : > { %v1583_v13 = vsel %vm1562_vm2, %v1550_v24, %v801_v18  ;;  %v1534_v44 = vsel %vm1529_vm0, %v1501_v1, %v3525_v45 }
 0x20c   : > { %v799_v43 = vpop.permute.xlu1 %798  ;;  %v639_v38 = vpop.permute.xlu0 %638  ;;  %v1616_v33 = vsel %vm1595_vm3, %v1583_v13, %v929_v30  ;;  %v1567_v20 = vsel %vm1562_vm2, %v1534_v44, %v769_v23  ;;  %v2324_v23 = vld [vmem:[%s2378_s17 + $0xe0] sm:$0xff] }
 0x20d   : > { %v1600_v16 = vsel %vm1595_vm3, %v1567_v20, %v897_v57  ;;  %v1516_v37 = vsel %vm1496_vm1, %v2324_v23, %v3751_v54  ;;  %v3752_v57 = vld [vmem:[#allocation4_spill] sm:$0xff] }
 0x20e   : > { %1400 = vrot.lane.b32.xlu1 %v3223_v63, %s2343_s25  ;;  %1432 = vrot.lane.b32.xlu0 %v3202_v0, %s2343_s25  ;;  %v1649_v63 = vsel %vm1628_vm4, %v1616_v33, %v1057_v26  ;;  %v1633_v4 = vsel %vm1628_vm4, %v1600_v16, %v1025_v34  ;;  %v1549_v11 = vsel %vm1529_vm0, %v1516_v37, %v671_v19 }
 0x20f   : > { %v1682_v0 = vsel %vm1661_vm5, %v1649_v63, %v1185_v53  ;;  %v1582_v10 = vsel %vm1562_vm2, %v1549_v11, %v799_v43  ;;  %v1500_v41 = vsel %vm1496_vm1, %v185_v21, %v3752_v57 }
 0x210   : > { %v1313_v39 = vpop.permute.xlu1 %1312  ;;  %v1153_v9 = vpop.permute.xlu0 %1152  ;;  %v1533_v5 = vsel %vm1529_vm0, %v1500_v41, %v639_v38 }
 0x211   : > { %v1715_v47 = vsel %vm1694_vm6, %v1682_v0, %v1313_v39  ;;  %v1666_v18 = vsel %vm1661_vm5, %v1633_v4, %v1153_v9 }
 0x214   : > { %v927_v32 = vpop.permute.xlu1 %926  ;;  %v767_v2 = vpop.permute.xlu0 %766 }
 0x215   : > { %v1615_v48 = vsel %vm1595_vm3, %v1582_v10, %v927_v32  ;;  %v1566_v15 = vsel %vm1562_vm2, %v1533_v5, %v767_v2  ;;  %v2325_v32 = vld [vmem:[%s2378_s17 + $0xd8] sm:$0xff]  ;;  %v3753_v2 = vld [vmem:[#allocation15_spill] sm:$0xff] }
 0x216   : > { %v1515_v33 = vsel %vm1496_vm1, %v2325_v32, %v3753_v2 }
 0x218   : > { %v1441_v12 = vpop.permute.xlu1 %1440  ;;  %v1281_v31 = vpop.permute.xlu0 %1280 }
 0x219   : > { %v1748_v62 = vsel %vm1727_vm7, %v1715_v47, %v1441_v12  ;;  %v1699_v42 = vsel %vm1694_vm6, %v1666_v18, %v1281_v31 }
 0x21a   : > { %2295 = vmatprep.subr.msk.mxu0 %vm1761_vm8, %v1748_v62  ;;  %v184_v62 = vld [vmem:[%s2378_s17 + $0x18] sm:$0xff] }
 0x21c   : > { %v1055_v6 = vpop.permute.xlu1 %1054  ;;  %v895_v36 = vpop.permute.xlu0 %894 }
 0x21d   : > { %v1648_v60 = vsel %vm1628_vm4, %v1615_v48, %v1055_v6  ;;  %v1599_v8 = vsel %vm1595_vm3, %v1566_v15, %v895_v36  ;;  %v3754_v36 = vld [vmem:[#allocation2_spill] sm:$0xff] }
 0x21e   : > { %v1499_v16 = vsel %vm1496_vm1, %v184_v62, %v3754_v36 }
 0x220   : > { %v669_v22 = vpop.permute.xlu1 %668  ;;  %v1409_v49 = vpop.permute.xlu0 %1408 }
 0x221   : > { %v1732_v35 = vsel %vm1727_vm7, %v1699_v42, %v1409_v49  ;;  %v1548_v63 = vsel %vm1529_vm0, %v1515_v33, %v669_v22  ;;  %v3757_v33 = vld [vmem:[#allocation3_spill] sm:$0xff] }
 0x222   : > { %2296 = vmatpush3.xpose.msk.msra.mxu0 %vm1761_vm8, %v1732_v35 }
 0x224   : > { %v1183_v45 = vpop.permute.xlu1 %1182  ;;  %v1023_v52 = vpop.permute.xlu0 %1022 }
 0x225   : > { %v1681_v51 = vsel %vm1661_vm5, %v1648_v60, %v1183_v45  ;;  %v1632_v56 = vsel %vm1628_vm4, %v1599_v8, %v1023_v52 }
 0x228   : > { %v797_v25 = vpop.permute.xlu1 %796  ;;  %v637_v27 = vpop.permute.xlu0 %636 }
 0x229   : > { %v1581_v58 = vsel %vm1562_vm2, %v1548_v63, %v797_v25  ;;  %v1532_v4 = vsel %vm1529_vm0, %v1499_v16, %v637_v27 }
 0x22c   : > { %v1311_v7 = vpop.permute.xlu1 %1310  ;;  %v1151_v30 = vpop.permute.xlu0 %1150 }
 0x22d   : > { %v1714_v55 = vsel %vm1694_vm6, %v1681_v51, %v1311_v7  ;;  %v1665_v53 = vsel %vm1661_vm5, %v1632_v56, %v1151_v30 }
 0x230   : > { %v925_v14 = vpop.permute.xlu1 %924  ;;  %v765_v29 = vpop.permute.xlu0 %764 }
 0x231   : > { %v1614_v12 = vsel %vm1595_vm3, %v1581_v58, %v925_v14  ;;  %v1565_v18 = vsel %vm1562_vm2, %v1532_v4, %v765_v29  ;;  %v2326_v14 = vld [vmem:[%s2378_s17 + $0xc8] sm:$0xff]  ;;  %v3755_v29 = vld [vmem:[#allocation12_spill] sm:$0xff]  ;;  %v2327_v58 = vld [vmem:[%s2378_s17 + $0xc0] sm:$0xff] }
 0x232   : > { %v1514_v48 = vsel %vm1496_vm1, %v2326_v14, %v3755_v29 }
 0x234   : > { %v1439_v40 = vpop.permute.xlu1 %1438  ;;  %v1279_v61 = vpop.permute.xlu0 %1278 }
 0x235   : > { %v1747_v26 = vsel %vm1727_vm7, %v1714_v55, %v1439_v40  ;;  %v1698_v34 = vsel %vm1694_vm6, %v1665_v53, %v1279_v61 }
 0x236   : > { %2297 = vmatprep.subr.msk.mxu0 %vm1761_vm8, %v1747_v26  ;;  %v183_v26 = vld [vmem:[%s2378_s17 + $0x8] sm:$0xff] }
 0x238   : > { %v1053_v46 = vpop.permute.xlu1 %1052  ;;  %v893_v19 = vpop.permute.xlu0 %892 }
 0x239   : > { %v1647_v31 = vsel %vm1628_vm4, %v1614_v12, %v1053_v46  ;;  %v1598_v49 = vsel %vm1595_vm3, %v1565_v18, %v893_v19  ;;  %v3756_v19 = vld [vmem:[#allocation5_spill] sm:$0xff] }
 0x23a   : > { %v1498_v8 = vsel %vm1496_vm1, %v183_v26, %v3756_v19 }
 0x23c   : > { %v667_v43 = vpop.permute.xlu1 %666  ;;  %v1407_v28 = vpop.permute.xlu0 %1406 }
 0x23d   : > { %v1731_v39 = vsel %vm1727_vm7, %v1698_v34, %v1407_v28  ;;  %v1547_v60 = vsel %vm1529_vm0, %v1514_v48, %v667_v43 }
 0x23e   : > { %2298 = vmatpush3.xpose.msk.msra.mxu0 %vm1761_vm8, %v1731_v39 }
 0x240   : > { %v1181_v38 = vpop.permute.xlu1 %1180  ;;  %v1021_v9 = vpop.permute.xlu0 %1020 }
 0x241   : > { %v1680_v17 = vsel %vm1661_vm5, %v1647_v31, %v1181_v38  ;;  %v1631_v35 = vsel %vm1628_vm4, %v1598_v49, %v1021_v9 }
 0x244   : > { %v795_v50 = vpop.permute.xlu1 %794  ;;  %v635_v3 = vpop.permute.xlu0 %634 }
 0x245   : > { %v1580_v21 = vsel %vm1562_vm2, %v1547_v60, %v795_v50  ;;  %v1531_v56 = vsel %vm1529_vm0, %v1498_v8, %v635_v3  ;;  %v182_v3 = vld [vmem:[%s2378_s17] sm:$0xff] }
 0x246   : > { %v1497_v63 = vsel %vm1496_vm1, %v182_v3, %v3757_v33 }
 0x248   : > { %v1309_v24 = vpop.permute.xlu1 %1308  ;;  %v1149_v13 = vpop.permute.xlu0 %1148 }
 0x249   : > { %v1713_v1 = vsel %vm1694_vm6, %v1680_v17, %v1309_v24  ;;  %v1664_v45 = vsel %vm1661_vm5, %v1631_v35, %v1149_v13 }
 0x24c   : > { %v923_v0 = vpop.permute.xlu1 %922  ;;  %v763_v47 = vpop.permute.xlu0 %762 }
 0x24d   : > { %v1613_v40 = vsel %vm1595_vm3, %v1580_v21, %v923_v0  ;;  %v1564_v53 = vsel %vm1562_vm2, %v1531_v56, %v763_v47  ;;  %v3758_v0 = vld [vmem:[#allocation13_spill] sm:$0xff] }
 0x24e   : > { %v1513_v47 = vsel %vm1496_vm1, %v2327_v58, %v3758_v0 }
 0x250   : > { %v1437_v44 = vpop.permute.xlu1 %1436  ;;  %v1277_v20 = vpop.permute.xlu0 %1276 }
 0x251   : > { %v1746_v6 = vsel %vm1727_vm7, %v1713_v1, %v1437_v44  ;;  %v1697_v52 = vsel %vm1694_vm6, %v1664_v45, %v1277_v20 }
 0x252   : > { %2299 = vmatprep.subr.msk.mxu0 %vm1761_vm8, %v1746_v6 }
 0x254   : > { %v1051_v42 = vpop.permute.xlu1 %1050  ;;  %v891_v22 = vpop.permute.xlu0 %890 }
 0x255   : > { %v1646_v61 = vsel %vm1628_vm4, %v1613_v40, %v1051_v42  ;;  %v1597_v28 = vsel %vm1595_vm3, %v1564_v53, %v891_v22 }
 0x258   : > { %v665_v25 = vpop.permute.xlu1 %664  ;;  %v1405_v7 = vpop.permute.xlu0 %1404 }
 0x259   : > { %v1730_v30 = vsel %vm1727_vm7, %v1697_v52, %v1405_v7  ;;  %v1546_v12 = vsel %vm1529_vm0, %v1513_v47, %v665_v25 }
 0x25a   : > { %2300 = vmatpush3.xpose.msk.msra.mxu0 %vm1761_vm8, %v1730_v30 }
 0x25c   : > { %v1179_v27 = vpop.permute.xlu1 %1178  ;;  %v1019_v23 = vpop.permute.xlu0 %1018 }
 0x25d   : > { %v1679_v57 = vsel %vm1661_vm5, %v1646_v61, %v1179_v27  ;;  %v1630_v39 = vsel %vm1628_vm4, %v1597_v28, %v1019_v23 }
 0x260   : > { %v793_v54 = vpop.permute.xlu1 %792  ;;  %v633_v37 = vpop.permute.xlu0 %632 }
 0x261   : > { %v1530_v31 = vsel %vm1529_vm0, %v1497_v63, %v633_v37  ;;  %v1579_v62 = vsel %vm1562_vm2, %v1546_v12, %v793_v54 }
 0x264   : > { %v1307_v11 = vpop.permute.xlu1 %1306  ;;  %v1147_v10 = vpop.permute.xlu0 %1146 }
 0x265   : > { %v1712_v41 = vsel %vm1694_vm6, %v1679_v57, %v1307_v11  ;;  %v1663_v38 = vsel %vm1661_vm5, %v1630_v39, %v1147_v10 }
 0x268   : > { %v921_v51 = vpop.permute.xlu1 %920  ;;  %v761_v55 = vpop.permute.xlu0 %760 }
 0x269   : > { %v1563_v17 = vsel %vm1562_vm2, %v1530_v31, %v761_v55  ;;  %v1612_v20 = vsel %vm1595_vm3, %v1579_v62, %v921_v51 }
 0x26c   : > { %v1435_v5 = vpop.permute.xlu1 %1434  ;;  %v1275_v15 = vpop.permute.xlu0 %1274 }
 0x26d   : > { %v1745_v46 = vsel %vm1727_vm7, %v1712_v41, %v1435_v5  ;;  %v1696_v9 = vsel %vm1694_vm6, %v1663_v38, %v1275_v15 }
 0x26e   : > { %2301 = vmatprep.subr.msk.mxu0 %vm1761_vm8, %v1745_v46 }
 0x270   : > { %v1049_v34 = vpop.permute.xlu1 %1048  ;;  %v889_v43 = vpop.permute.xlu0 %888 }
 0x271   : > { %v1596_v6 = vsel %vm1595_vm3, %v1563_v17, %v889_v43  ;;  %v1645_v36 = vsel %vm1628_vm4, %v1612_v20, %v1049_v34 }
 0x274   : > { %v1017_v50 = vpop.permute.xlu1 %1016  ;;  %v1403_v24 = vpop.permute.xlu0 %1402 }
 0x275   : > { %v1729_v13 = vsel %vm1727_vm7, %v1696_v9, %v1403_v24  ;;  %v1629_v16 = vsel %vm1628_vm4, %v1596_v6, %v1017_v50 }
 0x276   : > { %2302 = vmatpush3.xpose.msk.msra.mxu0 %vm1761_vm8, %v1729_v13 }
 0x278   : > { %v1145_v32 = vpop.permute.xlu1 %1144  ;;  %v1177_v2 = vpop.permute.xlu0 %1176 }
 0x279   : > { %v1662_v4 = vsel %vm1661_vm5, %v1629_v16, %v1145_v32  ;;  %v1678_v18 = vsel %vm1661_vm5, %v1645_v36, %v1177_v2 }
 0x27c   : > { %v1273_v1 = vpop.permute.xlu1 %1272  ;;  %v1305_v44 = vpop.permute.xlu0 %1304 }
 0x27d   : > { %v1695_v42 = vsel %vm1694_vm6, %v1662_v4, %v1273_v1  ;;  %v1711_v22 = vsel %vm1694_vm6, %v1678_v18, %v1305_v44 }
 0x280   : > { %v1401_v49 = vpop.permute.xlu1 %1400  ;;  %v1433_v35 = vpop.permute.xlu0 %1432 }
 0x281   : > { %v1728_v45 = vsel %vm1727_vm7, %v1695_v42, %v1401_v49  ;;  %v1744_v52 = vsel %vm1727_vm7, %v1711_v22, %v1433_v35 }
 0x282   : > { %2303 = vmatprep.subr.msk.mxu0 %vm1761_vm8, %v1744_v52 }
 0x283   : > { %2304 = vmatpush3.xpose.msk.msra.mxu0 %vm1761_vm8, %v1728_v45 }
 0x286   : > { %2306 = vmatmul.mubr.msk.f32.vlgmr.msra.gmra.mxu0 %vm1761_vm8, %v3573_v59 }
 0x346   : > { %v1927_v25 = vpop.f32.mrf.mxu0 }
 0x347   : > { %1932 = vst [vmem:[%s177_s4] sm:$0xff] %v1927_v25 }
 0x348   : > { %v1929_v7 = vpop.f32.mrf.mxu0 }
 0x349   : > { %1933 = vst [vmem:[%s177_s4 + $0x8] sm:$0xff] %v1929_v7  ;;  %v1934_v30 = vadd.f32 %v1929_v7, %v1927_v25 }
 0x34b   : > { %1935 = vadd.xlane.f32.xlu0 %v1934_v30 }
 0x3d4   : > { %v1936_v27 = vpop.xlane.xlu0 %1935 }
 0x3d5   : > { %v1938_v23 = vmul.f32 0.00390625, %v1936_v27 }
 0x3d7   : > { %v1939_v54 = vsub.f32 %v1927_v25, %v1938_v23  ;;  %v1940_v37 = vsub.f32 %v1929_v7, %v1938_v23 }
 0x3d9   : > { %v1941_v11 = vmul.f32 %v1939_v54, %v1939_v54  ;;  %v1942_v10 = vmul.f32 %v1940_v37, %v1940_v37 }
 0x3db   : > { %v1943_v14 = vadd.f32 %v1942_v10, %v1941_v11 }
 0x3dd   : > { %1944 = vadd.xlane.f32.xlu1 %v1943_v14 }
 0x466   : > { %v1945_v59 = vpop.xlane.xlu1 %1944 }
 0x467   : > { %v1947_v29 = vsel %vm1946_vm9, %v1938_v23, %v1945_v59 }
 0x468   : > { %1949 = vst.msk [vmem:[%s181_s8] sm:$0xff] %vm1948_vm10, %v1947_v29 }
 0x469 PF: > { %s14_s12 = sadd.s32 1, %s2334_s12  }
 0x46a   : > { %p11_p4 = scmp.ge.s32.totalorder %s14_s12, 4  }
 0x46c   :  { %13 = sbr.rel (!%p11_p4) target bundleno = 1 (0x1), region = 72 }

// kernel: double_convolution.4
= control target key start
LH: loop header
LB: loop body
LE: loop exit
PB: predicated region body
PF: predicated region fallthrough
CT: control target
= control target key end

     0   :  { %s2403_s18 = smov 0   ;;  %s3909_s0 = inlined_call_operand.vmem [shape: f32[2,8,256], index: 0, kind: input, shape index: {}]   ;;  %s3910_s1 = inlined_call_operand.vmem [shape: f32[8,1], index: 1, kind: input, shape index: {}]   ;;  %s3911_s2 = inlined_call_operand.vmem [shape: f32[8,1], index: 2, kind: input, shape index: {}]   ;;  %s3912_s3 = inlined_call_operand.vmem [shape: f32[8,72], index: 3, kind: input, shape index: {}]   ;;  %s3913_s4 = inlined_call_operand.vmem [shape: f32[2,8,256], index: 4, kind: output, shape index: {0}]   ;;  %s3914_s5 = inlined_call_operand.vmem [shape: f32[2,8,2], index: 5, kind: output, shape index: {1}]  }
   0x1 LB: > { %s2251_s19 = sadd.s32 4294967295, %s2361_s18   ;;  %p2255_p0 = scmp.ge.s32.totalorder %s2361_s18, 1  ;;  %s2361_s18 = sphi %s2403_s18, %s16_s18  }
   0x2   : > { %p190_p1 = scmp.lt.s32.totalorder %s2361_s18, 3 }
   0x4   : > { %p191_p2 = pnand %p2255_p0, %p190_p1 }
   0x6   : > { %194 = sbr.rel (%p191_p2) target bundleno = 1501 (0x5dd), region = 36 }
   0xb   : > { %v238_v0 = vld [vmem:[%s3910_s1] sm:$0xff]  ;;  %vm321_vm0 = vcmask 64512   ;;  %v2363_v1 = vmov 0   ;;  %v2364_v2 = vmov 0.0   ;;  %vm356_vm1 = vcmask 58368   ;;  %s2365_s24 = smov 48  }
   0xc   : > { %2350 = vset.pattern.permute.xlu0 %v2363_v1  ;;  %360 = vst.msk [vmem:[#allocation2 + $0x1a0] sm:$0xff] %vm321_vm0, %v2364_v2  ;;  %354 = vst.msk [vmem:[#allocation2] sm:$0xff] %vm321_vm0, %v2364_v2  ;;  %vm362_vm2 = vcmask 57344   ;;  %v246_v3 = vld [vmem:[%s3911_s2] sm:$0xff]  ;;  %s2366_s25 = smov 56   ;;  %s2367_s26 = smov 64  }
   0xd   : > { %355 = vst.msk [vmem:[#allocation2 + $0x8] sm:$0xff] %vm321_vm0, %v2364_v2  ;;  %359 = vst.msk [vmem:[#allocation2 + $0x198] sm:$0xff] %vm321_vm0, %v2364_v2  ;;  %241 = vperm.xlu0 %2350, %v238_v0   ;;  %s2368_s27 = smov 8   ;;  %p222_p3 = scmp.lt.s32.totalorder %s2251_s19, 1  ;;  %vm1744_vm3 = vcmask 130048   ;;  %vm1777_vm4 = vcmask 195584  }
   0xe   : > { %361 = vst.msk [vmem:[#allocation2 + $0x1a8] sm:$0x3] %vm356_vm1, %v2364_v2  ;;  %357 = vst.msk [vmem:[#allocation2 + $0x10] sm:$0x3] %vm356_vm1, %v2364_v2  ;;  %s2369_s7 = smov 16   ;;  %s2370_s8 = smov 24  }
   0xf   : > { %363 = vst.msk [vmem:[#allocation2] sm:$0x1] %vm362_vm2, %v2364_v2  ;;  %364 = vst.msk [vmem:[#allocation2 + $0x18] sm:$0x1] %vm362_vm2, %v2364_v2  ;;  %s4087_s19 = smov (!%p222_p3, %s2251_s19), 1  ;;  %s2371_s9 = smov 32  }
  0x10   : > { %365 = vst.msk [vmem:[#allocation2 + $0x30] sm:$0x1] %vm362_vm2, %v2364_v2  ;;  %366 = vst.msk [vmem:[#allocation2 + $0x48] sm:$0x1] %vm362_vm2, %v2364_v2  ;;  %s2296_s28 = sshll.u32 %s4087_s19, 4  ;;  %s2372_s10 = smov 40  }
  0x11   : > { %367 = vst.msk [vmem:[#allocation2 + $0x60] sm:$0x1] %vm362_vm2, %v2364_v2  ;;  %368 = vst.msk [vmem:[#allocation2 + $0x78] sm:$0x1] %vm362_vm2, %v2364_v2  ;;  %249 = vperm.xlu0 %2350, %v246_v3   ;;  %s226_s6 = scalar_lea.vmem %s3909_s0, %s2296_s28  ;;  %vm1810_vm5 = vcmask 261120   ;;  %vm1843_vm6 = vcmask 326656   ;;  %s231_s15 = scalar_lea.vmem %s3913_s4, %s2296_s28 }
  0x12   : > { %369 = vst.msk [vmem:[#allocation2 + $0x90] sm:$0x1] %vm362_vm2, %v2364_v2  ;;  %370 = vst.msk [vmem:[#allocation2 + $0xa8] sm:$0x1] %vm362_vm2, %v2364_v2  ;;  %v236_v11 = vld [vmem:[%s226_s6] sm:$0xff]  ;;  %v237_v18 = vld [vmem:[%s226_s6 + $0x8] sm:$0xff] }
  0x13   : > { %371 = vst.msk [vmem:[#allocation2 + $0xc0] sm:$0x1] %vm362_vm2, %v2364_v2  ;;  %372 = vst.msk [vmem:[#allocation2 + $0xd8] sm:$0x1] %vm362_vm2, %v2364_v2  ;;  %v623_v4 = vld [vmem:[#allocation2 + $0x1a0] sm:$0xff]  ;;  %vm1876_vm7 = vcmask 392192  }
  0x14   : > { %373 = vst.msk [vmem:[#allocation2 + $0xf0] sm:$0x1] %vm362_vm2, %v2364_v2  ;;  %374 = vst.msk [vmem:[#allocation2 + $0x108] sm:$0x1] %vm362_vm2, %v2364_v2  ;;  %1422 = vrot.lane.b32.xlu1 %v623_v4, %s2365_s24  ;;  %v431_v7 = vld [vmem:[#allocation2 + $0x1] sm:$0xff]  ;;  %v654_v15 = vld [vmem:[#allocation2 + $0x199] sm:$0xff] }
  0x15   : > { %375 = vst.msk [vmem:[#allocation2 + $0x120] sm:$0x1] %vm362_vm2, %v2364_v2  ;;  %376 = vst.msk [vmem:[#allocation2 + $0x138] sm:$0x1] %vm362_vm2, %v2364_v2  ;;  %v655_v5 = vld [vmem:[#allocation2 + $0x1a1] sm:$0xff]  ;;  %720 = vrot.lane.b32.xlu0 %v431_v7, %s2368_s27  ;;  %v432_v8 = vld [vmem:[#allocation2 + $0x9] sm:$0xff] }
  0x16   : > { %377 = vst.msk [vmem:[#allocation2 + $0x150] sm:$0x1] %vm362_vm2, %v2364_v2  ;;  %378 = vst.msk [vmem:[#allocation2 + $0x168] sm:$0x1] %vm362_vm2, %v2364_v2  ;;  %v686_v17 = vld [vmem:[#allocation2 + $0x19a] sm:$0xff]  ;;  %vm1909_vm8 = vcmask 457728  }
  0x17   : > { %379 = vst.msk [vmem:[#allocation2 + $0x180] sm:$0x1] %vm362_vm2, %v2364_v2  ;;  %380 = vst.msk [vmem:[#allocation2 + $0x198] sm:$0x1] %vm362_vm2, %v2364_v2  ;;  %vm1976_vm9 = vcmask 588800   ;;  %vm1942_vm10 = vcmask 523264  }
  0x18   : > { %382 = vst.msk [vmem:[#allocation2 + $0x29] sm:$0x1] %vm362_vm2, %v2364_v2  ;;  %383 = vst.msk [vmem:[#allocation2 + $0x41] sm:$0x1] %vm362_vm2, %v2364_v2  ;;  %1550 = vrot.lane.b32.xlu1 %v655_v5, %s2366_s25  ;;  %s2260_s16 = sshll.u32 %s4087_s19, 3  ;;  %vm2161_vm11 = vcmask 7168  }
  0x19   : > { %384 = vst.msk [vmem:[#allocation2 + $0x59] sm:$0x1] %vm362_vm2, %v2364_v2  ;;  %385 = vst.msk [vmem:[#allocation2 + $0x71] sm:$0x1] %vm362_vm2, %v2364_v2  ;;  %722 = vrot.lane.b32.xlu0 %v432_v8, %s2368_s27  ;;  %s235_s21 = scalar_lea.vmem %s3914_s5, %s2260_s16  ;;  %vm2163_vm12 = vcmask 15360  }
  0x1a   : > { %386 = vst.msk [vmem:[#allocation2 + $0x89] sm:$0x1] %vm362_vm2, %v2364_v2  ;;  %387 = vst.msk [vmem:[#allocation2 + $0xa1] sm:$0x1] %vm362_vm2, %v2364_v2 }
  0x1b   : > { %388 = vst.msk [vmem:[#allocation2 + $0xb9] sm:$0x1] %vm362_vm2, %v2364_v2  ;;  %389 = vst.msk [vmem:[#allocation2 + $0xd1] sm:$0x1] %vm362_vm2, %v2364_v2 }
  0x1c   : > { %390 = vst.msk [vmem:[#allocation2 + $0xe9] sm:$0x1] %vm362_vm2, %v2364_v2  ;;  %391 = vst.msk [vmem:[#allocation2 + $0x101] sm:$0x1] %vm362_vm2, %v2364_v2 }
  0x1d   : > { %392 = vst.msk [vmem:[#allocation2 + $0x119] sm:$0x1] %vm362_vm2, %v2364_v2  ;;  %393 = vst.msk [vmem:[#allocation2 + $0x131] sm:$0x1] %vm362_vm2, %v2364_v2 }
  0x1e   : > { %394 = vst.msk [vmem:[#allocation2 + $0x149] sm:$0x1] %vm362_vm2, %v2364_v2  ;;  %395 = vst.msk [vmem:[#allocation2 + $0x161] sm:$0x1] %vm362_vm2, %v2364_v2  ;;  %v622_v9 = vld [vmem:[#allocation2 + $0x198] sm:$0xff] }
  0x1f   : > { %396 = vst.msk [vmem:[#allocation2 + $0x179] sm:$0x1] %vm362_vm2, %v2364_v2  ;;  %397 = vst.msk [vmem:[#allocation2 + $0x191] sm:$0x1] %vm362_vm2, %v2364_v2  ;;  %1420 = vrot.lane.b32.xlu0 %v622_v9, %s2365_s24 }
  0x20   : > { %398 = vst.msk [vmem:[#allocation2 + $0x1a9] sm:$0x1] %vm362_vm2, %v2364_v2  ;;  %381 = vst.msk [vmem:[#allocation2 + $0x11] sm:$0x1] %vm362_vm2, %v2364_v2 }
  0x23   : > { %1548 = vrot.lane.b32.xlu0 %v654_v15, %s2366_s25 }
  0x27   : > { %v687_v6 = vld [vmem:[#allocation2 + $0x1a2] sm:$0xff]  ;;  %1676 = vrot.lane.b32.xlu0 %v686_v17, %s2367_s26 }
  0x28   : > { %1678 = vrot.lane.b32.xlu1 %v687_v6, %s2367_s26 }
  0x86   : > { %v2477_v22 = vpop.permute.xlu1 %1422 }
  0x88   : > { %v242_v10 = vpop.permute.xlu0 %241 }
  0x89   : > { %v244_v12 = vmul.f32 %v242_v10, %v236_v11  ;;  %v245_v19 = vmul.f32 %v242_v10, %v237_v18 }
  0x8a   : > { %v2479_v23 = vpop.permute.xlu1 %1550 }
  0x8c   : > { %v250_v13 = vpop.permute.xlu0 %249 }
  0x8d   : > { %v252_v14 = vadd.f32 %v250_v13, %v244_v12  ;;  %v253_v20 = vadd.f32 %v250_v13, %v245_v19 }
  0x8f   : > { %v254_v16 = vmax.f32 %v252_v14, 0.0  ;;  %v255_v21 = vmax.f32 %v253_v20, 0.0 }
  0x91   : > { %256 = vxpose.xlu1.b32.start.end [1/1] (short) %v254_v16, 128 }
  0x9a   : > { %v2481_v24 = vpop.permute.xlu1 %1678 }
  0xce   : > { %288 = vxpose.xlu1.b32.start.end [1/1] (short) %v255_v21, 128 }
 0x10d   : > { %v272_v25 = vpop.trf.xlu1 }
 0x10e   : > { %322 = vst.msk [vmem:[#allocation2 + $0x19] sm:$0xff] %vm321_vm0, %v272_v25 }
 0x111   : > { %v273_v26 = vpop.trf.xlu1 }
 0x112   : > { %323 = vst.msk [vmem:[#allocation2 + $0x21] sm:$0xff] %vm321_vm0, %v273_v26 }
 0x115   : > { %v274_v27 = vpop.trf.xlu1  ;;  %v433_v28 = vld [vmem:[#allocation2 + $0x19] sm:$0xff] }
 0x116   : > { %324 = vst.msk [vmem:[#allocation2 + $0x31] sm:$0xff] %vm321_vm0, %v274_v27  ;;  %724 = vrot.lane.b32.xlu0 %v433_v28, %s2368_s27 }
 0x119   : > { %v275_v29 = vpop.trf.xlu1  ;;  %v434_v48 = vld [vmem:[#allocation2 + $0x21] sm:$0xff] }
 0x11a   : > { %325 = vst.msk [vmem:[#allocation2 + $0x39] sm:$0xff] %vm321_vm0, %v275_v29 }
 0x11d   : > { %v276_v30 = vpop.trf.xlu1  ;;  %v435_v59 = vld [vmem:[#allocation2 + $0x31] sm:$0xff] }
 0x11e   : > { %326 = vst.msk [vmem:[#allocation2 + $0x49] sm:$0xff] %vm321_vm0, %v276_v30 }
 0x121   : > { %v277_v31 = vpop.trf.xlu1  ;;  %v436_v63 = vld [vmem:[#allocation2 + $0x39] sm:$0xff] }
 0x122   : > { %327 = vst.msk [vmem:[#allocation2 + $0x51] sm:$0xff] %vm321_vm0, %v277_v31  ;;  %v2602_v31 = vpop.permute.xlu0 %720 }
 0x123   : > { %3930 = vst [vmem:[#allocation3_spill] sm:$0xff] %v2602_v31 }
 0x125   : > { %v278_v32 = vpop.trf.xlu1  ;;  %v437_v2 = vld [vmem:[#allocation2 + $0x49] sm:$0xff] }
 0x126   : > { %328 = vst.msk [vmem:[#allocation2 + $0x61] sm:$0xff] %vm321_vm0, %v278_v32 }
 0x129   : > { %v279_v33 = vpop.trf.xlu1  ;;  %v2543_v9 = vld [vmem:[#allocation2 + $0x51] sm:$0xff] }
 0x12a   : > { %329 = vst.msk [vmem:[#allocation2 + $0x69] sm:$0xff] %vm321_vm0, %v279_v33 }
 0x12d   : > { %v280_v34 = vpop.trf.xlu1  ;;  %v2556_v14 = vld [vmem:[#allocation2 + $0x61] sm:$0xff] }
 0x12e   : > { %330 = vst.msk [vmem:[#allocation2 + $0x79] sm:$0xff] %vm321_vm0, %v280_v34 }
 0x131   : > { %v281_v35 = vpop.trf.xlu1  ;;  %v2571_v19 = vld [vmem:[#allocation2 + $0x69] sm:$0xff] }
 0x132   : > { %331 = vst.msk [vmem:[#allocation2 + $0x81] sm:$0xff] %vm321_vm0, %v281_v35  ;;  %v2618_v35 = vpop.permute.xlu0 %722 }
 0x133   : > { %3931 = vst [vmem:[#allocation4_spill] sm:$0xff] %v2618_v35 }
 0x135   : > { %v282_v36 = vpop.trf.xlu1  ;;  %v2582_v25 = vld [vmem:[#allocation2 + $0x79] sm:$0xff] }
 0x136   : > { %332 = vst.msk [vmem:[#allocation2 + $0x91] sm:$0xff] %vm321_vm0, %v282_v36 }
 0x139   : > { %v283_v37 = vpop.trf.xlu1  ;;  %v2511_v53 = vld [vmem:[#allocation2 + $0x82] sm:$0xff] }
 0x13a   : > { %333 = vst.msk [vmem:[#allocation2 + $0x99] sm:$0xff] %vm321_vm0, %v283_v37  ;;  %v2600_v30 = vld [vmem:[#allocation2 + $0x81] sm:$0xff] }
 0x13d   : > { %v284_v38 = vpop.trf.xlu1 }
 0x13e   : > { %334 = vst.msk [vmem:[#allocation2 + $0xa9] sm:$0xff] %vm321_vm0, %v284_v38  ;;  %v2628_v38 = vld [vmem:[#allocation2 + $0x91] sm:$0xff] }
 0x141   : > { %v285_v39 = vpop.trf.xlu1  ;;  %v2535_v6 = vld [vmem:[#allocation2 + $0x9a] sm:$0xff] }
 0x142   : > { %335 = vst.msk [vmem:[#allocation2 + $0xb1] sm:$0xff] %vm321_vm0, %v285_v39  ;;  %v2550_v12 = vld [vmem:[#allocation2 + $0x98] sm:$0xff]  ;;  %v2630_v39 = vpop.permute.xlu0 %1420 }
 0x143   : > { %v2558_v15 = vld [vmem:[#allocation2 + $0x99] sm:$0xff] }
 0x145   : > { %v286_v40 = vpop.trf.xlu1  ;;  %v2577_v21 = vld [vmem:[#allocation2 + $0xa9] sm:$0xff] }
 0x146   : > { %336 = vst.msk [vmem:[#allocation2 + $0xc1] sm:$0xff] %vm321_vm0, %v286_v40 }
 0x149   : > { %v287_v41 = vpop.trf.xlu1  ;;  %v2584_v26 = vld [vmem:[#allocation2 + $0xb1] sm:$0xff] }
 0x14a   : > { %337 = vst.msk [vmem:[#allocation2 + $0xc9] sm:$0xff] %vm321_vm0, %v287_v41  ;;  %v2592_v28 = vld [vmem:[#allocation2 + $0xb0] sm:$0xff] }
 0x14b   : > { %v2610_v33 = vld [vmem:[#allocation2 + $0xaa] sm:$0xff] }
 0x14d   : > { %v304_v42 = vpop.trf.xlu1  ;;  %v2636_v40 = vld [vmem:[#allocation2 + $0xc1] sm:$0xff] }
 0x14e   : > { %338 = vst.msk [vmem:[#allocation2 + $0xd9] sm:$0xff] %vm321_vm0, %v304_v42  ;;  %v2644_v42 = vpop.permute.xlu0 %1548 }
 0x14f   : > { %3932 = vst [vmem:[#allocation5_spill] sm:$0xff] %v2644_v42 }
 0x151   : > { %v305_v43 = vpop.trf.xlu1 }
 0x152   : > { %339 = vst.msk [vmem:[#allocation2 + $0xe1] sm:$0xff] %vm321_vm0, %v305_v43  ;;  %v2646_v43 = vld [vmem:[#allocation2 + $0xc0] sm:$0xff] }
 0x155   : > { %v306_v44 = vpop.trf.xlu1  ;;  %v606_v45 = vld [vmem:[#allocation2 + $0xd8] sm:$0xff] }
 0x156   : > { %v449_v46 = vld [vmem:[#allocation2 + $0xd9] sm:$0xff]  ;;  %340 = vst.msk [vmem:[#allocation2 + $0xf1] sm:$0xff] %vm321_vm0, %v306_v44  ;;  %1388 = vrot.lane.b32.xlu1 %v606_v45, %s2365_s24  ;;  %v2654_v45 = vpop.permute.xlu0 %1676 }
 0x157   : > { %756 = vrot.lane.b32.xlu0 %v449_v46, %s2368_s27  ;;  %3933 = vst [vmem:[#allocation6_spill] sm:$0xff] %v2654_v45 }
 0x159   : > { %v307_v47 = vpop.trf.xlu1  ;;  %v671_v49 = vld [vmem:[#allocation2 + $0xe2] sm:$0xff]  ;;  %v670_v57 = vld [vmem:[#allocation2 + $0xda] sm:$0xff] }
 0x15a   : > { %341 = vst.msk [vmem:[#allocation2 + $0xf9] sm:$0xff] %vm321_vm0, %v307_v47  ;;  %1516 = vrot.lane.b32.xlu1 %v449_v46, %s2366_s25  ;;  %v450_v50 = vld [vmem:[#allocation2 + $0xe1] sm:$0xff]  ;;  %v2660_v46 = vld [vmem:[#allocation2 + $0x92] sm:$0xff] }
 0x15b   : > { %726 = vrot.lane.b32.xlu0 %v434_v48, %s2368_s27  ;;  %v607_v54 = vld [vmem:[#allocation2 + $0xe0] sm:$0xff] }
 0x15c   : > { %v573_v47 = vld [vmem:[#allocation2 + $0xc2] sm:$0xff] }
 0x15d   : > { %v308_v51 = vpop.trf.xlu1  ;;  %v451_v60 = vld [vmem:[#allocation2 + $0xf1] sm:$0xff] }
 0x15e   : > { %342 = vst.msk [vmem:[#allocation2 + $0x109] sm:$0xff] %vm321_vm0, %v308_v51  ;;  %1646 = vrot.lane.b32.xlu1 %v671_v49, %s2367_s26 }
 0x15f   : > { %758 = vrot.lane.b32.xlu0 %v450_v50, %s2368_s27 }
 0x161   : > { %v309_v52 = vpop.trf.xlu1  ;;  %v452_v0 = vld [vmem:[#allocation2 + $0xf9] sm:$0xff] }
 0x162   : > { %343 = vst.msk [vmem:[#allocation2 + $0x111] sm:$0xff] %vm321_vm0, %v309_v52  ;;  %870 = vrot.lane.b32.xlu1 %v2511_v53, %s2369_s7 }
 0x163   : > { %1390 = vrot.lane.b32.xlu0 %v607_v54, %s2365_s24 }
 0x165   : > { %v310_v55 = vpop.trf.xlu1  ;;  %v453_v5 = vld [vmem:[#allocation2 + $0x109] sm:$0xff] }
 0x166   : > { %344 = vst.msk [vmem:[#allocation2 + $0x121] sm:$0xff] %vm321_vm0, %v310_v55 }
 0x167   : > { %1518 = vrot.lane.b32.xlu0 %v450_v50, %s2366_s25 }
 0x169   : > { %v311_v56 = vpop.trf.xlu1  ;;  %v454_v11 = vld [vmem:[#allocation2 + $0x111] sm:$0xff] }
 0x16a   : > { %345 = vst.msk [vmem:[#allocation2 + $0x129] sm:$0xff] %vm321_vm0, %v311_v56 }
 0x16b   : > { %1644 = vrot.lane.b32.xlu0 %v670_v57, %s2367_s26  ;;  %v2693_v57 = vld [vmem:[#allocation2 + $0xca] sm:$0xff] }
 0x16d   : > { %v312_v58 = vpop.trf.xlu1  ;;  %v455_v16 = vld [vmem:[#allocation2 + $0x121] sm:$0xff] }
 0x16e   : > { %346 = vst.msk [vmem:[#allocation2 + $0x139] sm:$0xff] %vm321_vm0, %v312_v58 }
 0x16f   : > { %728 = vrot.lane.b32.xlu0 %v435_v59, %s2368_s27 }
 0x171   : > { %v313_v61 = vpop.trf.xlu1  ;;  %v456_v20 = vld [vmem:[#allocation2 + $0x129] sm:$0xff] }
 0x172   : > { %347 = vst.msk [vmem:[#allocation2 + $0x141] sm:$0xff] %vm321_vm0, %v313_v61 }
 0x173   : > { %760 = vrot.lane.b32.xlu0 %v451_v60, %s2368_s27  ;;  %v2706_v60 = vld [vmem:[#allocation2 + $0xa8] sm:$0xff] }
 0x175   : > { %v314_v62 = vpop.trf.xlu1  ;;  %v2590_v27 = vld [vmem:[#allocation2 + $0x139] sm:$0xff] }
 0x176   : > { %348 = vst.msk [vmem:[#allocation2 + $0x151] sm:$0xff] %vm321_vm0, %v314_v62 }
 0x177   : > { %730 = vrot.lane.b32.xlu0 %v436_v63, %s2368_s27 }
 0x179   : > { %v315_v1 = vpop.trf.xlu1  ;;  %v2608_v32 = vld [vmem:[#allocation2 + $0x141] sm:$0xff] }
 0x17a   : > { %349 = vst.msk [vmem:[#allocation2 + $0x159] sm:$0xff] %vm321_vm0, %v315_v1  ;;  %v2620_v36 = vld [vmem:[#allocation2 + $0x142] sm:$0xff]  ;;  %v2926_v45 = vld [vmem:[#allocation2 + $0x13a] sm:$0xff] }
 0x17b   : > { %762 = vrot.lane.b32.xlu0 %v452_v0, %s2368_s27  ;;  %v2718_v0 = vld [vmem:[#allocation2 + $0x7a] sm:$0xff] }
 0x17d   : > { %v2529_v3 = vld [vmem:[#allocation2 + $0x151] sm:$0xff]  ;;  %v316_v4 = vpop.trf.xlu1 }
 0x17e   : > { %776 = vrot.lane.b32.xlu1 %v2529_v3, %s2368_s27  ;;  %350 = vst.msk [vmem:[#allocation2 + $0x169] sm:$0xff] %vm321_vm0, %v316_v4 }
 0x17f   : > { %732 = vrot.lane.b32.xlu0 %v437_v2, %s2368_s27 }
 0x181   : > { %v317_v7 = vpop.trf.xlu1  ;;  %v2541_v8 = vld [vmem:[#allocation2 + $0x152] sm:$0xff]  ;;  %v2652_v44 = vld [vmem:[#allocation2 + $0x15a] sm:$0xff] }
 0x182   : > { %874 = vrot.lane.b32.xlu1 %v2535_v6, %s2369_s7  ;;  %351 = vst.msk [vmem:[#allocation2 + $0x171] sm:$0xff] %vm321_vm0, %v317_v7  ;;  %v2642_v41 = vld [vmem:[#allocation2 + $0x159] sm:$0xff]  ;;  %v2734_v7 = vld [vmem:[#allocation2 + $0x90] sm:$0xff] }
 0x183   : > { %764 = vrot.lane.b32.xlu0 %v453_v5, %s2368_s27  ;;  %v2669_v50 = vld [vmem:[#allocation2 + $0x158] sm:$0xff] }
 0x184   : > { %v478_v5 = vld [vmem:[#allocation2 + $0xb2] sm:$0xff] }
 0x185   : > { %v318_v10 = vpop.trf.xlu1  ;;  %v2564_v17 = vld [vmem:[#allocation2 + $0x168] sm:$0xff] }
 0x186   : > { %904 = vrot.lane.b32.xlu1 %v2541_v8, %s2369_s7  ;;  %352 = vst.msk [vmem:[#allocation2 + $0x181] sm:$0xff] %vm321_vm0, %v318_v10  ;;  %v2569_v18 = vld [vmem:[#allocation2 + $0x169] sm:$0xff] }
 0x187   : > { %734 = vrot.lane.b32.xlu0 %v2543_v9, %s2368_s27 }
 0x188   : > { %v2667_v49 = vpop.permute.xlu0 %724 }
 0x189   : > { %v319_v13 = vpop.trf.xlu1  ;;  %v2598_v29 = vld [vmem:[#allocation2 + $0x172] sm:$0xff]  ;;  %3934 = vst [vmem:[#allocation7_spill] sm:$0xff] %v2667_v49 }
 0x18a   : > { %998 = vrot.lane.b32.xlu1 %v2550_v12, %s2370_s8  ;;  %353 = vst.msk [vmem:[#allocation2 + $0x189] sm:$0xff] %vm321_vm0, %v319_v13  ;;  %v2714_v62 = vld [vmem:[#allocation2 + $0x171] sm:$0xff] }
 0x18b   : > { %766 = vrot.lane.b32.xlu0 %v454_v11, %s2368_s27  ;;  %v2743_v13 = vld [vmem:[#allocation2 + $0x16a] sm:$0xff] }
 0x18c   : > { %v2761_v35 = vld [vmem:[#allocation2 + $0x170] sm:$0xff] }
 0x18d   : > { %v2616_v34 = vld [vmem:[#allocation2 + $0x180] sm:$0xff] }
 0x18e   : > { %1126 = vrot.lane.b32.xlu1 %v2558_v15, %s2371_s9  ;;  %v2626_v37 = vld [vmem:[#allocation2 + $0x181] sm:$0xff] }
 0x18f   : > { %736 = vrot.lane.b32.xlu0 %v2556_v14, %s2368_s27 }
 0x191   : > { %v2665_v48 = vld [vmem:[#allocation2 + $0x188] sm:$0xff] }
 0x192   : > { %1032 = vrot.lane.b32.xlu1 %v2564_v17, %s2370_s8  ;;  %v2675_v51 = vld [vmem:[#allocation2 + $0x189] sm:$0xff] }
 0x193   : > { %768 = vrot.lane.b32.xlu0 %v455_v16, %s2368_s27  ;;  %v2683_v54 = vld [vmem:[#allocation2 + $0x18a] sm:$0xff] }
 0x196   : > { %1160 = vrot.lane.b32.xlu1 %v2569_v18, %s2371_s9 }
 0x197   : > { %738 = vrot.lane.b32.xlu0 %v2571_v19, %s2368_s27 }
 0x19a   : > { %1128 = vrot.lane.b32.xlu1 %v2577_v21, %s2371_s9 }
 0x19b   : > { %770 = vrot.lane.b32.xlu0 %v456_v20, %s2368_s27 }
 0x19e   : > { %750 = vrot.lane.b32.xlu1 %v2584_v26, %s2368_s27 }
 0x19f   : > { %740 = vrot.lane.b32.xlu0 %v2582_v25, %s2368_s27 }
 0x1a2   : > { %1002 = vrot.lane.b32.xlu1 %v2592_v28, %s2370_s8 }
 0x1a3   : > { %772 = vrot.lane.b32.xlu0 %v2590_v27, %s2368_s27 }
 0x1a6   : > { %1290 = vrot.lane.b32.xlu1 %v2598_v29, %s2372_s10 }
 0x1a7   : > { %742 = vrot.lane.b32.xlu0 %v2600_v30, %s2368_s27 }
 0x1aa   : > { %1256 = vrot.lane.b32.xlu1 %v2610_v33, %s2372_s10 }
 0x1ab   : > { %774 = vrot.lane.b32.xlu0 %v2608_v32, %s2368_s27 }
 0x1ae   : > { %1036 = vrot.lane.b32.xlu1 %v2616_v34, %s2370_s8 }
 0x1af   : > { %902 = vrot.lane.b32.xlu0 %v2620_v36, %s2369_s7 }
 0x1b2   : > { %1164 = vrot.lane.b32.xlu1 %v2626_v37, %s2371_s9 }
 0x1b3   : > { %744 = vrot.lane.b32.xlu0 %v2628_v38, %s2368_s27 }
 0x1b6   : > { %1132 = vrot.lane.b32.xlu1 %v2636_v40, %s2371_s9 }
 0x1b7   : > { %746 = vrot.lane.b32.xlu0 %v2558_v15, %s2368_s27 }
 0x1ba   : > { %1384 = vrot.lane.b32.xlu1 %v2646_v43, %s2365_s24 }
 0x1bb   : > { %778 = vrot.lane.b32.xlu0 %v2642_v41, %s2368_s27 }
 0x1be   : > { %1512 = vrot.lane.b32.xlu1 %v2636_v40, %s2366_s25 }
 0x1bf   : > { %906 = vrot.lane.b32.xlu0 %v2652_v44, %s2369_s7 }
 0x1c2   : > { %1260 = vrot.lane.b32.xlu1 %v573_v47, %s2372_s10 }
 0x1c3   : > { %872 = vrot.lane.b32.xlu0 %v2660_v46, %s2369_s7 }
 0x1c6   : > { %1418 = vrot.lane.b32.xlu1 %v2665_v48, %s2365_s24 }
 0x1c7   : > { %1030 = vrot.lane.b32.xlu0 %v2669_v50, %s2370_s8 }
 0x1c8   : > { %v2708_v61 = vpop.permute.xlu1 %1388 }
 0x1c9   : > { %v2677_v52 = vpop.permute.xlu0 %756 }
 0x1ca   : > { %3935 = vst [vmem:[#allocation8_spill] sm:$0xff] %v2677_v52  ;;  %1546 = vrot.lane.b32.xlu1 %v2675_v51, %s2366_s25 }
 0x1cb   : > { %1158 = vrot.lane.b32.xlu0 %v2642_v41, %s2371_s9 }
 0x1cc   : > { %v2724_v1 = vpop.permute.xlu1 %1516 }
 0x1cd   : > { %v2685_v55 = vpop.permute.xlu0 %726  ;;  %3939 = vst [vmem:[#allocation12_spill] sm:$0xff] %v2724_v1  ;;  %v2972_v1 = vld [vmem:[#allocation2 + $0x60] sm:$0xff] }
 0x1ce   : > { %3936 = vst [vmem:[#allocation9_spill] sm:$0xff] %v2685_v55  ;;  %1674 = vrot.lane.b32.xlu1 %v2683_v54, %s2367_s26 }
 0x1cf   : > { %1286 = vrot.lane.b32.xlu0 %v2652_v44, %s2372_s10 }
 0x1d0   : > { %v2736_v10 = vpop.permute.xlu1 %1646 }
 0x1d1   : > { %v2691_v56 = vpop.permute.xlu0 %758 }
 0x1d2   : > { %3937 = vst [vmem:[#allocation10_spill] sm:$0xff] %v2691_v56  ;;  %1642 = vrot.lane.b32.xlu1 %v2693_v57, %s2367_s26 }
 0x1d3   : > { %748 = vrot.lane.b32.xlu0 %v2577_v21, %s2368_s27 }
 0x1d4   : > { %v2749_v16 = vpop.permute.xlu1 %870 }
 0x1d5   : > { %v2699_v58 = vpop.permute.xlu0 %1390  ;;  %3943 = vst [vmem:[#allocation16_spill] sm:$0xff] %v2749_v16 }
 0x1d6   : > { %1640 = vrot.lane.b32.xlu1 %v573_v47, %s2367_s26 }
 0x1d7   : > { %780 = vrot.lane.b32.xlu0 %v2569_v18, %s2368_s27 }
 0x1d9   : > { %v2704_v59 = vpop.permute.xlu0 %1518 }
 0x1da   : > { %1254 = vrot.lane.b32.xlu1 %v2535_v6, %s2372_s10 }
 0x1db   : > { %1000 = vrot.lane.b32.xlu0 %v2706_v60, %s2370_s8 }
 0x1dd   : > { %v2716_v63 = vpop.permute.xlu0 %1644 }
 0x1de   : > { %3938 = vst [vmem:[#allocation11_spill] sm:$0xff] %v2716_v63  ;;  %868 = vrot.lane.b32.xlu1 %v2718_v0, %s2369_s7  ;;  %v2894_v63 = vld [vmem:[#allocation2 + $0x52] sm:$0xff] }
 0x1df   : > { %782 = vrot.lane.b32.xlu0 %v2714_v62, %s2368_s27  ;;  %3971 = vst [vmem:[#allocation44_spill] sm:$0xff] %v2894_v63 }
 0x1e1   : > { %v2726_v2 = vpop.permute.xlu0 %728 }
 0x1e2   : > { %3940 = vst [vmem:[#allocation13_spill] sm:$0xff] %v2726_v2  ;;  %1382 = vrot.lane.b32.xlu1 %v2592_v28, %s2365_s24  ;;  %v2778_v2 = vld [vmem:[#allocation2 + $0x6a] sm:$0xff] }
 0x1e3   : > { %910 = vrot.lane.b32.xlu0 %v2598_v29, %s2369_s7 }
 0x1e5   : > { %v2732_v4 = vpop.permute.xlu0 %760 }
 0x1e6   : > { %3941 = vst [vmem:[#allocation14_spill] sm:$0xff] %v2732_v4  ;;  %996 = vrot.lane.b32.xlu1 %v2734_v7, %s2370_s8 }
 0x1e7   : > { %878 = vrot.lane.b32.xlu0 %v478_v5, %s2369_s7 }
 0x1e9   : > { %v2741_v11 = vpop.permute.xlu0 %730 }
 0x1ea   : > { %3942 = vst [vmem:[#allocation15_spill] sm:$0xff] %v2741_v11  ;;  %1510 = vrot.lane.b32.xlu1 %v2584_v26, %s2366_s25 }
 0x1eb   : > { %908 = vrot.lane.b32.xlu0 %v2743_v13, %s2369_s7 }
 0x1ed   : > { %v2751_v20 = vpop.permute.xlu0 %762 }
 0x1ee   : > { %3944 = vst [vmem:[#allocation17_spill] sm:$0xff] %v2751_v20  ;;  %1124 = vrot.lane.b32.xlu1 %v2628_v38, %s2371_s9 }
 0x1ef   : > { %876 = vrot.lane.b32.xlu0 %v2610_v33, %s2369_s7 }
 0x1f0   : > { %v2759_v31 = vpop.permute.xlu1 %776 }
 0x1f1   : > { %v2757_v47 = vpop.permute.xlu0 %732  ;;  %3946 = vst [vmem:[#allocation19_spill] sm:$0xff] %v2759_v31  ;;  %v589_v31 = vld [vmem:[#allocation2 + $0x182] sm:$0xff] }
 0x1f2   : > { %3945 = vst [vmem:[#allocation18_spill] sm:$0xff] %v2757_v47  ;;  %1638 = vrot.lane.b32.xlu1 %v478_v5, %s2367_s26 }
 0x1f3   : > { %1034 = vrot.lane.b32.xlu0 %v2761_v35, %s2370_s8 }
 0x1f4   : > { %v2768_v52 = vpop.permute.xlu1 %874 }
 0x1f5   : > { %v2766_v49 = vpop.permute.xlu0 %764 }
 0x1f6   : > { %3947 = vst [vmem:[#allocation20_spill] sm:$0xff] %v2766_v49  ;;  %1252 = vrot.lane.b32.xlu1 %v2660_v46, %s2372_s10  ;;  %v2795_v49 = vld [vmem:[#allocation2 + $0x80] sm:$0xff] }
 0x1f7   : > { %1162 = vrot.lane.b32.xlu0 %v2714_v62, %s2371_s9  ;;  %3954 = vst [vmem:[#allocation27_spill] sm:$0xff] %v2795_v49 }
 0x1f8   : > { %v2776_v56 = vpop.permute.xlu1 %904 }
 0x1f9   : > { %v2774_v55 = vpop.permute.xlu0 %734  ;;  %3949 = vst [vmem:[#allocation22_spill] sm:$0xff] %v2776_v56 }
 0x1fa   : > { %3948 = vst [vmem:[#allocation21_spill] sm:$0xff] %v2774_v55  ;;  %866 = vrot.lane.b32.xlu1 %v2778_v2, %s2369_s7 }
 0x1fb   : > { %1130 = vrot.lane.b32.xlu0 %v2584_v26, %s2371_s9 }
 0x1fc   : > { %v2786_v11 = vpop.permute.xlu1 %998 }
 0x1fd   : > { %v2784_v4 = vpop.permute.xlu0 %766  ;;  %3951 = vst [vmem:[#allocation24_spill] sm:$0xff] %v2786_v11  ;;  %v510_v11 = vld [vmem:[#allocation2 + $0xc8] sm:$0xff] }
 0x1fe   : > { %3950 = vst [vmem:[#allocation23_spill] sm:$0xff] %v2784_v4  ;;  %1380 = vrot.lane.b32.xlu1 %v2706_v60, %s2365_s24 }
 0x1ff   : > { %1258 = vrot.lane.b32.xlu0 %v478_v5, %s2372_s10 }
 0x200   : > { %v2793_v47 = vpop.permute.xlu1 %1126 }
 0x201   : > { %v2791_v20 = vpop.permute.xlu0 %736  ;;  %3953 = vst [vmem:[#allocation26_spill] sm:$0xff] %v2793_v47  ;;  %v2837_v47 = vld [vmem:[#allocation2 + $0x62] sm:$0xff] }
 0x202   : > { %3952 = vst [vmem:[#allocation25_spill] sm:$0xff] %v2791_v20  ;;  %994 = vrot.lane.b32.xlu1 %v2795_v49, %s2370_s8  ;;  %3963 = vst [vmem:[#allocation36_spill] sm:$0xff] %v2837_v47 }
 0x203   : > { %1288 = vrot.lane.b32.xlu0 %v2743_v13, %s2372_s10 }
 0x204   : > { %v2803_v55 = vpop.permute.xlu1 %1032 }
 0x205   : > { %v2801_v26 = vpop.permute.xlu0 %768  ;;  %3956 = vst [vmem:[#allocation29_spill] sm:$0xff] %v2803_v55 }
 0x206   : > { %3955 = vst [vmem:[#allocation28_spill] sm:$0xff] %v2801_v26  ;;  %1508 = vrot.lane.b32.xlu1 %v2577_v21, %s2366_s25 }
 0x207   : > { %752 = vrot.lane.b32.xlu0 %v2636_v40, %s2368_s27 }
 0x208   : > { %v2811_v4 = vpop.permute.xlu1 %1160 }
 0x209   : > { %v2809_v5 = vpop.permute.xlu0 %738  ;;  %3958 = vst [vmem:[#allocation31_spill] sm:$0xff] %v2811_v4 }
 0x20a   : > { %3957 = vst [vmem:[#allocation30_spill] sm:$0xff] %v2809_v5  ;;  %1122 = vrot.lane.b32.xlu1 %v2600_v30, %s2371_s9 }
 0x20b   : > { %1004 = vrot.lane.b32.xlu0 %v2646_v43, %s2370_s8 }
 0x20c   : > { %v2819_v26 = vpop.permute.xlu1 %1128 }
 0x20d   : > { %v2817_v20 = vpop.permute.xlu0 %770 }
 0x20e   : > { %3959 = vst [vmem:[#allocation32_spill] sm:$0xff] %v2817_v20  ;;  %1636 = vrot.lane.b32.xlu1 %v2610_v33, %s2367_s26  ;;  %v448_v20 = vld [vmem:[#allocation2 + $0xc9] sm:$0xff] }
 0x20f   : > { %1416 = vrot.lane.b32.xlu0 %v2616_v34, %s2365_s24 }
 0x210   : > { %v2827_v40 = vpop.permute.xlu1 %750 }
 0x211   : > { %v2825_v21 = vpop.permute.xlu0 %740 }
 0x212   : > { %3960 = vst [vmem:[#allocation33_spill] sm:$0xff] %v2825_v21  ;;  %1250 = vrot.lane.b32.xlu1 %v2511_v53, %s2372_s10 }
 0x213   : > { %1544 = vrot.lane.b32.xlu0 %v2626_v37, %s2366_s25 }
 0x214   : > { %v2835_v5 = vpop.permute.xlu1 %1002 }
 0x215   : > { %v2833_v43 = vpop.permute.xlu0 %772  ;;  %3962 = vst [vmem:[#allocation35_spill] sm:$0xff] %v2835_v5 }
 0x216   : > { %3961 = vst [vmem:[#allocation34_spill] sm:$0xff] %v2833_v43  ;;  %864 = vrot.lane.b32.xlu1 %v2837_v47, %s2369_s7  ;;  %v2854_v43 = vld [vmem:[#allocation2 + $0x78] sm:$0xff] }
 0x217   : > { %754 = vrot.lane.b32.xlu0 %v448_v20, %s2368_s27  ;;  %3967 = vst [vmem:[#allocation40_spill] sm:$0xff] %v2854_v43 }
 0x218   : > { %v2844_v34 = vpop.permute.xlu1 %1290 }
 0x219   : > { %v2842_v33 = vpop.permute.xlu0 %742 }
 0x21a   : > { %3964 = vst [vmem:[#allocation37_spill] sm:$0xff] %v2842_v33  ;;  %1378 = vrot.lane.b32.xlu1 %v2550_v12, %s2365_s24 }
 0x21b   : > { %1038 = vrot.lane.b32.xlu0 %v2665_v48, %s2370_s8 }
 0x21c   : > { %v2852_v21 = vpop.permute.xlu1 %1256 }
 0x21d   : > { %v2850_v37 = vpop.permute.xlu0 %774  ;;  %3966 = vst [vmem:[#allocation39_spill] sm:$0xff] %v2852_v21 }
 0x21e   : > { %3965 = vst [vmem:[#allocation38_spill] sm:$0xff] %v2850_v37  ;;  %992 = vrot.lane.b32.xlu1 %v2854_v43, %s2370_s8 }
 0x21f   : > { %1006 = vrot.lane.b32.xlu0 %v510_v11, %s2370_s8 }
 0x220   : > { %v2861_v33 = vpop.permute.xlu1 %1036 }
 0x221   : > { %v2859_v16 = vpop.permute.xlu0 %902 }
 0x222   : > { %3968 = vst [vmem:[#allocation41_spill] sm:$0xff] %v2859_v16  ;;  %1506 = vrot.lane.b32.xlu1 %v2558_v15, %s2366_s25 }
 0x223   : > { %1166 = vrot.lane.b32.xlu0 %v2675_v51, %s2371_s9 }
 0x224   : > { %v2869_v37 = vpop.permute.xlu1 %1164 }
 0x225   : > { %v2867_v48 = vpop.permute.xlu0 %744 }
 0x226   : > { %1120 = vrot.lane.b32.xlu1 %v2582_v25, %s2371_s9 }
 0x227   : > { %1134 = vrot.lane.b32.xlu0 %v448_v20, %s2371_s9 }
 0x228   : > { %v2876_v16 = vpop.permute.xlu1 %1132 }
 0x229   : > { %v2874_v4 = vpop.permute.xlu0 %746 }
 0x22a   : > { %1634 = vrot.lane.b32.xlu1 %v2535_v6, %s2367_s26 }
 0x22b   : > { %1294 = vrot.lane.b32.xlu0 %v2683_v54, %s2372_s10 }
 0x22c   : > { %v2884_v51 = vpop.permute.xlu1 %1384 }
 0x22d   : > { %v2882_v15 = vpop.permute.xlu0 %778  ;;  %3969 = vst [vmem:[#allocation42_spill] sm:$0xff] %v2884_v51  ;;  %v2910_v51 = vld [vmem:[#allocation2 + $0x68] sm:$0xff] }
 0x22e   : > { %1248 = vrot.lane.b32.xlu1 %v2718_v0, %s2372_s10  ;;  %3973 = vst [vmem:[#allocation46_spill] sm:$0xff] %v2910_v51 }
 0x22f   : > { %1262 = vrot.lane.b32.xlu0 %v2693_v57, %s2372_s10 }
 0x230   : > { %v2892_v56 = vpop.permute.xlu1 %1512 }
 0x231   : > { %v2890_v55 = vpop.permute.xlu0 %906  ;;  %3970 = vst [vmem:[#allocation43_spill] sm:$0xff] %v2892_v56 }
 0x232   : > { %862 = vrot.lane.b32.xlu1 %v2894_v63, %s2369_s7 }
 0x233   : > { %1292 = vrot.lane.b32.xlu0 %v589_v31, %s2372_s10 }
 0x234   : > { %v2901_v54 = vpop.permute.xlu1 %1260 }
 0x235   : > { %v2899_v6 = vpop.permute.xlu0 %872 }
 0x236   : > { %1376 = vrot.lane.b32.xlu1 %v2734_v7, %s2365_s24 }
 0x237   : > { %1386 = vrot.lane.b32.xlu0 %v510_v11, %s2365_s24 }
 0x238   : > { %v2908_v56 = vpop.permute.xlu1 %1418 }
 0x239   : > { %v2906_v57 = vpop.permute.xlu0 %1030 }
 0x23a   : > { %3972 = vst [vmem:[#allocation45_spill] sm:$0xff] %v2906_v57  ;;  %990 = vrot.lane.b32.xlu1 %v2910_v51, %s2370_s8 }
 0x23b   : > { %1514 = vrot.lane.b32.xlu0 %v448_v20, %s2366_s25 }
 0x23c   : > { %v2917_v21 = vpop.permute.xlu1 %1546 }
 0x23d   : > { %v2915_v5 = vpop.permute.xlu0 %1158  ;;  %3975 = vst [vmem:[#allocation48_spill] sm:$0xff] %v2917_v21  ;;  %v2954_v21 = vld [vmem:[#allocation2 + $0x4a] sm:$0xff] }
 0x23e   : > { %3974 = vst [vmem:[#allocation47_spill] sm:$0xff] %v2915_v5  ;;  %1504 = vrot.lane.b32.xlu1 %v2628_v38, %s2366_s25 }
 0x23f   : > { %1672 = vrot.lane.b32.xlu0 %v589_v31, %s2367_s26 }
 0x240   : > { %v2924_v57 = vpop.permute.xlu1 %1674 }
 0x241   : > { %v2922_v11 = vpop.permute.xlu0 %1286  ;;  %3977 = vst [vmem:[#allocation50_spill] sm:$0xff] %v2924_v57 }
 0x242   : > { %3976 = vst [vmem:[#allocation49_spill] sm:$0xff] %v2922_v11  ;;  %1118 = vrot.lane.b32.xlu1 %v2571_v19, %s2371_s9  ;;  %v2944_v11 = vld [vmem:[#allocation2 + $0x150] sm:$0xff] }
 0x243   : > { %900 = vrot.lane.b32.xlu0 %v2926_v45, %s2369_s7 }
 0x244   : > { %v2934_v5 = vpop.permute.xlu1 %1642 }
 0x245   : > { %v2932_v20 = vpop.permute.xlu0 %748  ;;  %3978 = vst [vmem:[#allocation51_spill] sm:$0xff] %v2934_v5 }
 0x246   : > { %1632 = vrot.lane.b32.xlu1 %v2660_v46, %s2367_s26 }
 0x247   : > { %1414 = vrot.lane.b32.xlu0 %v2761_v35, %s2365_s24 }
 0x248   : > { %v2942_v38 = vpop.permute.xlu1 %1640 }
 0x249   : > { %v2940_v31 = vpop.permute.xlu0 %780  ;;  %3979 = vst [vmem:[#allocation52_spill] sm:$0xff] %v2942_v38 }
 0x24a   : > { %1246 = vrot.lane.b32.xlu1 %v2778_v2, %s2372_s10 }
 0x24b   : > { %1028 = vrot.lane.b32.xlu0 %v2944_v11, %s2370_s8 }
 0x24c   : > { %v2952_v5 = vpop.permute.xlu1 %1254 }
 0x24d   : > { %v2950_v57 = vpop.permute.xlu0 %1000  ;;  %3980 = vst [vmem:[#allocation53_spill] sm:$0xff] %v2952_v5 }
 0x24e   : > { %860 = vrot.lane.b32.xlu1 %v2954_v21, %s2369_s7 }
 0x24f   : > { %1542 = vrot.lane.b32.xlu0 %v2714_v62, %s2366_s25 }
 0x250   : > { %v2962_v38 = vpop.permute.xlu1 %868 }
 0x251   : > { %v2960_v46 = vpop.permute.xlu0 %782  ;;  %3981 = vst [vmem:[#allocation54_spill] sm:$0xff] %v2962_v38 }
 0x252   : > { %1374 = vrot.lane.b32.xlu1 %v2795_v49, %s2365_s24  ;;  %v2990_v49 = vld [vmem:[#allocation2 + $0x12a] sm:$0xff] }
 0x253   : > { %1156 = vrot.lane.b32.xlu0 %v2529_v3, %s2371_s9  ;;  %3985 = vst [vmem:[#allocation58_spill] sm:$0xff] %v2990_v49 }
 0x254   : > { %v2970_v5 = vpop.permute.xlu1 %1382 }
 0x255   : > { %v2968_v42 = vpop.permute.xlu0 %910  ;;  %3982 = vst [vmem:[#allocation55_spill] sm:$0xff] %v2970_v5 }
 0x256   : > { %988 = vrot.lane.b32.xlu1 %v2972_v1, %s2370_s8 }
 0x257   : > { %1670 = vrot.lane.b32.xlu0 %v2598_v29, %s2367_s26 }
 0x258   : > { %v2980_v38 = vpop.permute.xlu1 %996 }
 0x259   : > { %v2978_v62 = vpop.permute.xlu0 %878  ;;  %3983 = vst [vmem:[#allocation56_spill] sm:$0xff] %v2980_v38 }
 0x25a   : > { %1502 = vrot.lane.b32.xlu1 %v2600_v30, %s2366_s25 }
 0x25b   : > { %1284 = vrot.lane.b32.xlu0 %v2541_v8, %s2372_s10 }
 0x25c   : > { %v2988_v5 = vpop.permute.xlu1 %1510 }
 0x25d   : > { %v2986_v3 = vpop.permute.xlu0 %908  ;;  %3984 = vst [vmem:[#allocation57_spill] sm:$0xff] %v2988_v5  ;;  %v3008_v5 = vld [vmem:[#allocation2 + $0x140] sm:$0xff] }
 0x25e   : > { %1116 = vrot.lane.b32.xlu1 %v2556_v14, %s2371_s9  ;;  %3988 = vst [vmem:[#allocation61_spill] sm:$0xff] %v3008_v5 }
 0x25f   : > { %898 = vrot.lane.b32.xlu0 %v2990_v49, %s2369_s7  ;;  %v3018_v49 = vld [vmem:[#allocation2 + $0x3a] sm:$0xff] }
 0x260   : > { %v2998_v38 = vpop.permute.xlu1 %1124 }
 0x261   : > { %v2996_v29 = vpop.permute.xlu0 %876  ;;  %3986 = vst [vmem:[#allocation59_spill] sm:$0xff] %v2998_v38 }
 0x262   : > { %1630 = vrot.lane.b32.xlu1 %v2511_v53, %s2367_s26 }
 0x263   : > { %1412 = vrot.lane.b32.xlu0 %v2564_v17, %s2365_s24 }
 0x264   : > { %v3006_v30 = vpop.permute.xlu1 %1638 }
 0x265   : > { %v3004_v8 = vpop.permute.xlu0 %1034  ;;  %3987 = vst [vmem:[#allocation60_spill] sm:$0xff] %v3006_v30 }
 0x266   : > { %1244 = vrot.lane.b32.xlu1 %v2837_v47, %s2372_s10 }
 0x267   : > { %1026 = vrot.lane.b32.xlu0 %v3008_v5, %s2370_s8  ;;  %v3036_v5 = vld [vmem:[#allocation2 + $0x50] sm:$0xff] }
 0x268   : > { %v3016_v38 = vpop.permute.xlu1 %1252 }
 0x269   : > { %v3014_v14 = vpop.permute.xlu0 %1162  ;;  %3989 = vst [vmem:[#allocation62_spill] sm:$0xff] %v3016_v38 }
 0x26a   : > { %858 = vrot.lane.b32.xlu1 %v3018_v49, %s2369_s7 }
 0x26b   : > { %1540 = vrot.lane.b32.xlu0 %v2569_v18, %s2366_s25 }
 0x26c   : > { %v3026_v30 = vpop.permute.xlu1 %866 }
 0x26d   : > { %v3024_v53 = vpop.permute.xlu0 %1130  ;;  %3990 = vst [vmem:[#allocation63_spill] sm:$0xff] %v3026_v30 }
 0x26e   : > { %1372 = vrot.lane.b32.xlu1 %v2854_v43, %s2365_s24  ;;  %v3054_v43 = vld [vmem:[#allocation2 + $0x122] sm:$0xff] }
 0x26f   : > { %1154 = vrot.lane.b32.xlu0 %v2608_v32, %s2371_s9 }
 0x270   : > { %v3034_v38 = vpop.permute.xlu1 %1380 }
 0x271   : > { %v3032_v47 = vpop.permute.xlu0 %1258  ;;  %3991 = vst [vmem:[#allocation64_spill] sm:$0xff] %v3034_v38 }
 0x272   : > { %986 = vrot.lane.b32.xlu1 %v3036_v5, %s2370_s8 }
 0x273   : > { %1668 = vrot.lane.b32.xlu0 %v2743_v13, %s2367_s26 }
 0x274   : > { %v3044_v30 = vpop.permute.xlu1 %994 }
 0x275   : > { %v3042_v18 = vpop.permute.xlu0 %1288  ;;  %3992 = vst [vmem:[#allocation65_spill] sm:$0xff] %v3044_v30 }
 0x276   : > { %1500 = vrot.lane.b32.xlu1 %v2582_v25, %s2366_s25 }
 0x277   : > { %1282 = vrot.lane.b32.xlu0 %v2620_v36, %s2372_s10 }
 0x278   : > { %v3052_v38 = vpop.permute.xlu1 %1508 }
 0x279   : > { %v3050_v32 = vpop.permute.xlu0 %752  ;;  %3994 = vst [vmem:[#allocation67_spill] sm:$0xff] %v3052_v38  ;;  %v3080_v38 = vld [vmem:[#allocation2 + $0x32] sm:$0xff] }
 0x27a   : > { %3993 = vst [vmem:[#allocation66_spill] sm:$0xff] %v3050_v32  ;;  %1114 = vrot.lane.b32.xlu1 %v2543_v9, %s2371_s9  ;;  %v3070_v32 = vld [vmem:[#allocation2 + $0x138] sm:$0xff] }
 0x27b   : > { %896 = vrot.lane.b32.xlu0 %v3054_v43, %s2369_s7  ;;  %3997 = vst [vmem:[#allocation70_spill] sm:$0xff] %v3070_v32 }
 0x27c   : > { %v3060_v30 = vpop.permute.xlu1 %1122 }
 0x27d   : > { %v1005_v13 = vpop.permute.xlu0 %1004  ;;  %3995 = vst [vmem:[#allocation68_spill] sm:$0xff] %v3060_v30 }
 0x27e   : > { %1628 = vrot.lane.b32.xlu1 %v2718_v0, %s2367_s26 }
 0x27f   : > { %1410 = vrot.lane.b32.xlu0 %v2669_v50, %s2365_s24 }
 0x280   : > { %v3068_v36 = vpop.permute.xlu1 %1636 }
 0x281   : > { %v3066_v25 = vpop.permute.xlu0 %1416  ;;  %3996 = vst [vmem:[#allocation69_spill] sm:$0xff] %v3068_v36 }
 0x282   : > { %1242 = vrot.lane.b32.xlu1 %v2894_v63, %s2372_s10 }
 0x283   : > { %1024 = vrot.lane.b32.xlu0 %v3070_v32, %s2370_s8  ;;  %v3096_v32 = vld [vmem:[#allocation2 + $0x48] sm:$0xff] }
 0x284   : > { %v3078_v30 = vpop.permute.xlu1 %1250  ;;  %4002 = vst [vmem:[#allocation75_spill] sm:$0xff] %v3096_v32 }
 0x285   : > { %v3076_v9 = vpop.permute.xlu0 %1544  ;;  %3998 = vst [vmem:[#allocation71_spill] sm:$0xff] %v3078_v30 }
 0x286   : > { %856 = vrot.lane.b32.xlu1 %v3080_v38, %s2369_s7 }
 0x287   : > { %1538 = vrot.lane.b32.xlu0 %v2642_v41, %s2366_s25 }
 0x288   : > { %v3088_v36 = vpop.permute.xlu1 %864 }
 0x289   : > { %v3086_v0 = vpop.permute.xlu0 %754  ;;  %4000 = vst [vmem:[#allocation73_spill] sm:$0xff] %v3088_v36 }
 0x28a   : > { %3999 = vst [vmem:[#allocation72_spill] sm:$0xff] %v3086_v0  ;;  %1370 = vrot.lane.b32.xlu1 %v2910_v51, %s2365_s24  ;;  %v3112_v51 = vld [vmem:[#allocation2 + $0x49] sm:$0xff] }
 0x28b   : > { %1152 = vrot.lane.b32.xlu0 %v2590_v27, %s2371_s9  ;;  %4006 = vst [vmem:[#allocation79_spill] sm:$0xff] %v3112_v51 }
 0x28c   : > { %v3094_v30 = vpop.permute.xlu1 %1378 }
 0x28d   : > { %v1039_v63 = vpop.permute.xlu0 %1038  ;;  %4001 = vst [vmem:[#allocation74_spill] sm:$0xff] %v3094_v30  ;;  %v3110_v30 = vld [vmem:[#allocation2 + $0x112] sm:$0xff] }
 0x28e   : > { %984 = vrot.lane.b32.xlu1 %v3096_v32, %s2370_s8  ;;  %4005 = vst [vmem:[#allocation78_spill] sm:$0xff] %v3110_v30 }
 0x28f   : > { %1666 = vrot.lane.b32.xlu0 %v2652_v44, %s2367_s26  ;;  %v1726_v44 = vsel %vm321_vm0, %v2706_v60, %v2932_v20 }
 0x290   : > { %v3102_v0 = vpop.permute.xlu1 %992 }
 0x291   : > { %v1007_v41 = vpop.permute.xlu0 %1006  ;;  %4003 = vst [vmem:[#allocation76_spill] sm:$0xff] %v3102_v0  ;;  %v1743_v0 = vsel %vm321_vm0, %v2761_v35, %v2960_v46  ;;  %v1741_v35 = vsel %vm321_vm0, %v2669_v50, %v2882_v15  ;;  %v1742_v46 = vsel %vm321_vm0, %v2564_v17, %v2940_v31  ;;  %v3150_v50 = vld [vmem:[#allocation2 + $0x128] sm:$0xff] }
 0x292   : > { %1498 = vrot.lane.b32.xlu1 %v2571_v19, %s2366_s25  ;;  %v1774_v20 = vsel %vm1744_vm3, %v1741_v35, %v2890_v55  ;;  %v1775_v17 = vsel %vm1744_vm3, %v1742_v46, %v2986_v3  ;;  %v4010_v46 = vld [vmem:[#allocation6_spill] sm:$0xff] }
 0x293   : > { %1280 = vrot.lane.b32.xlu0 %v2926_v45, %s2372_s10 }
 0x294   : > { %v3108_v36 = vpop.permute.xlu1 %1506 }
 0x295   : > { %v1167_v27 = vpop.permute.xlu0 %1166  ;;  %4004 = vst [vmem:[#allocation77_spill] sm:$0xff] %v3108_v36  ;;  %v1759_v36 = vsel %vm1744_vm3, %v1726_v44, %v2996_v29  ;;  %v4008_v44 = vld [vmem:[#allocation5_spill] sm:$0xff] }
 0x296   : > { %1112 = vrot.lane.b32.xlu1 %v3112_v51, %s2371_s9  ;;  %v1776_v51 = vsel %vm1744_vm3, %v1743_v0, %v2968_v42  ;;  %v1727_v42 = vsel %vm321_vm0, %v2592_v28, %v2827_v40  ;;  %v1807_v28 = vsel %vm1777_vm4, %v1774_v20, %v3004_v8  ;;  %v3188_v0 = vld [vmem:[#allocation2 + $0x22] sm:$0xff] }
 0x297   : > { %894 = vrot.lane.b32.xlu0 %v3110_v30, %s2369_s7  ;;  %v1792_v30 = vsel %vm1777_vm4, %v1759_v36, %v1005_v13  ;;  %v1809_v60 = vsel %vm1777_vm4, %v1776_v51, %v1039_v63  ;;  %v1760_v63 = vsel %vm1744_vm3, %v1727_v42, %v2978_v62  ;;  %v1840_v15 = vsel %vm1810_vm5, %v1807_v28, %v3014_v14 }
 0x298   : > { %v3121_v19 = vpop.permute.xlu1 %1120  ;;  %v1825_v55 = vsel %vm1810_vm5, %v1792_v30, %v2876_v16  ;;  %v1793_v16 = vsel %vm1777_vm4, %v1760_v63, %v1007_v41  ;;  %v1724_v14 = vsel %vm321_vm0, %v2734_v7, %v2867_v48  ;;  %v1808_v36 = vsel %vm1777_vm4, %v1775_v17, %v2861_v33  ;;  %v4012_v63 = vld [vmem:[#allocation35_spill] sm:$0xff] }
 0x299   : > { %v1135_v32 = vpop.permute.xlu0 %1134  ;;  %v1858_v62 = vsel %vm1843_vm6, %v1825_v55, %v2901_v54  ;;  %v1757_v7 = vsel %vm1744_vm3, %v1724_v14, %v2899_v6  ;;  %v680_v55 = vld [vmem:[#allocation2 + $0x152] sm:$0xff] }
 0x29a   : > { %1626 = vrot.lane.b32.xlu1 %v2778_v2, %s2367_s26  ;;  %v1842_v2 = vsel %vm1810_vm5, %v1809_v60, %v1167_v27  ;;  %v1826_v3 = vsel %vm1810_vm5, %v1793_v16, %v1135_v32  ;;  %v648_v32 = vld [vmem:[#allocation2 + $0x151] sm:$0xff] }
 0x29b   : > { %1408 = vrot.lane.b32.xlu0 %v2944_v11, %s2365_s24  ;;  %v4009_v60 = vld [vmem:[#allocation48_spill] sm:$0xff] }
 0x29c   : > { %v3148_v13 = vpop.permute.xlu1 %1634 }
 0x29d   : > { %v1295_v29 = vpop.permute.xlu0 %1294 }
 0x29e   : > { %v1875_v40 = vsel %vm1843_vm6, %v1842_v2, %v1295_v29  ;;  %1240 = vrot.lane.b32.xlu1 %v2954_v21, %s2372_s10  ;;  %v4011_v2 = vld [vmem:[#allocation39_spill] sm:$0xff] }
 0x29f   : > { %v1908_v51 = vsel %vm1876_vm7, %v1875_v40, %v2477_v22  ;;  %1022 = vrot.lane.b32.xlu0 %v3150_v50, %s2370_s8  ;;  %v4013_v40 = vld [vmem:[#allocation11_spill] sm:$0xff] }
 0x2a0   : > { %v1941_v31 = vsel %vm1909_vm8, %v1908_v51, %v2479_v23  ;;  %v3175_v22 = vpop.permute.xlu1 %1248  ;;  %v1873_v23 = vsel %vm1843_vm6, %v1840_v15, %v2844_v34  ;;  %v1790_v34 = vsel %vm1777_vm4, %v1757_v7, %v2950_v57  ;;  %v3245_v15 = vld [vmem:[#allocation2 + $0x38] sm:$0xff]  ;;  %v4014_v51 = vld [vmem:[#allocation19_spill] sm:$0xff] }
 0x2a1   : > { %v1263_v8 = vpop.permute.xlu0 %1262  ;;  %v1974_v30 = vsel %vm1942_vm10, %v1941_v31, %v2481_v24  ;;  %v1725_v24 = vsel %vm321_vm0, %v2550_v12, %v2874_v4  ;;  %v1891_v12 = vsel %vm1876_vm7, %v1858_v62, %v2708_v61  ;;  %v1906_v4 = vsel %vm1876_vm7, %v1873_v23, %v2908_v56  ;;  %v3218_v61 = vld [vmem:[#allocation2 + $0x129] sm:$0xff] }
 0x2a2   : > { %v1859_v54 = vsel %vm1843_vm6, %v1826_v3, %v1263_v8  ;;  %2298 = vmatprep.subr.msk.mxu0 %vm1976_vm9, %v1974_v30  ;;  %854 = vrot.lane.b32.xlu1 %v3188_v0, %s2369_s7  ;;  %v1758_v57 = vsel %vm1744_vm3, %v1725_v24, %v2768_v52  ;;  %v1823_v56 = vsel %vm1810_vm5, %v1790_v34, %v2819_v26  ;;  %v4015_v62 = vld [vmem:[#allocation50_spill] sm:$0xff]  ;;  %v4019_v7 = vld [vmem:[#allocation31_spill] sm:$0xff] }
 0x2a3   : > { %v1892_v33 = vsel %vm1876_vm7, %v1859_v54, %v2699_v58  ;;  %1536 = vrot.lane.b32.xlu0 %v648_v32, %s2366_s25  ;;  %v1841_v58 = vsel %vm1810_vm5, %v1808_v36, %v2869_v37  ;;  %v1939_v42 = vsel %vm1909_vm8, %v1906_v4, %v4009_v60  ;;  %v1856_v29 = vsel %vm1843_vm6, %v1823_v56, %v4011_v2  ;;  %v4016_v8 = vld [vmem:[#allocation22_spill] sm:$0xff]  ;;  %v4021_v4 = vld [vmem:[#allocation51_spill] sm:$0xff]  ;;  %v4024_v60 = vld [vmem:[#allocation61_spill] sm:$0xff] }
 0x2a4   : > { %v1925_v48 = vsel %vm1909_vm8, %v1892_v33, %v2704_v59  ;;  %v3210_v41 = vpop.permute.xlu1 %862  ;;  %v1791_v28 = vsel %vm1777_vm4, %v1758_v57, %v4012_v63  ;;  %v1740_v16 = vsel %vm321_vm0, %v2944_v11, %v4014_v51  ;;  %v1972_v3 = vsel %vm1942_vm10, %v1939_v42, %v4015_v62  ;;  %v4017_v11 = vld [vmem:[#allocation29_spill] sm:$0xff]  ;;  %v4018_v32 = vld [vmem:[#allocation42_spill] sm:$0xff]  ;;  %v4025_v42 = vld [vmem:[#allocation36_spill] sm:$0xff] }
 0x2a5   : > { %v1293_v6 = vpop.permute.xlu0 %1292  ;;  %v1958_v27 = vsel %vm1942_vm10, %v1925_v48, %v2736_v10  ;;  %v4007_v10 = vld [vmem:[#allocation12_spill] sm:$0xff]  ;;  %v1824_v31 = vsel %vm1810_vm5, %v1791_v28, %v3024_v53  ;;  %v1773_v30 = vsel %vm1744_vm3, %v1740_v16, %v4016_v8  ;;  %v1889_v24 = vsel %vm1876_vm7, %v1856_v29, %v4018_v32  ;;  %v4020_v48 = vld [vmem:[#allocation58_spill] sm:$0xff]  ;;  %v4026_v63 = vld [vmem:[#allocation37_spill] sm:$0xff] }
 0x2a6   : > { %v1874_v59 = vsel %vm1843_vm6, %v1841_v58, %v1293_v6  ;;  %2299 = vmatpush3.xpose.msk.msra.mxu0 %vm1976_vm9, %v1958_v27  ;;  %1368 = vrot.lane.b32.xlu1 %v2972_v1, %s2365_s24  ;;  %v1924_v52 = vsel %vm1909_vm8, %v1891_v12, %v4007_v10  ;;  %v1857_v14 = vsel %vm1843_vm6, %v1824_v31, %v3032_v47  ;;  %v628_v12 = vld [vmem:[#allocation2 + $0x61] sm:$0xff]  ;;  %v4022_v27 = vld [vmem:[#allocation43_spill] sm:$0xff]  ;;  %v4028_v51 = vld [vmem:[#allocation16_spill] sm:$0xff] }
 0x2a7   : > { %v1907_v37 = vsel %vm1876_vm7, %v1874_v59, %v2630_v39  ;;  %1150 = vrot.lane.b32.xlu0 %v3218_v61, %s2371_s9  ;;  %v1957_v17 = vsel %vm1942_vm10, %v1924_v52, %v4013_v40  ;;  %v1806_v53 = vsel %vm1777_vm4, %v1773_v30, %v4017_v11  ;;  %v1922_v57 = vsel %vm1909_vm8, %v1889_v24, %v4022_v27  ;;  %v3290_v10 = vld [vmem:[#allocation2 + $0x10a] sm:$0xff]  ;;  %v4023_v52 = vld [vmem:[#allocation52_spill] sm:$0xff]  ;;  %v647_v40 = vld [vmem:[#allocation2 + $0x141] sm:$0xff] }
 0x2a8   : > { %v1940_v35 = vsel %vm1909_vm8, %v1907_v37, %v4008_v44  ;;  %v3234_v26 = vpop.permute.xlu1 %1376  ;;  %v1839_v33 = vsel %vm1810_vm5, %v1806_v53, %v4019_v7  ;;  %v1955_v44 = vsel %vm1942_vm10, %v1922_v57, %v4023_v52  ;;  %v4027_v28 = vld [vmem:[#allocation27_spill] sm:$0xff]  ;;  %v4029_v8 = vld [vmem:[#allocation38_spill] sm:$0xff]  ;;  %v4031_v53 = vld [vmem:[#allocation24_spill] sm:$0xff] }
 0x2a9   : > { %v1387_v20 = vpop.permute.xlu0 %1386  ;;  %v1973_v39 = vsel %vm1942_vm10, %v1940_v35, %v4010_v46  ;;  %v1872_v34 = vsel %vm1843_vm6, %v1839_v33, %v3042_v18  ;;  %v1739_v30 = vsel %vm321_vm0, %v4024_v60, %v4029_v8  ;;  %v4033_v33 = vld [vmem:[#allocation47_spill] sm:$0xff]  ;;  %v4036_v57 = vld [vmem:[#allocation53_spill] sm:$0xff] }
 0x2aa   : > { %2300 = vmatprep.subr.msk.mxu0 %vm1976_vm9, %v1973_v39  ;;  %982 = vrot.lane.b32.xlu1 %v3245_v15, %s2370_s8  ;;  %v1890_v36 = vsel %vm1876_vm7, %v1857_v14, %v1387_v20  ;;  %v1905_v58 = vsel %vm1876_vm7, %v1872_v34, %v3066_v25  ;;  %v3295_v25 = vld [vmem:[#allocation2 + $0x39] sm:$0xff]  ;;  %v679_v34 = vld [vmem:[#allocation2 + $0x142] sm:$0xff] }
 0x2ab   : > { %1664 = vrot.lane.b32.xlu0 %v680_v55, %s2367_s26  ;;  %2301 = vmatpush3.xpose.msk.msra.mxu0 %vm1976_vm9, %v1957_v17  ;;  %v1938_v18 = vsel %vm1909_vm8, %v1905_v58, %v3076_v9  ;;  %v3312_v39 = vld [vmem:[#allocation2 + $0x120] sm:$0xff]  ;;  %v1723_v55 = vsel %vm321_vm0, %v4027_v28, %v4026_v63  ;;  %v4035_v58 = vld [vmem:[#allocation26_spill] sm:$0xff] }
 0x2ac   : > { %2302 = vmatprep.subr.msk.mxu0 %vm1976_vm9, %v1972_v3  ;;  %v3266_v54 = vpop.permute.xlu1 %990  ;;  %v3326_v17 = vld [vmem:[#allocation2 + $0x1a] sm:$0xff]  ;;  %v1756_v16 = vsel %vm1744_vm3, %v1723_v55, %v4028_v51 }
 0x2ad   : > { %v1515_v23 = vpop.permute.xlu0 %1514  ;;  %v3334_v3 = vld [vmem:[#allocation2 + $0x121] sm:$0xff] }
 0x2ae   : > { %v1923_v47 = vsel %vm1909_vm8, %v1890_v36, %v1515_v23  ;;  %1496 = vrot.lane.b32.xlu1 %v628_v12, %s2366_s25  ;;  %v4030_v14 = vld [vmem:[#allocation41_spill] sm:$0xff]  ;;  %v1789_v36 = vsel %vm1777_vm4, %v1756_v16, %v4031_v53  ;;  %v3353_v12 = vld [vmem:[#allocation2 + $0x30] sm:$0xff] }
 0x2af   : > { %1278 = vrot.lane.b32.xlu0 %v4020_v48, %s2372_s10  ;;  %v1956_v6 = vsel %vm1942_vm10, %v1923_v47, %v4021_v4  ;;  %v1772_v11 = vsel %vm1744_vm3, %v1739_v30, %v4030_v14  ;;  %v4032_v23 = vld [vmem:[#allocation45_spill] sm:$0xff]  ;;  %v1822_v27 = vsel %vm1810_vm5, %v1789_v36, %v4035_v58  ;;  %v3386_v30 = vld [vmem:[#allocation2 + $0x31] sm:$0xff] }
 0x2b0   : > { %2303 = vmatpush3.xpose.msk.msra.mxu0 %vm1976_vm9, %v1956_v6  ;;  %v3287_v56 = vpop.permute.xlu1 %1504  ;;  %v1805_v32 = vsel %vm1777_vm4, %v1772_v11, %v4032_v23  ;;  %v4034_v4 = vld [vmem:[#allocation49_spill] sm:$0xff]  ;;  %v4040_v11 = vld [vmem:[#allocation70_spill] sm:$0xff]  ;;  %v4041_v36 = vld [vmem:[#allocation44_spill] sm:$0xff] }
 0x2b1   : > { %v1673_v59 = vpop.permute.xlu0 %1672  ;;  %v1838_v47 = vsel %vm1810_vm5, %v1805_v32, %v4033_v33  ;;  %v4038_v63 = vld [vmem:[#allocation57_spill] sm:$0xff]  ;;  %v3398_v32 = vld [vmem:[#allocation2 + $0x110] sm:$0xff] }
 0x2b2   : > { %v1971_v37 = vsel %vm1942_vm10, %v1938_v18, %v1673_v59  ;;  %1110 = vrot.lane.b32.xlu1 %v3295_v25, %s2371_s9  ;;  %v1871_v6 = vsel %vm1843_vm6, %v1838_v47, %v4034_v4  ;;  %v1855_v18 = vsel %vm1843_vm6, %v1822_v27, %v4036_v57  ;;  %v3382_v8 = vld [vmem:[#allocation2 + $0xfa] sm:$0xff]  ;;  %v464_v47 = vld [vmem:[#allocation2 + $0xa] sm:$0xff] }
 0x2b3   : > { %892 = vrot.lane.b32.xlu0 %v3290_v10, %s2369_s7  ;;  %2304 = vmatprep.subr.msk.mxu0 %vm1976_vm9, %v1971_v37  ;;  %v4037_v37 = vld [vmem:[#allocation55_spill] sm:$0xff]  ;;  %v646_v4 = vld [vmem:[#allocation2 + $0x139] sm:$0xff]  ;;  %v4042_v27 = vld [vmem:[#allocation34_spill] sm:$0xff] }
 0x2b4   : > { %2305 = vmatpush3.xpose.msk.msra.mxu0 %vm1976_vm9, %v1955_v44  ;;  %v3304_v35 = vpop.permute.xlu1 %1118  ;;  %v1888_v52 = vsel %vm1876_vm7, %v1855_v18, %v4037_v37  ;;  %v3410_v58 = vld [vmem:[#allocation2 + $0x111] sm:$0xff]  ;;  %v1738_v57 = vsel %vm321_vm0, %v4040_v11, %v4042_v27  ;;  %v594_v18 = vld [vmem:[#allocation2 + $0x48] sm:$0xff] }
 0x2b5   : > { %v3302_v9 = vpop.permute.xlu0 %900  ;;  %v1921_v28 = vsel %vm1909_vm8, %v1888_v52, %v4038_v63  ;;  %v4044_v37 = vld [vmem:[#allocation40_spill] sm:$0xff]  ;;  %v4045_v63 = vld [vmem:[#allocation54_spill] sm:$0xff] }
 0x2b6   : > { %1624 = vrot.lane.b32.xlu1 %v4025_v42, %s2367_s26  ;;  %v4048_v27 = vld [vmem:[#allocation62_spill] sm:$0xff] }
 0x2b7   : > { %1406 = vrot.lane.b32.xlu0 %v4024_v60, %s2365_s24 }
 0x2b8   : > { %v3310_v46 = vpop.permute.xlu1 %1632 }
 0x2b9   : > { %v1415_v20 = vpop.permute.xlu0 %1414 }
 0x2ba   : > { %1238 = vrot.lane.b32.xlu1 %v3018_v49, %s2372_s10  ;;  %v1904_v59 = vsel %vm1876_vm7, %v1871_v6, %v1415_v20  ;;  %v627_v20 = vld [vmem:[#allocation2 + $0x51] sm:$0xff] }
 0x2bb   : > { %1020 = vrot.lane.b32.xlu0 %v3312_v39, %s2370_s8 }
 0x2bc   : > { %v3320_v29 = vpop.permute.xlu1 %1246 }
 0x2bd   : > { %v3318_v2 = vpop.permute.xlu0 %1028 }
 0x2be   : > { %852 = vrot.lane.b32.xlu1 %v3326_v17, %s2369_s7 }
 0x2bf   : > { %1534 = vrot.lane.b32.xlu0 %v647_v40, %s2366_s25  ;;  %v4039_v40 = vld [vmem:[#allocation60_spill] sm:$0xff] }
 0x2c0   : > { %v3332_v62 = vpop.permute.xlu1 %860  ;;  %v1954_v51 = vsel %vm1942_vm10, %v1921_v28, %v4039_v40 }
 0x2c1   : > { %v1543_v31 = vpop.permute.xlu0 %1542 }
 0x2c2   : > { %1366 = vrot.lane.b32.xlu1 %v3036_v5, %s2365_s24  ;;  %v1937_v44 = vsel %vm1909_vm8, %v1904_v59, %v1543_v31  ;;  %v4043_v59 = vld [vmem:[#allocation33_spill] sm:$0xff] }
 0x2c3   : > { %1148 = vrot.lane.b32.xlu0 %v3334_v3, %s2371_s9  ;;  %v1722_v52 = vsel %vm321_vm0, %v4044_v37, %v4043_v59 }
 0x2c4   : > { %v3349_v7 = vpop.permute.xlu1 %1374  ;;  %v1755_v28 = vsel %vm1744_vm3, %v1722_v52, %v4045_v63  ;;  %v4050_v52 = vld [vmem:[#allocation67_spill] sm:$0xff]  ;;  %v4051_v63 = vld [vmem:[#allocation69_spill] sm:$0xff] }
 0x2c5   : > { %v1157_v24 = vpop.permute.xlu0 %1156 }
 0x2c6   : > { %980 = vrot.lane.b32.xlu1 %v3353_v12, %s2370_s8 }
 0x2c7   : > { %1662 = vrot.lane.b32.xlu0 %v679_v34, %s2367_s26 }
 0x2c8   : > { %v3368_v42 = vpop.permute.xlu1 %988 }
 0x2c9   : > { %v1671_v60 = vpop.permute.xlu0 %1670 }
 0x2ca   : > { %v1970_v55 = vsel %vm1942_vm10, %v1937_v44, %v1671_v60  ;;  %1494 = vrot.lane.b32.xlu1 %v627_v20, %s2366_s25  ;;  %v1771_v44 = vsel %vm1744_vm3, %v1738_v57, %v3302_v9 }
 0x2cb   : > { %1276 = vrot.lane.b32.xlu0 %v3054_v43, %s2372_s10  ;;  %2306 = vmatprep.subr.msk.mxu0 %vm1976_vm9, %v1970_v55  ;;  %v1804_v55 = vsel %vm1777_vm4, %v1771_v44, %v3318_v2 }
 0x2cc   : > { %2307 = vmatpush3.xpose.msk.msra.mxu0 %vm1976_vm9, %v1954_v51  ;;  %v3380_v31 = vpop.permute.xlu1 %1502  ;;  %v4046_v51 = vld [vmem:[#allocation56_spill] sm:$0xff] }
 0x2cd   : > { %v1285_v16 = vpop.permute.xlu0 %1284  ;;  %v1788_v20 = vsel %vm1777_vm4, %v1755_v28, %v4046_v51  ;;  %v3457_v51 = vld [vmem:[#allocation2 + $0xf2] sm:$0xff] }
 0x2ce   : > { %1108 = vrot.lane.b32.xlu1 %v3386_v30, %s2371_s9 }
 0x2cf   : > { %890 = vrot.lane.b32.xlu0 %v3382_v8, %s2369_s7 }
 0x2d0   : > { %v3394_v53 = vpop.permute.xlu1 %1116 }
 0x2d1   : > { %v3390_v14 = vpop.permute.xlu0 %898 }
 0x2d2   : > { %1622 = vrot.lane.b32.xlu1 %v4041_v36, %s2367_s26  ;;  %v4047_v36 = vld [vmem:[#allocation59_spill] sm:$0xff] }
 0x2d3   : > { %1404 = vrot.lane.b32.xlu0 %v4040_v11, %s2365_s24  ;;  %v1837_v11 = vsel %vm1810_vm5, %v1804_v55, %v1157_v24  ;;  %v4053_v55 = vld [vmem:[#allocation79_spill] sm:$0xff] }
 0x2d4   : > { %v3406_v34 = vpop.permute.xlu1 %1630  ;;  %v1870_v9 = vsel %vm1843_vm6, %v1837_v11, %v1285_v16 }
 0x2d5   : > { %v1413_v23 = vpop.permute.xlu0 %1412 }
 0x2d6   : > { %1236 = vrot.lane.b32.xlu1 %v3080_v38, %s2372_s10  ;;  %v1903_v2 = vsel %vm1876_vm7, %v1870_v9, %v1413_v23  ;;  %v4052_v23 = vld [vmem:[#allocation78_spill] sm:$0xff] }
 0x2d7   : > { %1018 = vrot.lane.b32.xlu0 %v3398_v32, %s2370_s8 }
 0x2d8   : > { %v3422_v60 = vpop.permute.xlu1 %1244 }
 0x2d9   : > { %v3404_v33 = vpop.permute.xlu0 %1026 }
 0x2da   : > { %850 = vrot.lane.b32.xlu1 %v464_v47, %s2369_s7  ;;  %v1821_v47 = vsel %vm1810_vm5, %v1788_v20, %v4047_v36  ;;  %v528_v20 = vld [vmem:[#allocation2 + $0x21] sm:$0xff] }
 0x2db   : > { %1532 = vrot.lane.b32.xlu0 %v646_v4, %s2366_s25  ;;  %v496_v4 = vld [vmem:[#allocation2 + $0x20] sm:$0xff]  ;;  %v1854_v57 = vsel %vm1843_vm6, %v1821_v47, %v4048_v27 }
 0x2dc   : > { %v3446_v44 = vpop.permute.xlu1 %858 }
 0x2dd   : > { %v1541_v6 = vpop.permute.xlu0 %1540 }
 0x2de   : > { %1364 = vrot.lane.b32.xlu1 %v594_v18, %s2365_s24  ;;  %v4049_v18 = vld [vmem:[#allocation64_spill] sm:$0xff]  ;;  %v1936_v24 = vsel %vm1909_vm8, %v1903_v2, %v1541_v6 }
 0x2df   : > { %1146 = vrot.lane.b32.xlu0 %v3410_v58, %s2371_s9  ;;  %v1887_v59 = vsel %vm1876_vm7, %v1854_v57, %v4049_v18  ;;  %v463_v57 = vld [vmem:[#allocation2 + $0x2] sm:$0xff] }
 0x2e0   : > { %v1920_v16 = vsel %vm1909_vm8, %v1887_v59, %v4050_v52  ;;  %v3461_v11 = vpop.permute.xlu1 %1372  ;;  %v3485_v18 = vld [vmem:[#allocation2 + $0x109] sm:$0xff]  ;;  %v4054_v59 = vld [vmem:[#allocation32_spill] sm:$0xff] }
 0x2e1   : > { %v1155_v40 = vpop.permute.xlu0 %1154  ;;  %v1953_v28 = vsel %vm1942_vm10, %v1920_v16, %v4051_v63  ;;  %v4056_v52 = vld [vmem:[#allocation46_spill] sm:$0xff] }
 0x2e2   : > { %978 = vrot.lane.b32.xlu1 %v496_v4, %s2370_s8  ;;  %v3472_v4 = vld [vmem:[#allocation2 + $0x108] sm:$0xff] }
 0x2e3   : > { %1660 = vrot.lane.b32.xlu0 %v2926_v45, %s2367_s26 }
 0x2e4   : > { %v3470_v9 = vpop.permute.xlu1 %986 }
 0x2e5   : > { %v1669_v37 = vpop.permute.xlu0 %1668 }
 0x2e6   : > { %v1969_v45 = vsel %vm1942_vm10, %v1936_v24, %v1669_v37  ;;  %1492 = vrot.lane.b32.xlu1 %v4053_v55, %s2366_s25  ;;  %v1737_v24 = vsel %vm321_vm0, %v3150_v50, %v4054_v59  ;;  %v4055_v37 = vld [vmem:[#allocation30_spill] sm:$0xff]  ;;  %v4058_v55 = vld [vmem:[#allocation65_spill] sm:$0xff] }
 0x2e7   : > { %1274 = vrot.lane.b32.xlu0 %v4052_v23, %s2372_s10  ;;  %2308 = vmatprep.subr.msk.mxu0 %vm1976_vm9, %v1969_v45  ;;  %v1721_v16 = vsel %vm321_vm0, %v4056_v52, %v4055_v37  ;;  %v4057_v45 = vld [vmem:[#allocation63_spill] sm:$0xff]  ;;  %v4059_v37 = vld [vmem:[#allocation68_spill] sm:$0xff] }
 0x2e8   : > { %2309 = vmatpush3.xpose.msk.msra.mxu0 %vm1976_vm9, %v1953_v28  ;;  %v3482_v2 = vpop.permute.xlu1 %1500  ;;  %v1754_v63 = vsel %vm1744_vm3, %v1721_v16, %v4057_v45 }
 0x2e9   : > { %v1283_v6 = vpop.permute.xlu0 %1282 }
 0x2ea   : > { %1106 = vrot.lane.b32.xlu1 %v528_v20, %s2371_s9  ;;  %v1787_v20 = vsel %vm1777_vm4, %v1754_v63, %v4058_v55 }
 0x2eb   : > { %888 = vrot.lane.b32.xlu0 %v3457_v51, %s2369_s7  ;;  %v1820_v52 = vsel %vm1810_vm5, %v1787_v20, %v4059_v37  ;;  %v3532_v20 = vld [vmem:[#allocation2 + $0xe2] sm:$0xff] }
 0x2ec   : > { %v3505_v59 = vpop.permute.xlu1 %1114 }
 0x2ed   : > { %v3464_v36 = vpop.permute.xlu0 %896 }
 0x2ee   : > { %1620 = vrot.lane.b32.xlu1 %v2954_v21, %s2367_s26 }
 0x2ef   : > { %1402 = vrot.lane.b32.xlu0 %v3150_v50, %s2365_s24 }
 0x2f1   : > { %v1411_v47 = vpop.permute.xlu0 %1410 }
 0x2f2   : > { %1234 = vrot.lane.b32.xlu1 %v3188_v0, %s2372_s10  ;;  %v593_v0 = vld [vmem:[#allocation2 + $0x38] sm:$0xff] }
 0x2f3   : > { %1016 = vrot.lane.b32.xlu0 %v3472_v4, %s2370_s8 }
 0x2f5   : > { %v3478_v27 = vpop.permute.xlu0 %1024 }
 0x2f6   : > { %848 = vrot.lane.b32.xlu1 %v463_v57, %s2369_s7 }
 0x2f7   : > { %1530 = vrot.lane.b32.xlu0 %v3218_v61, %s2366_s25  ;;  %v1770_v61 = vsel %vm1744_vm3, %v1737_v24, %v3390_v14  ;;  %v495_v24 = vld [vmem:[#allocation2 + $0x18] sm:$0xff] }
 0x2f8   : > { %v1803_v28 = vsel %vm1777_vm4, %v1770_v61, %v3404_v33  ;;  %v4061_v61 = vld [vmem:[#allocation74_spill] sm:$0xff] }
 0x2f9   : > { %v1539_v21 = vpop.permute.xlu0 %1538  ;;  %v1836_v57 = vsel %vm1810_vm5, %v1803_v28, %v1155_v40  ;;  %v4062_v28 = vld [vmem:[#allocation77_spill] sm:$0xff] }
 0x2fa   : > { %1362 = vrot.lane.b32.xlu1 %v593_v0, %s2365_s24  ;;  %v1869_v14 = vsel %vm1843_vm6, %v1836_v57, %v1283_v6  ;;  %v4060_v0 = vld [vmem:[#allocation71_spill] sm:$0xff]  ;;  %v527_v57 = vld [vmem:[#allocation2 + $0x19] sm:$0xff] }
 0x2fb   : > { %1144 = vrot.lane.b32.xlu0 %v3485_v18, %s2371_s9  ;;  %v1853_v33 = vsel %vm1843_vm6, %v1820_v52, %v4060_v0  ;;  %v1902_v16 = vsel %vm1876_vm7, %v1869_v14, %v1411_v47  ;;  %v3527_v47 = vpop.permute.xlu1 %1628  ;;  %v612_v52 = vld [vmem:[#allocation2 + $0x120] sm:$0xff]  ;;  %v3542_v14 = vld [vmem:[#allocation2 + $0xf8] sm:$0xff] }
 0x2fc   : > { %v1886_v40 = vsel %vm1876_vm7, %v1853_v33, %v4061_v61  ;;  %v1935_v45 = vsel %vm1909_vm8, %v1902_v16, %v1539_v21  ;;  %v640_v16 = vld [vmem:[#allocation2 + $0xf1] sm:$0xff] }
 0x2fd   : > { %v1153_v50 = vpop.permute.xlu0 %1152  ;;  %v1919_v6 = vsel %vm1909_vm8, %v1886_v40, %v4062_v28  ;;  %v3554_v40 = vld [vmem:[#allocation2 + $0xf9] sm:$0xff] }
 0x2fe   : > { %976 = vrot.lane.b32.xlu1 %v495_v24, %s2370_s8  ;;  %v608_v24 = vld [vmem:[#allocation2 + $0xf0] sm:$0xff]  ;;  %v4065_v28 = vld [vmem:[#allocation25_spill] sm:$0xff] }
 0x2ff   : > { %1658 = vrot.lane.b32.xlu0 %v4020_v48, %s2367_s26  ;;  %v1952_v48 = vsel %vm1942_vm10, %v1919_v6, %v3148_v13  ;;  %v3537_v37 = vpop.permute.xlu1 %1242  ;;  %v1720_v6 = vsel %vm321_vm0, %v2972_v1, %v4065_v28 }
 0x301   : > { %v1667_v63 = vpop.permute.xlu0 %1666 }
 0x302   : > { %v1968_v55 = vsel %vm1942_vm10, %v1935_v45, %v1667_v63  ;;  %1490 = vrot.lane.b32.xlu1 %v3295_v25, %s2366_s25  ;;  %v4064_v45 = vld [vmem:[#allocation28_spill] sm:$0xff] }
 0x303   : > { %1272 = vrot.lane.b32.xlu0 %v3290_v10, %s2372_s10  ;;  %2310 = vmatprep.subr.msk.mxu0 %vm1976_vm9, %v1968_v55  ;;  %v3546_v0 = vpop.permute.xlu1 %856  ;;  %v1736_v63 = vsel %vm321_vm0, %v3312_v39, %v4064_v45  ;;  %v4066_v55 = vld [vmem:[#allocation73_spill] sm:$0xff] }
 0x304   : > { %2311 = vmatpush3.xpose.msk.msra.mxu0 %vm1976_vm9, %v1952_v48  ;;  %4063 = vst [vmem:[#allocation12_spill] sm:$0xff] %v3546_v0  ;;  %v1753_v48 = vsel %vm1744_vm3, %v1720_v6, %v4066_v55 }
 0x305   : > { %v1281_v21 = vpop.permute.xlu0 %1280 }
 0x306   : > { %1104 = vrot.lane.b32.xlu1 %v527_v57, %s2371_s9 }
 0x307   : > { %886 = vrot.lane.b32.xlu0 %v3532_v20, %s2369_s7 }
 0x309   : > { %v895_v13 = vpop.permute.xlu0 %894 }
 0x30a   : > { %1618 = vrot.lane.b32.xlu1 %v3018_v49, %s2367_s26  ;;  %v3552_v49 = vpop.permute.xlu1 %1370 }
 0x30b   : > { %1400 = vrot.lane.b32.xlu0 %v612_v52, %s2365_s24  ;;  %v4067_v52 = vld [vmem:[#allocation76_spill] sm:$0xff] }
 0x30c   : > { %v1786_v45 = vsel %vm1777_vm4, %v1753_v48, %v4067_v52  ;;  %v4068_v52 = vld [vmem:[#allocation23_spill] sm:$0xff] }
 0x30d   : > { %v1409_v25 = vpop.permute.xlu0 %1408  ;;  %v1819_v1 = vsel %vm1810_vm5, %v1786_v45, %v3121_v19  ;;  %v1735_v45 = vsel %vm321_vm0, %v3398_v32, %v4068_v52  ;;  %v544_v52 = vld [vmem:[#allocation2 + $0xe1] sm:$0xff] }
 0x30e   : > { %1392 = vrot.lane.b32.xlu1 %v608_v24, %s2365_s24  ;;  %v3582_v28 = vpop.permute.xlu1 %984 }
 0x30f   : > { %1014 = vrot.lane.b32.xlu0 %v3542_v14, %s2370_s8 }
 0x311   : > { %v1023_v33 = vpop.permute.xlu0 %1022 }
 0x312   : > { %1520 = vrot.lane.b32.xlu1 %v640_v16, %s2366_s25 }
 0x313   : > { %1528 = vrot.lane.b32.xlu0 %v3334_v3, %s2366_s25  ;;  %v1769_v3 = vsel %vm1744_vm3, %v1736_v63, %v3464_v36  ;;  %v1852_v63 = vsel %vm1843_vm6, %v1819_v1, %v3175_v22  ;;  %v4069_v1 = vld [vmem:[#allocation21_spill] sm:$0xff] }
 0x314   : > { %v1802_v57 = vsel %vm1777_vm4, %v1769_v3, %v3478_v27  ;;  %v1885_v6 = vsel %vm1876_vm7, %v1852_v63, %v3234_v26  ;;  %v3597_v26 = vpop.permute.xlu1 %1498  ;;  %v1768_v63 = vsel %vm1744_vm3, %v1735_v45, %v895_v13  ;;  %v4070_v45 = vld [vmem:[#allocation20_spill] sm:$0xff] }
 0x315   : > { %v1537_v61 = vpop.permute.xlu0 %1536  ;;  %v1835_v0 = vsel %vm1810_vm5, %v1802_v57, %v1153_v50  ;;  %v1918_v19 = vsel %vm1909_vm8, %v1885_v6, %v3287_v56 }
 0x316   : > { %1648 = vrot.lane.b32.xlu1 %v3457_v51, %s2367_s26  ;;  %v1868_v36 = vsel %vm1843_vm6, %v1835_v0, %v1281_v21  ;;  %v611_v0 = vld [vmem:[#allocation2 + $0x110] sm:$0xff] }
 0x317   : > { %1142 = vrot.lane.b32.xlu0 %v3554_v40, %s2371_s9  ;;  %v1901_v27 = vsel %vm1876_vm7, %v1868_v36, %v1409_v25  ;;  %v3599_v25 = vld [vmem:[#allocation2 + $0xda] sm:$0xff]  ;;  %v1719_v36 = vsel %vm321_vm0, %v3036_v5, %v4069_v1 }
 0x318   : > { %v1934_v50 = vsel %vm1909_vm8, %v1901_v27, %v1537_v61  ;;  %v1752_v27 = vsel %vm1744_vm3, %v1719_v36, %v3210_v41  ;;  %v4072_v36 = vld [vmem:[#allocation75_spill] sm:$0xff] }
 0x319   : > { %v1151_v39 = vpop.permute.xlu0 %1150 }
 0x31b   : > { %1656 = vrot.lane.b32.xlu0 %v3054_v43, %s2367_s26  ;;  %v1951_v43 = vsel %vm1942_vm10, %v1918_v19, %v3310_v46  ;;  %v3604_v46 = vpop.permute.xlu1 %1112 }
 0x31d   : > { %v1665_v3 = vpop.permute.xlu0 %1664 }
 0x31e   : > { %v1967_v21 = vsel %vm1942_vm10, %v1934_v50, %v1665_v3  ;;  %v1785_v50 = vsel %vm1777_vm4, %v1752_v27, %v3266_v54 }
 0x31f   : > { %1270 = vrot.lane.b32.xlu0 %v3382_v8, %s2372_s10  ;;  %2312 = vmatprep.subr.msk.mxu0 %vm1976_vm9, %v1967_v21  ;;  %v3607_v48 = vpop.permute.xlu1 %1626 }
 0x320   : > { %2313 = vmatpush3.xpose.msk.msra.mxu0 %vm1976_vm9, %v1951_v43 }
 0x321   : > { %v1279_v22 = vpop.permute.xlu0 %1278 }
 0x323   : > { %884 = vrot.lane.b32.xlu0 %v3599_v25, %s2369_s7 }
 0x325   : > { %v893_v56 = vpop.permute.xlu0 %892 }
 0x327   : > { %1398 = vrot.lane.b32.xlu0 %v611_v0, %s2365_s24 }
 0x329   : > { %v1407_v61 = vpop.permute.xlu0 %1406 }
 0x32b   : > { %1012 = vrot.lane.b32.xlu0 %v608_v24, %s2370_s8  ;;  %v3619_v24 = vpop.permute.xlu1 %1240 }
 0x32d   : > { %v1021_v55 = vpop.permute.xlu0 %1020 }
 0x32f   : > { %1526 = vrot.lane.b32.xlu0 %v3410_v58, %s2366_s25  ;;  %v1801_v58 = vsel %vm1777_vm4, %v1768_v63, %v1023_v33 }
 0x330   : > { %v1834_v32 = vsel %vm1810_vm5, %v1801_v58, %v1151_v39 }
 0x331   : > { %v1535_v57 = vpop.permute.xlu0 %1534  ;;  %v1867_v5 = vsel %vm1843_vm6, %v1834_v32, %v1279_v22 }
 0x332   : > { %v1900_v41 = vsel %vm1876_vm7, %v1867_v5, %v1407_v61 }
 0x333   : > { %1140 = vrot.lane.b32.xlu0 %v640_v16, %s2371_s9  ;;  %v1818_v16 = vsel %vm1810_vm5, %v1785_v50, %v3304_v35  ;;  %v1933_v54 = vsel %vm1909_vm8, %v1900_v41, %v1535_v57  ;;  %v3640_v35 = vpop.permute.xlu1 %854  ;;  %v421_v57 = vld [vmem:[#allocation2 + $0x108] sm:$0xff] }
 0x334   : > { %v1851_v13 = vsel %vm1843_vm6, %v1818_v16, %v3320_v29  ;;  %v1734_v1 = vsel %vm321_vm0, %v421_v57, %v4070_v45 }
 0x335   : > { %v1149_v6 = vpop.permute.xlu0 %1148  ;;  %v1884_v33 = vsel %vm1876_vm7, %v1851_v13, %v3349_v7  ;;  %v480_v7 = vld [vmem:[#allocation2 + $0xca] sm:$0xff]  ;;  %v1767_v27 = vsel %vm1744_vm3, %v1734_v1, %v893_v56 }
 0x336   : > { %v1917_v39 = vsel %vm1909_vm8, %v1884_v33, %v3380_v31 }
 0x337   : > { %1654 = vrot.lane.b32.xlu0 %v4052_v23, %s2367_s26  ;;  %v1950_v23 = vsel %vm1942_vm10, %v1917_v39, %v3406_v34  ;;  %v3650_v21 = vpop.permute.xlu1 %1368  ;;  %v512_v34 = vld [vmem:[#allocation2 + $0xe0] sm:$0xff]  ;;  %v511_v39 = vld [vmem:[#allocation2 + $0xd8] sm:$0xff] }
 0x339   : > { %v1663_v3 = vpop.permute.xlu0 %1662 }
 0x33a   : > { %v1966_v19 = vsel %vm1942_vm10, %v1933_v54, %v1663_v3 }
 0x33b   : > { %1268 = vrot.lane.b32.xlu0 %v3457_v51, %s2372_s10  ;;  %2314 = vmatprep.subr.msk.mxu0 %vm1976_vm9, %v1966_v19  ;;  %v3654_v22 = vpop.permute.xlu1 %982 }
 0x33c   : > { %2315 = vmatpush3.xpose.msk.msra.mxu0 %vm1976_vm9, %v1950_v23 }
 0x33d   : > { %v1277_v29 = vpop.permute.xlu0 %1276 }
 0x33f   : > { %882 = vrot.lane.b32.xlu0 %v480_v7, %s2369_s7  ;;  %v3659_v0 = vpop.permute.xlu1 %1496 }
 0x341   : > { %v891_v31 = vpop.permute.xlu0 %890 }
 0x343   : > { %1396 = vrot.lane.b32.xlu0 %v3472_v4, %s2365_s24  ;;  %v4071_v4 = vld [vmem:[#allocation18_spill] sm:$0xff]  ;;  %v3673_v16 = vpop.permute.xlu1 %1110 }
 0x344   : > { %v1718_v63 = vsel %vm321_vm0, %v4072_v36, %v4071_v4 }
 0x345   : > { %v1405_v43 = vpop.permute.xlu0 %1404  ;;  %v1751_v58 = vsel %vm1744_vm3, %v1718_v63, %v3332_v62 }
 0x346   : > { %v1784_v32 = vsel %vm1777_vm4, %v1751_v58, %v3368_v42 }
 0x347   : > { %1010 = vrot.lane.b32.xlu0 %v512_v34, %s2370_s8  ;;  %v1817_v13 = vsel %vm1810_vm5, %v1784_v32, %v3394_v53  ;;  %v4073_v34 = vld [vmem:[#allocation17_spill] sm:$0xff] }
 0x348   : > { %v1850_v62 = vsel %vm1843_vm6, %v1817_v13, %v3422_v60 }
 0x349   : > { %v1019_v51 = vpop.permute.xlu0 %1018  ;;  %v1883_v42 = vsel %vm1876_vm7, %v1850_v62, %v3461_v11  ;;  %v479_v11 = vld [vmem:[#allocation2 + $0xc2] sm:$0xff] }
 0x34a   : > { %v4075_v62 = vld [vmem:[#allocation14_spill] sm:$0xff] }
 0x34b   : > { %1524 = vrot.lane.b32.xlu0 %v3485_v18, %s2366_s25  ;;  %v1800_v18 = vsel %vm1777_vm4, %v1767_v27, %v1021_v55 }
 0x34c   : > { %v1833_v5 = vsel %vm1810_vm5, %v1800_v18, %v1149_v6  ;;  %v1916_v6 = vsel %vm1909_vm8, %v1883_v42, %v3482_v2  ;;  %v4076_v42 = vld [vmem:[#allocation13_spill] sm:$0xff] }
 0x34d   : > { %v1533_v61 = vpop.permute.xlu0 %1532  ;;  %v1866_v41 = vsel %vm1843_vm6, %v1833_v5, %v1277_v29  ;;  %v1949_v54 = vsel %vm1942_vm10, %v1916_v6, %v3527_v47  ;;  %v420_v29 = vld [vmem:[#allocation2 + $0xf8] sm:$0xff] }
 0x34e   : > { %v1899_v56 = vsel %vm1876_vm7, %v1866_v41, %v1405_v43  ;;  %v543_v43 = vld [vmem:[#allocation2 + $0xd9] sm:$0xff]  ;;  %v419_v41 = vld [vmem:[#allocation2 + $0xf0] sm:$0xff] }
 0x34f   : > { %1138 = vrot.lane.b32.xlu0 %v544_v52, %s2371_s9  ;;  %v1932_v55 = vsel %vm1909_vm8, %v1899_v56, %v1533_v61  ;;  %v1733_v61 = vsel %vm321_vm0, %v420_v29, %v4073_v34  ;;  %v1732_v56 = vsel %vm321_vm0, %v419_v41, %v4075_v62 }
 0x350   : > { %v1766_v52 = vsel %vm1744_vm3, %v1733_v61, %v891_v31 }
 0x351   : > { %v1147_v50 = vpop.permute.xlu0 %1146 }
 0x353   : > { %1652 = vrot.lane.b32.xlu0 %v3290_v10, %s2367_s26  ;;  %v3695_v10 = vpop.permute.xlu1 %1624 }
 0x355   : > { %v1661_v33 = vpop.permute.xlu0 %1660 }
 0x356   : > { %v1965_v53 = vsel %vm1942_vm10, %v1932_v55, %v1661_v33  ;;  %v1716_v55 = vsel %vm321_vm0, %v3353_v12, %v4076_v42 }
 0x357   : > { %1266 = vrot.lane.b32.xlu0 %v3532_v20, %s2372_s10  ;;  %2316 = vmatprep.subr.msk.mxu0 %vm1976_vm9, %v1965_v53  ;;  %v3699_v2 = vpop.permute.xlu1 %1238  ;;  %v4077_v53 = vld [vmem:[#allocation12_spill] sm:$0xff] }
 0x358   : > { %2317 = vmatpush3.xpose.msk.msra.mxu0 %vm1976_vm9, %v1949_v54 }
 0x359   : > { %v1275_v60 = vpop.permute.xlu0 %1274 }
 0x35b   : > { %880 = vrot.lane.b32.xlu0 %v479_v11, %s2369_s7  ;;  %v3704_v20 = vpop.permute.xlu1 %852 }
 0x35d   : > { %v889_v3 = vpop.permute.xlu0 %888 }
 0x35e   : > { %v1765_v6 = vsel %vm1744_vm3, %v1732_v56, %v889_v3 }
 0x35f   : > { %1394 = vrot.lane.b32.xlu0 %v3542_v14, %s2365_s24  ;;  %v3708_v7 = vpop.permute.xlu1 %1366  ;;  %v4074_v14 = vld [vmem:[#allocation15_spill] sm:$0xff] }
 0x360   : > { %v1717_v57 = vsel %vm321_vm0, %v3245_v15, %v4074_v14 }
 0x361   : > { %v1403_v47 = vpop.permute.xlu0 %1402  ;;  %v1750_v45 = vsel %vm1744_vm3, %v1717_v57, %v3446_v44 }
 0x362   : > { %v1783_v4 = vsel %vm1777_vm4, %v1750_v45, %v3470_v9 }
 0x363   : > { %1008 = vrot.lane.b32.xlu0 %v511_v39, %s2370_s8  ;;  %v1816_v63 = vsel %vm1810_vm5, %v1783_v4, %v3505_v59  ;;  %v3730_v44 = vpop.permute.xlu1 %980  ;;  %v4078_v4 = vld [vmem:[#allocation10_spill] sm:$0xff] }
 0x364   : > { %v1849_v15 = vsel %vm1843_vm6, %v1816_v63, %v3537_v37  ;;  %v4079_v63 = vld [vmem:[#allocation9_spill] sm:$0xff] }
 0x365   : > { %v1017_v19 = vpop.permute.xlu0 %1016  ;;  %v1882_v9 = vsel %vm1876_vm7, %v1849_v15, %v3552_v49 }
 0x366   : > { %v1915_v59 = vsel %vm1909_vm8, %v1882_v9, %v3597_v26  ;;  %v3752_v26 = vld [vmem:[%s3912_s3] sm:$0xff]  ;;  %v1798_v54 = vsel %vm1777_vm4, %v1765_v6, %v1017_v19 }
 0x367   : > { %1522 = vrot.lane.b32.xlu0 %v3554_v40, %s2366_s25  ;;  %v1799_v40 = vsel %vm1777_vm4, %v1766_v52, %v1019_v51  ;;  %v3745_v49 = vpop.permute.xlu1 %1494  ;;  %2330 = vmatprep.mubr.msk.f32.mxu0 %vm1976_vm9, %v3752_v26 }
 0x368   : > { %v1832_v36 = vsel %vm1810_vm5, %v1799_v40, %v1147_v50  ;;  %v402_v40 = vld [vmem:[#allocation2 + $0x20] sm:$0xff] }
 0x369   : > { %v1531_v23 = vpop.permute.xlu0 %1530  ;;  %v1865_v27 = vsel %vm1843_vm6, %v1832_v36, %v1275_v60 }
 0x36a   : > { %v1898_v31 = vsel %vm1876_vm7, %v1865_v27, %v1403_v47 }
 0x36b   : > { %1136 = vrot.lane.b32.xlu0 %v543_v43, %s2371_s9  ;;  %v1931_v51 = vsel %vm1909_vm8, %v1898_v31, %v1531_v23  ;;  %v3757_v50 = vpop.permute.xlu1 %1108 }
 0x36d   : > { %v1145_v1 = vpop.permute.xlu0 %1144 }
 0x36e   : > { %v1831_v11 = vsel %vm1810_vm5, %v1798_v54, %v1145_v1  ;;  %v2351_v1 = vld [vmem:[#allocation2 + $0xe0] sm:$0xff] }
 0x36f   : > { %1650 = vrot.lane.b32.xlu0 %v3382_v8, %s2367_s26  ;;  %v1948_v8 = vsel %vm1942_vm10, %v1915_v59, %v3607_v48  ;;  %v1731_v36 = vsel %vm321_vm0, %v2351_v1, %v4078_v4  ;;  %v400_v4 = vld [vmem:[#allocation2 + $0x8] sm:$0xff] }
 0x371   : > { %v1659_v58 = vpop.permute.xlu0 %1658 }
 0x372   : > { %v1964_v18 = vsel %vm1942_vm10, %v1931_v51, %v1659_v58 }
 0x373   : > { %1264 = vrot.lane.b32.xlu0 %v3599_v25, %s2372_s10  ;;  %2318 = vmatprep.subr.msk.mxu0 %vm1976_vm9, %v1964_v18  ;;  %v592_v25 = vld [vmem:[#allocation2 + $0x30] sm:$0xff] }
 0x374   : > { %2319 = vmatpush3.xpose.msk.msra.mxu0 %vm1976_vm9, %v1948_v8 }
 0x375   : > { %v1273_v37 = vpop.permute.xlu0 %1272 }
 0x376   : > { %v1864_v12 = vsel %vm1843_vm6, %v1831_v11, %v1273_v37 }
 0x377   : > { %1232 = vrot.lane.b32.xlu0 %v3326_v17, %s2372_s10  ;;  %v1623_v17 = vpop.permute.xlu1 %1622 }
 0x379   : > { %v887_v48 = vpop.permute.xlu0 %886 }
 0x37a   : > { %v1764_v27 = vsel %vm1744_vm3, %v1731_v36, %v887_v48 }
 0x37b   : > { %1360 = vrot.lane.b32.xlu0 %v592_v25, %s2365_s24  ;;  %v3768_v33 = vpop.permute.xlu1 %1236 }
 0x37d   : > { %v1401_v32 = vpop.permute.xlu0 %1400 }
 0x37e   : > { %v1897_v3 = vsel %vm1876_vm7, %v1864_v12, %v1401_v32 }
 0x37f   : > { %1488 = vrot.lane.b32.xlu0 %v3386_v30, %s2366_s25  ;;  %v1749_v30 = vsel %vm1744_vm3, %v1716_v55, %v4077_v53  ;;  %v3788_v43 = vpop.permute.xlu1 %850  ;;  %v401_v53 = vld [vmem:[#allocation2 + $0x18] sm:$0xff] }
 0x381   : > { %v1015_v5 = vpop.permute.xlu0 %1014 }
 0x382   : > { %v1797_v31 = vsel %vm1777_vm4, %v1764_v27, %v1015_v5  ;;  %v4083_v27 = vld [vmem:[#allocation4_spill] sm:$0xff] }
 0x383   : > { %1616 = vrot.lane.b32.xlu0 %v3080_v38, %s2367_s26  ;;  %v1782_v38 = vsel %vm1777_vm4, %v1749_v30, %v3582_v28  ;;  %v1365_v61 = vpop.permute.xlu1 %1364  ;;  %v4080_v30 = vld [vmem:[#allocation8_spill] sm:$0xff] }
 0x384   : > { %v1815_v47 = vsel %vm1810_vm5, %v1782_v38, %v3604_v46 }
 0x385   : > { %v1529_v13 = vpop.permute.xlu0 %1528  ;;  %v1848_v39 = vsel %vm1843_vm6, %v1815_v47, %v3619_v24 }
 0x386   : > { %v1881_v23 = vsel %vm1876_vm7, %v1848_v39, %v3650_v21  ;;  %v1930_v19 = vsel %vm1909_vm8, %v1897_v3, %v1529_v13 }
 0x387   : > { %v1914_v28 = vsel %vm1909_vm8, %v1881_v23, %v3659_v0  ;;  %v3795_v57 = vpop.permute.xlu1 %978 }
 0x388   : > { %v1947_v34 = vsel %vm1942_vm10, %v1914_v28, %v3695_v10  ;;  %v1715_v10 = vsel %vm321_vm0, %v402_v40, %v4079_v63  ;;  %v2353_v63 = vld [vmem:[#allocation2 + $0xc8] sm:$0xff] }
 0x389   : > { %v1143_v60 = vpop.permute.xlu0 %1142  ;;  %v1748_v15 = vsel %vm1744_vm3, %v1715_v10, %v3640_v35  ;;  %v4082_v10 = vld [vmem:[#allocation72_spill] sm:$0xff] }
 0x38a   : > { %v1781_v51 = vsel %vm1777_vm4, %v1748_v15, %v3654_v22  ;;  %v1830_v59 = vsel %vm1810_vm5, %v1797_v31, %v1143_v60  ;;  %v1713_v15 = vsel %vm321_vm0, %v400_v4, %v4083_v27 }
 0x38b   : > { %v1493_v45 = vpop.permute.xlu1 %1492  ;;  %v1814_v18 = vsel %vm1810_vm5, %v1781_v51, %v3673_v16  ;;  %v1746_v51 = vsel %vm1744_vm3, %v1713_v15, %v3788_v43 }
 0x38c   : > { %v1847_v37 = vsel %vm1843_vm6, %v1814_v18, %v3699_v2 }
 0x38d   : > { %v1657_v29 = vpop.permute.xlu0 %1656  ;;  %v1880_v48 = vsel %vm1876_vm7, %v1847_v37, %v3708_v7 }
 0x38e   : > { %v1963_v46 = vsel %vm1942_vm10, %v1930_v19, %v1657_v29  ;;  %v1913_v32 = vsel %vm1909_vm8, %v1880_v48, %v3745_v49  ;;  %v2352_v49 = vld [vmem:[#allocation2 + $0xd8] sm:$0xff] }
 0x38f   : > { %2320 = vmatprep.subr.msk.mxu0 %vm1976_vm9, %v1963_v46  ;;  %v3807_v58 = vpop.permute.xlu1 %1106  ;;  %v1946_v16 = vsel %vm1942_vm10, %v1913_v32, %v1623_v17  ;;  %v1730_v54 = vsel %vm321_vm0, %v2352_v49, %v4080_v30  ;;  %v4081_v17 = vld [vmem:[#allocation7_spill] sm:$0xff] }
 0x390   : > { %2321 = vmatpush3.xpose.msk.msra.mxu0 %vm1976_vm9, %v1947_v34  ;;  %v1714_v60 = vsel %vm321_vm0, %v401_v53, %v4081_v17 }
 0x391   : > { %v1271_v24 = vpop.permute.xlu0 %1270  ;;  %v1747_v11 = vsel %vm1744_vm3, %v1714_v60, %v3704_v20 }
 0x392   : > { %v1863_v8 = vsel %vm1843_vm6, %v1830_v59, %v1271_v24  ;;  %v1780_v39 = vsel %vm1777_vm4, %v1747_v11, %v3730_v44 }
 0x393   : > { %v1621_v13 = vpop.permute.xlu1 %1620  ;;  %v1813_v23 = vsel %vm1810_vm5, %v1780_v39, %v3757_v50 }
 0x394   : > { %v1846_v29 = vsel %vm1843_vm6, %v1813_v23, %v3768_v33 }
 0x395   : > { %v885_v21 = vpop.permute.xlu0 %884  ;;  %v1879_v20 = vsel %vm1876_vm7, %v1846_v29, %v1365_v61 }
 0x396   : > { %v1763_v38 = vsel %vm1744_vm3, %v1730_v54, %v885_v21  ;;  %v1912_v44 = vsel %vm1909_vm8, %v1879_v20, %v1493_v45  ;;  %v1729_v45 = vsel %vm321_vm0, %v2353_v63, %v4082_v10 }
 0x397   : > { %v1235_v62 = vpop.permute.xlu1 %1234 }
 0x399   : > { %v1399_v14 = vpop.permute.xlu0 %1398 }
 0x39a   : > { %v1896_v35 = vsel %vm1876_vm7, %v1863_v8, %v1399_v14  ;;  %v1945_v14 = vsel %vm1942_vm10, %v1912_v44, %v1621_v13  ;;  %v1779_v8 = vsel %vm1777_vm4, %v1746_v51, %v3795_v57  ;;  %v4084_v13 = vld [vmem:[#allocation66_spill] sm:$0xff] }
 0x39b   : > { %v3825_v7 = vpop.permute.xlu1 %848 }
 0x39d   : > { %v1013_v52 = vpop.permute.xlu0 %1012 }
 0x39e   : > { %v1796_v47 = vsel %vm1777_vm4, %v1763_v38, %v1013_v52  ;;  %v399_v38 = vld [vmem:[#allocation2] sm:$0xff] }
 0x39f   : > { %v1363_v6 = vpop.permute.xlu1 %1362 }
 0x3a1   : > { %v1527_v0 = vpop.permute.xlu0 %1526 }
 0x3a2   : > { %v1929_v25 = vsel %vm1909_vm8, %v1896_v35, %v1527_v0  ;;  %v1812_v35 = vsel %vm1810_vm5, %v1779_v8, %v3807_v58 }
 0x3a3   : > { %v977_v28 = vpop.permute.xlu1 %976 }
 0x3a5   : > { %v1141_v9 = vpop.permute.xlu0 %1140 }
 0x3a6   : > { %v1829_v3 = vsel %vm1810_vm5, %v1796_v47, %v1141_v9  ;;  %v4085_v47 = vld [vmem:[#allocation3_spill] sm:$0xff] }
 0x3a7   : > { %v1491_v33 = vpop.permute.xlu1 %1490 }
 0x3a9   : > { %v1655_v22 = vpop.permute.xlu0 %1654 }
 0x3aa   : > { %v1962_v5 = vsel %vm1942_vm10, %v1929_v25, %v1655_v22  ;;  %v1845_v25 = vsel %vm1843_vm6, %v1812_v35, %v1235_v62 }
 0x3ab   : > { %2322 = vmatprep.subr.msk.mxu0 %vm1976_vm9, %v1962_v5  ;;  %v1105_v0 = vpop.permute.xlu1 %1104  ;;  %v1878_v32 = vsel %vm1876_vm7, %v1845_v25, %v1363_v6 }
 0x3ac   : > { %2323 = vmatpush3.xpose.msk.msra.mxu0 %vm1976_vm9, %v1946_v16  ;;  %v2354_v16 = vld [vmem:[#allocation2 + $0xc0] sm:$0xff] }
 0x3ad   : > { %v1269_v2 = vpop.permute.xlu0 %1268  ;;  %v1728_v57 = vsel %vm321_vm0, %v2354_v16, %v4084_v13 }
 0x3ae   : > { %v1862_v19 = vsel %vm1843_vm6, %v1829_v3, %v1269_v2  ;;  %v1911_v2 = vsel %vm1909_vm8, %v1878_v32, %v1491_v33 }
 0x3af   : > { %v1619_v61 = vpop.permute.xlu1 %1618 }
 0x3b1   : > { %v883_v41 = vpop.permute.xlu0 %882 }
 0x3b2   : > { %v1762_v9 = vsel %vm1744_vm3, %v1729_v45, %v883_v41 }
 0x3b3   : > { %v1393_v31 = vpop.permute.xlu1 %1392 }
 0x3b5   : > { %v1397_v56 = vpop.permute.xlu0 %1396 }
 0x3b6   : > { %v1895_v46 = vsel %vm1876_vm7, %v1862_v19, %v1397_v56  ;;  %v1944_v56 = vsel %vm1942_vm10, %v1911_v2, %v1619_v61 }
 0x3b7   : > { %v1521_v41 = vpop.permute.xlu1 %1520 }
 0x3b9   : > { %v1011_v42 = vpop.permute.xlu0 %1010 }
 0x3ba   : > { %v1795_v59 = vsel %vm1777_vm4, %v1762_v9, %v1011_v42 }
 0x3bb   : > { %v1649_v30 = vpop.permute.xlu1 %1648 }
 0x3bd   : > { %v1525_v55 = vpop.permute.xlu0 %1524 }
 0x3be   : > { %v1928_v34 = vsel %vm1909_vm8, %v1895_v46, %v1525_v55 }
 0x3c1   : > { %v1139_v12 = vpop.permute.xlu0 %1138 }
 0x3c2   : > { %v1828_v37 = vsel %vm1810_vm5, %v1795_v59, %v1139_v12  ;;  %v1712_v12 = vsel %vm321_vm0, %v399_v38, %v4085_v47 }
 0x3c3   : > { %v1745_v39 = vsel %vm1744_vm3, %v1712_v12, %v3825_v7 }
 0x3c4   : > { %v1778_v3 = vsel %vm1777_vm4, %v1745_v39, %v977_v28 }
 0x3c5   : > { %v1653_v24 = vpop.permute.xlu0 %1652  ;;  %v1811_v19 = vsel %vm1810_vm5, %v1778_v3, %v1105_v0 }
 0x3c6   : > { %v1961_v21 = vsel %vm1942_vm10, %v1928_v34, %v1653_v24 }
 0x3c7   : > { %2324 = vmatprep.subr.msk.mxu0 %vm1976_vm9, %v1961_v21 }
 0x3c8   : > { %2325 = vmatpush3.xpose.msk.msra.mxu0 %vm1976_vm9, %v1945_v14 }
 0x3c9   : > { %v1267_v50 = vpop.permute.xlu0 %1266 }
 0x3ca   : > { %v1861_v48 = vsel %vm1843_vm6, %v1828_v37, %v1267_v50 }
 0x3cd   : > { %v881_v52 = vpop.permute.xlu0 %880 }
 0x3ce   : > { %v1761_v62 = vsel %vm1744_vm3, %v1728_v57, %v881_v52 }
 0x3d1   : > { %v1395_v40 = vpop.permute.xlu0 %1394 }
 0x3d2   : > { %v1894_v22 = vsel %vm1876_vm7, %v1861_v48, %v1395_v40 }
 0x3d5   : > { %v1009_v1 = vpop.permute.xlu0 %1008 }
 0x3d6   : > { %v1794_v42 = vsel %vm1777_vm4, %v1761_v62, %v1009_v1 }
 0x3d9   : > { %v1523_v36 = vpop.permute.xlu0 %1522 }
 0x3da   : > { %v1927_v43 = vsel %vm1909_vm8, %v1894_v22, %v1523_v36 }
 0x3dd   : > { %v1137_v18 = vpop.permute.xlu0 %1136 }
 0x3de   : > { %v1827_v55 = vsel %vm1810_vm5, %v1794_v42, %v1137_v18 }
 0x3e1   : > { %v1651_v5 = vpop.permute.xlu0 %1650 }
 0x3e2   : > { %v1960_v58 = vsel %vm1942_vm10, %v1927_v43, %v1651_v5 }
 0x3e3   : > { %2326 = vmatprep.subr.msk.mxu0 %vm1976_vm9, %v1960_v58 }
 0x3e4   : > { %2327 = vmatpush3.xpose.msk.msra.mxu0 %vm1976_vm9, %v1944_v56 }
 0x3e5   : > { %v1265_v6 = vpop.permute.xlu0 %1264 }
 0x3e6   : > { %v1860_v53 = vsel %vm1843_vm6, %v1827_v55, %v1265_v6 }
 0x3e7   : > { %v1893_v49 = vsel %vm1876_vm7, %v1860_v53, %v1393_v31 }
 0x3e8   : > { %v1926_v54 = vsel %vm1909_vm8, %v1893_v49, %v1521_v41 }
 0x3e9   : > { %v1233_v17 = vpop.permute.xlu0 %1232  ;;  %v1959_v60 = vsel %vm1942_vm10, %v1926_v54, %v1649_v30 }
 0x3ea   : > { %2328 = vmatprep.subr.msk.mxu0 %vm1976_vm9, %v1959_v60  ;;  %v1844_v29 = vsel %vm1843_vm6, %v1811_v19, %v1233_v17 }
 0x3ed   : > { %v1361_v11 = vpop.permute.xlu0 %1360 }
 0x3ee   : > { %v1877_v46 = vsel %vm1876_vm7, %v1844_v29, %v1361_v11 }
 0x3f1   : > { %v1489_v23 = vpop.permute.xlu0 %1488 }
 0x3f2   : > { %v1910_v20 = vsel %vm1909_vm8, %v1877_v46, %v1489_v23 }
 0x3f5   : > { %v1617_v34 = vpop.permute.xlu0 %1616 }
 0x3f6   : > { %v1943_v24 = vsel %vm1942_vm10, %v1910_v20, %v1617_v34 }
 0x3f7   : > { %2329 = vmatpush3.xpose.msk.msra.mxu0 %vm1976_vm9, %v1943_v24 }
 0x3fa   : > { %2331 = vmatmul.mubr.msk.f32.vlgmr.msra.gmra.mxu0 %vm1976_vm9, %v3752_v26 }
 0x4ba   : > { %v2142_v7 = vpop.f32.mrf.mxu0 }
 0x4bb   : > { %2147 = vst [vmem:[%s231_s15] sm:$0xff] %v2142_v7 }
 0x4bc   : > { %v2144_v28 = vpop.f32.mrf.mxu0 }
 0x4bd   : > { %2148 = vst [vmem:[%s231_s15 + $0x8] sm:$0xff] %v2144_v28  ;;  %v2149_v44 = vadd.f32 %v2144_v28, %v2142_v7 }
 0x4bf   : > { %2150 = vadd.xlane.f32.xlu1 %v2149_v44 }
 0x548   : > { %v2151_v21 = vpop.xlane.xlu1 %2150 }
 0x549   : > { %v2153_v14 = vmul.f32 0.00390625, %v2151_v21 }
 0x54b   : > { %v2154_v50 = vsub.f32 %v2142_v7, %v2153_v14  ;;  %v2155_v33 = vsub.f32 %v2144_v28, %v2153_v14 }
 0x54d   : > { %v2156_v52 = vmul.f32 %v2154_v50, %v2154_v50  ;;  %v2157_v0 = vmul.f32 %v2155_v33, %v2155_v33 }
 0x54f   : > { %v2158_v40 = vadd.f32 %v2157_v0, %v2156_v52 }
 0x551   : > { %2159 = vadd.xlane.f32.xlu0 %v2158_v40 }
 0x5da   : > { %v2160_v26 = vpop.xlane.xlu0 %2159 }
 0x5db   : > { %v2162_v1 = vsel %vm2161_vm11, %v2153_v14, %v2160_v26 }
 0x5dc   : > { %2164 = vst.msk [vmem:[%s235_s21] sm:$0xff] %vm2163_vm12, %v2162_v1 }
 0x5dd PF: > { %s16_s18 = sadd.s32 1, %s2361_s18  }
 0x5de   : > { %p13_p4 = scmp.ge.s32.totalorder %s16_s18, 4  }
 0x5e0   :  { %15 = sbr.rel (!%p13_p4) target bundleno = 1 (0x1), region = 81 }

</bundles_post_ra>
